<compile_context>
chip_gen: v7x
topology: tpu7x:2x2x1
jax: 0.10.0
libtpu: 0.0.40
codegen_flags: <defaults>
</compile_context>

<pallas_src>
import functools
import math

import jax
import jax.numpy as jnp
import numpy as np
from jax.experimental import pallas as pl
from jax.experimental.pallas import tpu as pltpu


# ----------------------------------------------------------------------------
# Small helpers.
# ----------------------------------------------------------------------------
def _round_up(n, m):
    return ((n + m - 1) // m) * m


def _pick_time_block(total, target):
    """Divisor of `total` that is <= target and (== total or a multiple of 8)."""
    for ts in range(min(target, total), 0, -1):
        if total % ts == 0 and (ts == total or ts % 8 == 0):
            return ts
    return total


def _pick_row_block(total, target, align=8):
    blk = min(target, total)
    while blk > 1 and (total % blk != 0 or (blk != total and blk % align != 0)):
        blk -= 1
    if total % blk != 0 or (blk != total and blk % align != 0):
        blk = total
    return blk


def _resident_spec(block_shape, index_map):
    """Constant-index BlockSpec; single-buffered where supported.

    Default pipelining double-buffers even never-changing blocks; Buffered(1)
    halves resident weight VMEM at zero perf cost.
    """
    try:
        return pl.BlockSpec(block_shape, index_map,
                            pipeline_mode=pl.Buffered(1))
    except (AttributeError, TypeError):
        return pl.BlockSpec(block_shape, index_map)


def _pad_gate_weight(w, d_in_pad, h, h_pad):
    """(d_in, 4h) -> (d_in_pad, 4*h_pad) keeping (i,f,g,o) blocks lane-aligned."""
    d_in = w.shape[0]
    w4 = w.reshape(d_in, 4, h)
    w4 = jnp.pad(w4, ((0, d_in_pad - d_in), (0, 0), (0, h_pad - h)))
    return w4.reshape(d_in_pad, 4 * h_pad)


def _pad_gate_bias(b, h, h_pad):
    """(1, 4h) -> (1, 4*h_pad), zero padded gate blocks."""
    b4 = b.reshape(1, 4, h)
    b4 = jnp.pad(b4, ((0, 0), (0, 0), (0, h_pad - h)))
    return b4.reshape(1, 4 * h_pad)


def _vmem_limit_bytes(w_ih_list, w_hh, b, ts, bb, d0_pad, h_pad, num_layers):
    f32 = 4
    wbytes = sum(int(w.size) * w.dtype.itemsize for w in w_ih_list)
    wbytes += int(w_hh.size) * w_hh.dtype.itemsize
    wbytes += int(b.size) * b.dtype.itemsize
    act = 2 * ts * bb * d0_pad * f32                     # x blocks (double buf)
    act += 2 * bb * ts * h_pad * f32                     # y blocks
    act += 4 * 2 * num_layers * bb * h_pad * f32         # h0/c0/hT/cT blocks
    scratch = ts * bb * 4 * h_pad * f32 + ts * bb * h_pad * f32
    est = wbytes + act + scratch
    return int(min(64 * 1024 * 1024, max(32 * 1024 * 1024, 2 * est)))


# ----------------------------------------------------------------------------
# Fused multi-layer LSTM kernel: one grid step == one (batch-block, time-block).
# ----------------------------------------------------------------------------
def _fused_lstm_kernel(x_ref, *refs, num_layers, hidden_pad, ts, bb, d0_pad):
    L = num_layers
    H = hidden_pad
    wih_refs = refs[:L]
    whh_ref, b_ref, h0_ref, c0_ref = refs[L:L + 4]
    y_ref, hT_ref, cT_ref = refs[L + 4:L + 7]
    gx_scr, h_scr = refs[L + 7:L + 9]

    tb = pl.program_id(1)                 # time-block index ("arbitrary" axis)

    @pl.when(tb == 0)
    def _():
        hT_ref[...] = h0_ref[...]
        cT_ref[...] = c0_ref[...]

    n_rows = ts * bb

    for layer in range(L):
        w_dtype = wih_refs[layer].dtype
        if layer == 0:
            inp2d = x_ref[...].reshape(n_rows, d0_pad)
        else:
            inp2d = h_scr[...].reshape(n_rows, H)   # previous layer, in VMEM

        # Hoisted input projection: ONE (ts*bb, Din) x (Din, 4H) MXU matmul
        # (+ bias) per layer per time-block, staged into VMEM scratch.
        gx = (jnp.dot(inp2d.astype(w_dtype), wih_refs[layer][...],
                      preferred_element_type=jnp.float32)
              + b_ref[layer].astype(jnp.float32))
        gx_scr[...] = gx.reshape(ts, bb, 4 * H)

        # TODO(synk): hold W_hh in the MXU staging registers across the whole
        # time-block via pltpu.matmul_push_rhs/matmul_acc_lhs/matmul_pop.
        whh = whh_ref[layer]                             # (H, 4H) loop-invariant
        h_init = hT_ref[layer].astype(jnp.float32)       # (bb, H)
        c_init = cT_ref[layer].astype(jnp.float32)

        def step(s, carry, whh=whh, w_dtype=w_dtype):
            h, c = carry
            g = gx_scr[s] + jnp.dot(h.astype(w_dtype), whh,
                                    preferred_element_type=jnp.float32)
            i_g = jax.nn.sigmoid(g[:, 0 * H:1 * H])
            f_g = jax.nn.sigmoid(g[:, 1 * H:2 * H])
            g_g = jnp.tanh(g[:, 2 * H:3 * H])
            o_g = jax.nn.sigmoid(g[:, 3 * H:4 * H])
            c = f_g * c + i_g * g_g
            h = o_g * jnp.tanh(c)
            h_scr[s] = h                                 # dense (bb, H) store
            return h, c

        h, c = jax.lax.fori_loop(0, ts, step, (h_init, c_init), unroll=True)

        # Single carry writeback per time-block (not per step).
        hT_ref[layer] = h.astype(hT_ref.dtype)
        cT_ref[layer] = c.astype(cT_ref.dtype)

    # Last layer's hiddens -> batch-major (bb, ts, H) output block so the
    # wrapper's view(-1, H) needs no HBM transpose.  Static, lane-dense stores.
    for b_i in range(bb):
        y_ref[b_i] = h_scr[:, b_i, :].astype(y_ref.dtype)


def lstm_fused_pallas(x_tbd, w_ih_list, w_hh, b, h0, c0, *,
                      time_block=16, batch_block=8):
    """All LSTM layers in one pallas_call.

    x_tbd : (T, Bp, D0p) f32 (Bp % 8 == 0, D0p % 128 == 0)
    w_ih_list[l] : (Din_l_pad, 4*Hp); w_hh : (L, Hp, 4*Hp); b : (L, 1, 4*Hp)
    h0, c0 : (L, Bp, Hp)
    Returns y (Bp, T, Hp) batch-major, hT (L, Bp, Hp), cT (L, Bp, Hp).
    """
    T, Bp, D0p = x_tbd.shape
    L, Hp, H4 = w_hh.shape
    ts = _pick_time_block(T, time_block)
    bb = batch_block if Bp % batch_block == 0 else Bp
    grid = (Bp // bb, T // ts)

    kernel = functools.partial(_fused_lstm_kernel, num_layers=L,
                               hidden_pad=Hp, ts=ts, bb=bb, d0_pad=D0p)

    in_specs = [pl.BlockSpec((ts, bb, D0p), lambda bk, tb: (tb, bk, 0))]
    for w in w_ih_list:
        in_specs.append(_resident_spec(w.shape, lambda bk, tb: (0, 0)))
    in_specs += [
        _resident_spec((L, Hp, H4), lambda bk, tb: (0, 0, 0)),
        _resident_spec((L, 1, H4), lambda bk, tb: (0, 0, 0)),
        pl.BlockSpec((L, bb, Hp), lambda bk, tb: (0, bk, 0)),
        pl.BlockSpec((L, bb, Hp), lambda bk, tb: (0, bk, 0)),
    ]
    out_specs = [
        pl.BlockSpec((bb, ts, Hp), lambda bk, tb: (bk, tb, 0)),
        pl.BlockSpec((L, bb, Hp), lambda bk, tb: (0, bk, 0)),
        pl.BlockSpec((L, bb, Hp), lambda bk, tb: (0, bk, 0)),
    ]
    out_shape = [
        jax.ShapeDtypeStruct((Bp, T, Hp), jnp.float32),
        jax.ShapeDtypeStruct((L, Bp, Hp), jnp.float32),
        jax.ShapeDtypeStruct((L, Bp, Hp), jnp.float32),
    ]
    scratch_shapes = [
        pltpu.VMEM((ts, bb, H4), jnp.float32),   # staged gate pre-activations
        pltpu.VMEM((ts, bb, Hp), jnp.float32),   # per-layer block hiddens
    ]
    vmem_limit = _vmem_limit_bytes(w_ih_list, w_hh, b, ts, bb, D0p, Hp, L)

    y, hT, cT = pl.pallas_call(
        kernel, grid=grid,
        in_specs=in_specs, out_specs=out_specs, out_shape=out_shape,
        scratch_shapes=scratch_shapes,
        compiler_params=pltpu.CompilerParams(
            dimension_semantics=("parallel", "arbitrary"),
            vmem_limit_bytes=vmem_limit),
    )(x_tbd, *w_ih_list, w_hh, b, h0, c0)
    return y, hT, cT


# ----------------------------------------------------------------------------
# Projection + (optional temperature) + LogSoftmax kernel (row-blocked).
# ----------------------------------------------------------------------------
def _proj_logsoftmax_kernel(x_ref, w_ref, b_ref, o_ref, *, inv_temp):
    logits = (jnp.dot(x_ref[...].astype(w_ref.dtype), w_ref[...],
                      preferred_element_type=jnp.float32)
              + b_ref[...])
    logits = logits * inv_temp
    m = jnp.max(logits, axis=-1, keepdims=True)
    s = logits - m
    lse = jnp.log(jnp.sum(jnp.exp(s), axis=-1, keepdims=True))
    o_ref[...] = s - lse


def projection_logsoftmax_pallas(x, w, b, temperature=None, *, row_block=256):
    """x: (N, Hp), w: (Hp, V), b: (V,) -> log-probs (N, V); V padded to 128."""
    N, Hp = x.shape
    V = w.shape[1]
    Vp = _round_up(V, 128)
    # Padded vocab columns get a ~-inf bias so they vanish from the softmax.
    w_p = jnp.pad(w, ((0, 0), (0, Vp - V)))
    b_p = jnp.pad(b.astype(jnp.float32), (0, Vp - V),
                  constant_values=-1e30).reshape(1, Vp)
    tn = _pick_row_block(N, row_block)
    inv_temp = 1.0 if temperature is None else 1.0 / float(temperature)
    kernel = functools.partial(_proj_logsoftmax_kernel, inv_temp=inv_temp)
    out = pl.pallas_call(
        kernel, grid=(N // tn,),
        in_specs=[
            pl.BlockSpec((tn, Hp), lambda i: (i, 0)),
            _resident_spec((Hp, Vp), lambda i: (0, 0)),
            _resident_spec((1, Vp), lambda i: (0, 0)),
        ],
        out_specs=pl.BlockSpec((tn, Vp), lambda i: (i, 0)),
        out_shape=jax.ShapeDtypeStruct((N, Vp), jnp.float32),
        compiler_params=pltpu.CompilerParams(
            dimension_semantics=("parallel",)),
    )(x, w_p, b_p)
    return out[:, :V]


# ----------------------------------------------------------------------------
# Full VaxLSTM forward (embeddings = JAX glue, recurrence/projection = Pallas).
# ----------------------------------------------------------------------------
def vaxlstm_forward(params, input_sequences, hidden, input_immunogenicity,
                    temperature=None, return_hidden=False):
    # TODO(synk): nn.Embedding gathers stay as JAX takes (no matmul hot path).
    if input_sequences.ndim == 1:                       # generation path
        input_sequences = input_sequences[:, None]
    B, T = input_sequences.shape

    # Build the LSTM input directly time-major: (T, B, H + C).
    emb = params["sequence_embeddings"][input_sequences.swapaxes(0, 1)]
    imm = params["immunogenicity_embedding"][input_immunogenicity]
    H = emb.shape[-1]
    C = imm.shape[-1]
    L = params["num_layers"]
    x = jnp.concatenate(
        [emb, jnp.broadcast_to(imm[None, :, :], (T, B, C))], axis=2)

    # Pad to TPU-friendly shapes: 128 lanes on features, 8 sublanes on batch.
    D0, Hp = H + C, _round_up(H, 128)
    D0p, Bp = _round_up(D0, 128), _round_up(B, 8)
    x = jnp.pad(x.astype(jnp.float32), ((0, 0), (0, Bp - B), (0, D0p - D0)))

    h0_all, c0_all = hidden
    h0 = jnp.pad(jnp.asarray(h0_all, jnp.float32),
                 ((0, 0), (0, Bp - B), (0, Hp - H)))
    c0 = jnp.pad(jnp.asarray(c0_all, jnp.float32),
                 ((0, 0), (0, Bp - B), (0, Hp - H)))

    # TODO(synk): hoist the weight padding out of the forward for production.
    w_ih_list = []
    for layer in range(L):
        d_in_p = D0p if layer == 0 else Hp
        w_ih_list.append(_pad_gate_weight(params["w_ih"][layer], d_in_p, H, Hp))
    w_hh = jnp.stack([_pad_gate_weight(params["w_hh"][layer], Hp, H, Hp)
                      for layer in range(L)])
    b = jnp.stack([_pad_gate_bias(params["b"][layer], H, Hp)
                   for layer in range(L)])

    y, hT, cT = lstm_fused_pallas(x, w_ih_list, w_hh, b, h0, c0)

    # batch_first contiguous().view(-1, H): y is already (B, T, Hp) batch-major.
    enc = y[:B].reshape(B * T, Hp)
    proj_w = jnp.pad(params["proj_w"], ((0, Hp - H), (0, 0)))
    logp = projection_logsoftmax_pallas(enc, proj_w, params["proj_b"],
                                        temperature)
    if return_hidden:
        return logp, (hT[:, :B, :H], cT[:, :B, :H])
    return logp


# ----------------------------------------------------------------------------
# Pure-JAX reference (for correctness check).
# ----------------------------------------------------------------------------
def _lstm_layer_ref(x_tbd, w_ih, w_hh, b, h0, c0):
    def step(carry, x_t):
        h, c = carry
        gates = x_t @ w_ih + h @ w_hh + b[0]
        i, f, g, o = jnp.split(gates, 4, axis=-1)
        i = jax.nn.sigmoid(i)
        f = jax.nn.sigmoid(f)
        g = jnp.tanh(g)
        o = jax.nn.sigmoid(o)
        c = f * c + i * g
        h = o * jnp.tanh(c)
        return (h, c), h

    (hT, cT), y = jax.lax.scan(step, (h0, c0), x_tbd)
    return y, hT, cT


def vaxlstm_forward_ref(params, input_sequences, hidden, input_immunogenicity,
                        temperature=None, return_hidden=False):
    emb = params["sequence_embeddings"][input_sequences]
    imm = params["immunogenicity_embedding"][input_immunogenicity]
    B, T, H = emb.shape
    C = imm.shape[-1]
    x = jnp.concatenate(
        [emb, jnp.broadcast_to(imm[:, None, :], (B, T, C))], axis=2)
    x_tbd = jnp.transpose(x, (1, 0, 2)).astype(jnp.float32)
    h0_all, c0_all = hidden
    h_fin, c_fin = [], []
    for layer in range(params["num_layers"]):
        x_tbd, hT, cT = _lstm_layer_ref(
            x_tbd, params["w_ih"][layer], params["w_hh"][layer],
            params["b"][layer], h0_all[layer], c0_all[layer])
        h_fin.append(hT)
        c_fin.append(cT)
    enc = jnp.transpose(x_tbd, (1, 0, 2)).reshape(B * T, H)
    logits = enc @ params["proj_w"] + params["proj_b"]
    if temperature is not None:
        logits = logits / temperature
    logp = jax.nn.log_softmax(logits, axis=-1)
    if return_hidden:
        return logp, (jnp.stack(h_fin), jnp.stack(c_fin))
    return logp


# ----------------------------------------------------------------------------
# Deterministic parameter construction.
# ----------------------------------------------------------------------------
def init_params(key, *, vocab_size, hidden_dim, conditional, num_layers,
                padding_idx, param_dtype=jnp.float32):
    keys = jax.random.split(key, 6 + 3 * num_layers)
    k_scale = 1.0 / math.sqrt(hidden_dim)

    seq_emb = jax.random.normal(keys[0], (vocab_size, hidden_dim), jnp.float32)
    seq_emb = seq_emb.at[padding_idx].set(0.0)          # padding_idx row zero
    imm_emb = jax.random.normal(keys[1], (conditional, conditional),
                                jnp.float32)

    w_ih, w_hh, b = [], [], []
    for layer in range(num_layers):
        d_in = hidden_dim + conditional if layer == 0 else hidden_dim
        w_ih.append(jax.random.uniform(keys[2 + 3 * layer],
                                       (d_in, 4 * hidden_dim), jnp.float32,
                                       -k_scale, k_scale).astype(param_dtype))
        w_hh.append(jax.random.uniform(keys[3 + 3 * layer],
                                       (hidden_dim, 4 * hidden_dim),
                                       jnp.float32, -k_scale,
                                       k_scale).astype(param_dtype))
        b.append(jax.random.uniform(keys[4 + 3 * layer],
                                    (1, 4 * hidden_dim), jnp.float32,
                                    -k_scale, k_scale))

    proj_w = jax.random.uniform(keys[-2], (hidden_dim, vocab_size),
                                jnp.float32, -k_scale,
                                k_scale).astype(param_dtype)
    proj_b = jax.random.uniform(keys[-1], (vocab_size,), jnp.float32,
                                -k_scale, k_scale)

    return dict(sequence_embeddings=seq_emb,
                immunogenicity_embedding=imm_emb,
                w_ih=w_ih, w_hh=w_hh, b=b,
                proj_w=proj_w, proj_b=proj_b,
                num_layers=num_layers)


if __name__ == "__main__":
    B, T = 2, 8
    HIDDEN = 32
    CONDITIONAL = 4        # len(CAI_TEMPLATE)
    VOCAB = 66             # len(CODON_INDICES) + 1
    NUM_LAYERS = 2
    PADDING_IDX = 0

    root = jax.random.PRNGKey(0)
    kp, ks, ki = jax.random.split(root, 3)

    input_sequences = jax.random.randint(ks, (B, T), 1, VOCAB)        # (B, T)
    input_immunogenicity = jax.random.randint(ki, (B,), 0, CONDITIONAL)
    hidden = (jnp.zeros((NUM_LAYERS, B, HIDDEN), jnp.float32),
              jnp.zeros((NUM_LAYERS, B, HIDDEN), jnp.float32))

    # --- f32 weights: strict correctness check against pure-JAX reference ---
    params = init_params(kp, vocab_size=VOCAB, hidden_dim=HIDDEN,
                         conditional=CONDITIONAL, num_layers=NUM_LAYERS,
                         padding_idx=PADDING_IDX, param_dtype=jnp.float32)

    logp, new_hidden = vaxlstm_forward(params, input_sequences, hidden,
                                       input_immunogenicity,
                                       temperature=None, return_hidden=True)
    logp = jax.block_until_ready(logp)
    jax.block_until_ready(new_hidden)

    ref_logp, ref_hidden = vaxlstm_forward_ref(params, input_sequences, hidden,
                                               input_immunogenicity,
                                               temperature=None,
                                               return_hidden=True)
    ref_logp = jax.block_until_ready(ref_logp)

    assert logp.shape == (B * T, VOCAB), logp.shape
    assert new_hidden[0].shape == (NUM_LAYERS, B, HIDDEN)
    assert bool(jnp.all(jnp.isfinite(logp)))
    np.testing.assert_allclose(np.asarray(logp), np.asarray(ref_logp),
                               rtol=1e-2, atol=1e-2)
    np.testing.assert_allclose(np.asarray(new_hidden[0]),
                               np.asarray(ref_hidden[0]), rtol=1e-2, atol=1e-2)
    np.testing.assert_allclose(np.asarray(new_hidden[1]),
                               np.asarray(ref_hidden[1]), rtol=1e-2, atol=1e-2)

    # --- bf16 weights: fast-MXU path smoke test (gate math / c stay f32) ---
    params_bf16 = init_params(kp, vocab_size=VOCAB, hidden_dim=HIDDEN,
                              conditional=CONDITIONAL, num_layers=NUM_LAYERS,
                              padding_idx=PADDING_IDX,
                              param_dtype=jnp.bfloat16)
    logp_bf16 = vaxlstm_forward(params_bf16, input_sequences, hidden,
                                input_immunogenicity)
    logp_bf16 = jax.block_until_ready(logp_bf16)
    assert logp_bf16.shape == (B * T, VOCAB)
    assert bool(jnp.all(jnp.isfinite(logp_bf16)))

    print("KERNEL_OK")
</pallas_src>

<mosaic_0001>
module attributes {stable_mosaic.version = 11 : i64} {
  func.func @_fused_lstm_kernel(%arg0: i32, %arg1: i32, %arg2: memref<8x8x128xf32, #tpu.memory_space<vmem>>, %arg3: memref<128x512xf32, #tpu.memory_space<vmem>>, %arg4: memref<128x512xf32, #tpu.memory_space<vmem>>, %arg5: memref<2x128x512xf32, #tpu.memory_space<vmem>>, %arg6: memref<2x1x512xf32, #tpu.memory_space<vmem>>, %arg7: memref<2x8x128xf32, #tpu.memory_space<vmem>>, %arg8: memref<2x8x128xf32, #tpu.memory_space<vmem>>, %arg9: memref<8x8x128xf32, #tpu.memory_space<vmem>>, %arg10: memref<2x8x128xf32, #tpu.memory_space<vmem>>, %arg11: memref<2x8x128xf32, #tpu.memory_space<vmem>>, %arg12: memref<8x8x512xf32, #tpu.memory_space<vmem>>, %arg13: memref<8x8x128xf32, #tpu.memory_space<vmem>>) attributes {dimension_semantics = [#tpu.dimension_semantics<parallel>, #tpu.dimension_semantics<arbitrary>], iteration_bounds = array<i64: 1, 1>, scalar_prefetch = 0 : i64, scratch_operands = 2 : i64, tpu.core_type = #tpu.core_type<tc>, window_params = [{transform_indices = @transform_0, window_bounds = array<i64: 8, 8, 128>}, {pipeline_mode = #tpu.pipeline_mode<synchronous>, transform_indices = @transform_1, window_bounds = array<i64: 128, 512>}, {pipeline_mode = #tpu.pipeline_mode<synchronous>, transform_indices = @transform_2, window_bounds = array<i64: 128, 512>}, {pipeline_mode = #tpu.pipeline_mode<synchronous>, transform_indices = @transform_3, window_bounds = array<i64: 2, 128, 512>}, {pipeline_mode = #tpu.pipeline_mode<synchronous>, transform_indices = @transform_4, window_bounds = array<i64: 2, 1, 512>}, {transform_indices = @transform_5, window_bounds = array<i64: 2, 8, 128>}, {transform_indices = @transform_6, window_bounds = array<i64: 2, 8, 128>}, {transform_indices = @transform_7, window_bounds = array<i64: 8, 8, 128>}, {transform_indices = @transform_8, window_bounds = array<i64: 2, 8, 128>}, {transform_indices = @transform_9, window_bounds = array<i64: 2, 8, 128>}]} {
    %c0_i32 = arith.constant 0 : i32
    %0 = arith.cmpi eq, %arg1, %c0_i32 : i32
    %1 = arith.extui %0 : i1 to i32
    %c0_i32_0 = arith.constant 0 : i32
    %2 = arith.cmpi ne, %1, %c0_i32_0 : i32
    scf.if %2 {
      %c0_232 = arith.constant 0 : index
      %c0_233 = arith.constant 0 : index
      %c0_234 = arith.constant 0 : index
      %631 = vector.load %arg7[%c0_232, %c0_233, %c0_234] : memref<2x8x128xf32, #tpu.memory_space<vmem>>, vector<2x8x128xf32>
      %c0_235 = arith.constant 0 : index
      %c0_236 = arith.constant 0 : index
      %c0_237 = arith.constant 0 : index
      %632 = vector.load %arg10[%c0_235, %c0_236, %c0_237] : memref<2x8x128xf32, #tpu.memory_space<vmem>>, vector<2x8x128xf32>
      tpu.vector_store %arg10[%c0_235, %c0_236, %c0_237], %631 {strides = array<i32>} : memref<2x8x128xf32, #tpu.memory_space<vmem>>, vector<2x8x128xf32>,
      %c0_238 = arith.constant 0 : index
      %c0_239 = arith.constant 0 : index
      %c0_240 = arith.constant 0 : index
      %633 = vector.load %arg8[%c0_238, %c0_239, %c0_240] : memref<2x8x128xf32, #tpu.memory_space<vmem>>, vector<2x8x128xf32>
      %c0_241 = arith.constant 0 : index
      %c0_242 = arith.constant 0 : index
      %c0_243 = arith.constant 0 : index
      %634 = vector.load %arg11[%c0_241, %c0_242, %c0_243] : memref<2x8x128xf32, #tpu.memory_space<vmem>>, vector<2x8x128xf32>
      tpu.vector_store %arg11[%c0_241, %c0_242, %c0_243], %633 {strides = array<i32>} : memref<2x8x128xf32, #tpu.memory_space<vmem>>, vector<2x8x128xf32>,
    } else {
    }
    %c0 = arith.constant 0 : index
    %c0_1 = arith.constant 0 : index
    %c0_2 = arith.constant 0 : index
    %3 = vector.load %arg2[%c0, %c0_1, %c0_2] : memref<8x8x128xf32, #tpu.memory_space<vmem>>, vector<8x8x128xf32>
    %4 = vector.shape_cast %3 : vector<8x8x128xf32> to vector<64x128xf32>
    %c0_3 = arith.constant 0 : index
    %c0_4 = arith.constant 0 : index
    %5 = vector.load %arg3[%c0_3, %c0_4] : memref<128x512xf32, #tpu.memory_space<vmem>>, vector<128x512xf32>
    %cst = arith.constant dense<0.000000e+00> : vector<64x512xf32>
    %6 = tpu.matmul %4, %5, %cst {dimension_numbers = #tpu.dot_dimension_numbers<[1], [0], [0], [1], [0, 0, 1, 1], [], []>} : vector<64x128xf32>, vector<128x512xf32>, vector<64x512xf32> -> vector<64x512xf32>
    %c0_5 = arith.constant 0 : index
    %c0_6 = arith.constant 0 : index
    %c0_7 = arith.constant 0 : index
    %7 = vector.load %arg6[%c0_5, %c0_6, %c0_7] : memref<2x1x512xf32, #tpu.memory_space<vmem>>, vector<1x1x512xf32>
    %8 = vector.shape_cast %7 : vector<1x1x512xf32> to vector<1x512xf32>
    %9 = vector.broadcast %8 : vector<1x512xf32> to vector<64x512xf32>
    %10 = arith.addf %6, %9 : vector<64x512xf32>
    %11 = vector.shape_cast %10 : vector<64x512xf32> to vector<8x8x512xf32>
    %c0_8 = arith.constant 0 : index
    %c0_9 = arith.constant 0 : index
    %c0_10 = arith.constant 0 : index
    %12 = vector.load %arg12[%c0_8, %c0_9, %c0_10] : memref<8x8x512xf32, #tpu.memory_space<vmem>>, vector<8x8x512xf32>
    tpu.vector_store %arg12[%c0_8, %c0_9, %c0_10], %11 {strides = array<i32>} : memref<8x8x512xf32, #tpu.memory_space<vmem>>, vector<8x8x512xf32>,
    %c0_11 = arith.constant 0 : index
    %c0_12 = arith.constant 0 : index
    %c0_13 = arith.constant 0 : index
    %13 = vector.load %arg5[%c0_11, %c0_12, %c0_13] : memref<2x128x512xf32, #tpu.memory_space<vmem>>, vector<1x128x512xf32>
    %14 = vector.shape_cast %13 : vector<1x128x512xf32> to vector<128x512xf32>
    %c0_14 = arith.constant 0 : index
    %c0_15 = arith.constant 0 : index
    %c0_16 = arith.constant 0 : index
    %15 = vector.load %arg10[%c0_14, %c0_15, %c0_16] : memref<2x8x128xf32, #tpu.memory_space<vmem>>, vector<1x8x128xf32>
    %16 = vector.shape_cast %15 : vector<1x8x128xf32> to vector<8x128xf32>
    %c0_17 = arith.constant 0 : index
    %c0_18 = arith.constant 0 : index
    %c0_19 = arith.constant 0 : index
    %17 = vector.load %arg11[%c0_17, %c0_18, %c0_19] : memref<2x8x128xf32, #tpu.memory_space<vmem>>, vector<1x8x128xf32>
    %18 = vector.shape_cast %17 : vector<1x8x128xf32> to vector<8x128xf32>
    %c0_i32_20 = arith.constant 0 : i32
    %19 = arith.index_cast %c0_i32_20 : i32 to index
    %c0_21 = arith.constant 0 : index
    %c0_22 = arith.constant 0 : index
    %20 = vector.load %arg12[%19, %c0_21, %c0_22] : memref<8x8x512xf32, #tpu.memory_space<vmem>>, vector<1x8x512xf32>
    %21 = vector.shape_cast %20 : vector<1x8x512xf32> to vector<8x512xf32>
    %cst_23 = arith.constant dense<0.000000e+00> : vector<8x512xf32>
    %22 = tpu.matmul %16, %14, %cst_23 {dimension_numbers = #tpu.dot_dimension_numbers<[1], [0], [0], [1], [0, 0, 1, 1], [], []>} : vector<8x128xf32>, vector<128x512xf32>, vector<8x512xf32> -> vector<8x512xf32>
    %23 = arith.addf %21, %22 : vector<8x512xf32>
    %24 = vector.extract_strided_slice %23 {offsets = [0, 0], sizes = [8, 128], strides = [1, 1]} : vector<8x512xf32> to vector<8x128xf32>
    %25 = arith.negf %24 : vector<8x128xf32>
    %26 = math.exp %25 : vector<8x128xf32>
    %cst_24 = arith.constant 1.000000e+00 : f32
    %27 = vector.broadcast %cst_24 : f32 to vector<8x128xf32>
    %28 = arith.addf %27, %26 : vector<8x128xf32>
    %29 = arith.divf %27, %28 : vector<8x128xf32>
    %30 = vector.extract_strided_slice %23 {offsets = [0, 128], sizes = [8, 128], strides = [1, 1]} : vector<8x512xf32> to vector<8x128xf32>
    %31 = arith.negf %30 : vector<8x128xf32>
    %32 = math.exp %31 : vector<8x128xf32>
    %cst_25 = arith.constant 1.000000e+00 : f32
    %33 = vector.broadcast %cst_25 : f32 to vector<8x128xf32>
    %34 = arith.addf %33, %32 : vector<8x128xf32>
    %35 = arith.divf %33, %34 : vector<8x128xf32>
    %36 = vector.extract_strided_slice %23 {offsets = [0, 256], sizes = [8, 128], strides = [1, 1]} : vector<8x512xf32> to vector<8x128xf32>
    %37 = math.tanh %36 : vector<8x128xf32>
    %38 = vector.extract_strided_slice %23 {offsets = [0, 384], sizes = [8, 128], strides = [1, 1]} : vector<8x512xf32> to vector<8x128xf32>
    %39 = arith.negf %38 : vector<8x128xf32>
    %40 = math.exp %39 : vector<8x128xf32>
    %cst_26 = arith.constant 1.000000e+00 : f32
    %41 = vector.broadcast %cst_26 : f32 to vector<8x128xf32>
    %42 = arith.addf %41, %40 : vector<8x128xf32>
    %43 = arith.divf %41, %42 : vector<8x128xf32>
    %44 = arith.mulf %35, %18 : vector<8x128xf32>
    %45 = arith.mulf %29, %37 : vector<8x128xf32>
    %46 = arith.addf %44, %45 : vector<8x128xf32>
    %47 = math.tanh %46 : vector<8x128xf32>
    %48 = arith.mulf %43, %47 : vector<8x128xf32>
    %49 = arith.index_cast %c0_i32_20 : i32 to index
    %c0_27 = arith.constant 0 : index
    %c0_28 = arith.constant 0 : index
    %50 = vector.load %arg13[%49, %c0_27, %c0_28] : memref<8x8x128xf32, #tpu.memory_space<vmem>>, vector<1x8x128xf32>
    %51 = vector.shape_cast %50 : vector<1x8x128xf32> to vector<8x128xf32>
    %52 = vector.shape_cast %48 : vector<8x128xf32> to vector<1x8x128xf32>
    tpu.vector_store %arg13[%49, %c0_27, %c0_28], %52 {strides = array<i32>} : memref<8x8x128xf32, #tpu.memory_space<vmem>>, vector<1x8x128xf32>,
    %c1_i32 = arith.constant 1 : i32
    %53 = arith.index_cast %c1_i32 : i32 to index
    %c0_29 = arith.constant 0 : index
    %c0_30 = arith.constant 0 : index
    %54 = vector.load %arg12[%53, %c0_29, %c0_30] : memref<8x8x512xf32, #tpu.memory_space<vmem>>, vector<1x8x512xf32>
    %55 = vector.shape_cast %54 : vector<1x8x512xf32> to vector<8x512xf32>
    %cst_31 = arith.constant dense<0.000000e+00> : vector<8x512xf32>
    %56 = tpu.matmul %48, %14, %cst_31 {dimension_numbers = #tpu.dot_dimension_numbers<[1], [0], [0], [1], [0, 0, 1, 1], [], []>} : vector<8x128xf32>, vector<128x512xf32>, vector<8x512xf32> -> vector<8x512xf32>
    %57 = arith.addf %55, %56 : vector<8x512xf32>
    %58 = vector.extract_strided_slice %57 {offsets = [0, 0], sizes = [8, 128], strides = [1, 1]} : vector<8x512xf32> to vector<8x128xf32>
    %59 = arith.negf %58 : vector<8x128xf32>
    %60 = math.exp %59 : vector<8x128xf32>
    %cst_32 = arith.constant 1.000000e+00 : f32
    %61 = vector.broadcast %cst_32 : f32 to vector<8x128xf32>
    %62 = arith.addf %61, %60 : vector<8x128xf32>
    %63 = arith.divf %61, %62 : vector<8x128xf32>
    %64 = vector.extract_strided_slice %57 {offsets = [0, 128], sizes = [8, 128], strides = [1, 1]} : vector<8x512xf32> to vector<8x128xf32>
    %65 = arith.negf %64 : vector<8x128xf32>
    %66 = math.exp %65 : vector<8x128xf32>
    %cst_33 = arith.constant 1.000000e+00 : f32
    %67 = vector.broadcast %cst_33 : f32 to vector<8x128xf32>
    %68 = arith.addf %67, %66 : vector<8x128xf32>
    %69 = arith.divf %67, %68 : vector<8x128xf32>
    %70 = vector.extract_strided_slice %57 {offsets = [0, 256], sizes = [8, 128], strides = [1, 1]} : vector<8x512xf32> to vector<8x128xf32>
    %71 = math.tanh %70 : vector<8x128xf32>
    %72 = vector.extract_strided_slice %57 {offsets = [0, 384], sizes = [8, 128], strides = [1, 1]} : vector<8x512xf32> to vector<8x128xf32>
    %73 = arith.negf %72 : vector<8x128xf32>
    %74 = math.exp %73 : vector<8x128xf32>
    %cst_34 = arith.constant 1.000000e+00 : f32
    %75 = vector.broadcast %cst_34 : f32 to vector<8x128xf32>
    %76 = arith.addf %75, %74 : vector<8x128xf32>
    %77 = arith.divf %75, %76 : vector<8x128xf32>
    %78 = arith.mulf %69, %46 : vector<8x128xf32>
    %79 = arith.mulf %63, %71 : vector<8x128xf32>
    %80 = arith.addf %78, %79 : vector<8x128xf32>
    %81 = math.tanh %80 : vector<8x128xf32>
    %82 = arith.mulf %77, %81 : vector<8x128xf32>
    %83 = arith.index_cast %c1_i32 : i32 to index
    %c0_35 = arith.constant 0 : index
    %c0_36 = arith.constant 0 : index
    %84 = vector.load %arg13[%83, %c0_35, %c0_36] : memref<8x8x128xf32, #tpu.memory_space<vmem>>, vector<1x8x128xf32>
    %85 = vector.shape_cast %84 : vector<1x8x128xf32> to vector<8x128xf32>
    %86 = vector.shape_cast %82 : vector<8x128xf32> to vector<1x8x128xf32>
    tpu.vector_store %arg13[%83, %c0_35, %c0_36], %86 {strides = array<i32>} : memref<8x8x128xf32, #tpu.memory_space<vmem>>, vector<1x8x128xf32>,
    %c2_i32 = arith.constant 2 : i32
    %87 = arith.index_cast %c2_i32 : i32 to index
    %c0_37 = arith.constant 0 : index
    %c0_38 = arith.constant 0 : index
    %88 = vector.load %arg12[%87, %c0_37, %c0_38] : memref<8x8x512xf32, #tpu.memory_space<vmem>>, vector<1x8x512xf32>
    %89 = vector.shape_cast %88 : vector<1x8x512xf32> to vector<8x512xf32>
    %cst_39 = arith.constant dense<0.000000e+00> : vector<8x512xf32>
    %90 = tpu.matmul %82, %14, %cst_39 {dimension_numbers = #tpu.dot_dimension_numbers<[1], [0], [0], [1], [0, 0, 1, 1], [], []>} : vector<8x128xf32>, vector<128x512xf32>, vector<8x512xf32> -> vector<8x512xf32>
    %91 = arith.addf %89, %90 : vector<8x512xf32>
    %92 = vector.extract_strided_slice %91 {offsets = [0, 0], sizes = [8, 128], strides = [1, 1]} : vector<8x512xf32> to vector<8x128xf32>
    %93 = arith.negf %92 : vector<8x128xf32>
    %94 = math.exp %93 : vector<8x128xf32>
    %cst_40 = arith.constant 1.000000e+00 : f32
    %95 = vector.broadcast %cst_40 : f32 to vector<8x128xf32>
    %96 = arith.addf %95, %94 : vector<8x128xf32>
    %97 = arith.divf %95, %96 : vector<8x128xf32>
    %98 = vector.extract_strided_slice %91 {offsets = [0, 128], sizes = [8, 128], strides = [1, 1]} : vector<8x512xf32> to vector<8x128xf32>
    %99 = arith.negf %98 : vector<8x128xf32>
    %100 = math.exp %99 : vector<8x128xf32>
    %cst_41 = arith.constant 1.000000e+00 : f32
    %101 = vector.broadcast %cst_41 : f32 to vector<8x128xf32>
    %102 = arith.addf %101, %100 : vector<8x128xf32>
    %103 = arith.divf %101, %102 : vector<8x128xf32>
    %104 = vector.extract_strided_slice %91 {offsets = [0, 256], sizes = [8, 128], strides = [1, 1]} : vector<8x512xf32> to vector<8x128xf32>
    %105 = math.tanh %104 : vector<8x128xf32>
    %106 = vector.extract_strided_slice %91 {offsets = [0, 384], sizes = [8, 128], strides = [1, 1]} : vector<8x512xf32> to vector<8x128xf32>
    %107 = arith.negf %106 : vector<8x128xf32>
    %108 = math.exp %107 : vector<8x128xf32>
    %cst_42 = arith.constant 1.000000e+00 : f32
    %109 = vector.broadcast %cst_42 : f32 to vector<8x128xf32>
    %110 = arith.addf %109, %108 : vector<8x128xf32>
    %111 = arith.divf %109, %110 : vector<8x128xf32>
    %112 = arith.mulf %103, %80 : vector<8x128xf32>
    %113 = arith.mulf %97, %105 : vector<8x128xf32>
    %114 = arith.addf %112, %113 : vector<8x128xf32>
    %115 = math.tanh %114 : vector<8x128xf32>
    %116 = arith.mulf %111, %115 : vector<8x128xf32>
    %117 = arith.index_cast %c2_i32 : i32 to index
    %c0_43 = arith.constant 0 : index
    %c0_44 = arith.constant 0 : index
    %118 = vector.load %arg13[%117, %c0_43, %c0_44] : memref<8x8x128xf32, #tpu.memory_space<vmem>>, vector<1x8x128xf32>
    %119 = vector.shape_cast %118 : vector<1x8x128xf32> to vector<8x128xf32>
    %120 = vector.shape_cast %116 : vector<8x128xf32> to vector<1x8x128xf32>
    tpu.vector_store %arg13[%117, %c0_43, %c0_44], %120 {strides = array<i32>} : memref<8x8x128xf32, #tpu.memory_space<vmem>>, vector<1x8x128xf32>,
    %c3_i32 = arith.constant 3 : i32
    %121 = arith.index_cast %c3_i32 : i32 to index
    %c0_45 = arith.constant 0 : index
    %c0_46 = arith.constant 0 : index
    %122 = vector.load %arg12[%121, %c0_45, %c0_46] : memref<8x8x512xf32, #tpu.memory_space<vmem>>, vector<1x8x512xf32>
    %123 = vector.shape_cast %122 : vector<1x8x512xf32> to vector<8x512xf32>
    %cst_47 = arith.constant dense<0.000000e+00> : vector<8x512xf32>
    %124 = tpu.matmul %116, %14, %cst_47 {dimension_numbers = #tpu.dot_dimension_numbers<[1], [0], [0], [1], [0, 0, 1, 1], [], []>} : vector<8x128xf32>, vector<128x512xf32>, vector<8x512xf32> -> vector<8x512xf32>
    %125 = arith.addf %123, %124 : vector<8x512xf32>
    %126 = vector.extract_strided_slice %125 {offsets = [0, 0], sizes = [8, 128], strides = [1, 1]} : vector<8x512xf32> to vector<8x128xf32>
    %127 = arith.negf %126 : vector<8x128xf32>
    %128 = math.exp %127 : vector<8x128xf32>
    %cst_48 = arith.constant 1.000000e+00 : f32
    %129 = vector.broadcast %cst_48 : f32 to vector<8x128xf32>
    %130 = arith.addf %129, %128 : vector<8x128xf32>
    %131 = arith.divf %129, %130 : vector<8x128xf32>
    %132 = vector.extract_strided_slice %125 {offsets = [0, 128], sizes = [8, 128], strides = [1, 1]} : vector<8x512xf32> to vector<8x128xf32>
    %133 = arith.negf %132 : vector<8x128xf32>
    %134 = math.exp %133 : vector<8x128xf32>
    %cst_49 = arith.constant 1.000000e+00 : f32
    %135 = vector.broadcast %cst_49 : f32 to vector<8x128xf32>
    %136 = arith.addf %135, %134 : vector<8x128xf32>
    %137 = arith.divf %135, %136 : vector<8x128xf32>
    %138 = vector.extract_strided_slice %125 {offsets = [0, 256], sizes = [8, 128], strides = [1, 1]} : vector<8x512xf32> to vector<8x128xf32>
    %139 = math.tanh %138 : vector<8x128xf32>
    %140 = vector.extract_strided_slice %125 {offsets = [0, 384], sizes = [8, 128], strides = [1, 1]} : vector<8x512xf32> to vector<8x128xf32>
    %141 = arith.negf %140 : vector<8x128xf32>
    %142 = math.exp %141 : vector<8x128xf32>
    %cst_50 = arith.constant 1.000000e+00 : f32
    %143 = vector.broadcast %cst_50 : f32 to vector<8x128xf32>
    %144 = arith.addf %143, %142 : vector<8x128xf32>
    %145 = arith.divf %143, %144 : vector<8x128xf32>
    %146 = arith.mulf %137, %114 : vector<8x128xf32>
    %147 = arith.mulf %131, %139 : vector<8x128xf32>
    %148 = arith.addf %146, %147 : vector<8x128xf32>
    %149 = math.tanh %148 : vector<8x128xf32>
    %150 = arith.mulf %145, %149 : vector<8x128xf32>
    %151 = arith.index_cast %c3_i32 : i32 to index
    %c0_51 = arith.constant 0 : index
    %c0_52 = arith.constant 0 : index
    %152 = vector.load %arg13[%151, %c0_51, %c0_52] : memref<8x8x128xf32, #tpu.memory_space<vmem>>, vector<1x8x128xf32>
    %153 = vector.shape_cast %152 : vector<1x8x128xf32> to vector<8x128xf32>
    %154 = vector.shape_cast %150 : vector<8x128xf32> to vector<1x8x128xf32>
    tpu.vector_store %arg13[%151, %c0_51, %c0_52], %154 {strides = array<i32>} : memref<8x8x128xf32, #tpu.memory_space<vmem>>, vector<1x8x128xf32>,
    %c4_i32 = arith.constant 4 : i32
    %155 = arith.index_cast %c4_i32 : i32 to index
    %c0_53 = arith.constant 0 : index
    %c0_54 = arith.constant 0 : index
    %156 = vector.load %arg12[%155, %c0_53, %c0_54] : memref<8x8x512xf32, #tpu.memory_space<vmem>>, vector<1x8x512xf32>
    %157 = vector.shape_cast %156 : vector<1x8x512xf32> to vector<8x512xf32>
    %cst_55 = arith.constant dense<0.000000e+00> : vector<8x512xf32>
    %158 = tpu.matmul %150, %14, %cst_55 {dimension_numbers = #tpu.dot_dimension_numbers<[1], [0], [0], [1], [0, 0, 1, 1], [], []>} : vector<8x128xf32>, vector<128x512xf32>, vector<8x512xf32> -> vector<8x512xf32>
    %159 = arith.addf %157, %158 : vector<8x512xf32>
    %160 = vector.extract_strided_slice %159 {offsets = [0, 0], sizes = [8, 128], strides = [1, 1]} : vector<8x512xf32> to vector<8x128xf32>
    %161 = arith.negf %160 : vector<8x128xf32>
    %162 = math.exp %161 : vector<8x128xf32>
    %cst_56 = arith.constant 1.000000e+00 : f32
    %163 = vector.broadcast %cst_56 : f32 to vector<8x128xf32>
    %164 = arith.addf %163, %162 : vector<8x128xf32>
    %165 = arith.divf %163, %164 : vector<8x128xf32>
    %166 = vector.extract_strided_slice %159 {offsets = [0, 128], sizes = [8, 128], strides = [1, 1]} : vector<8x512xf32> to vector<8x128xf32>
    %167 = arith.negf %166 : vector<8x128xf32>
    %168 = math.exp %167 : vector<8x128xf32>
    %cst_57 = arith.constant 1.000000e+00 : f32
    %169 = vector.broadcast %cst_57 : f32 to vector<8x128xf32>
    %170 = arith.addf %169, %168 : vector<8x128xf32>
    %171 = arith.divf %169, %170 : vector<8x128xf32>
    %172 = vector.extract_strided_slice %159 {offsets = [0, 256], sizes = [8, 128], strides = [1, 1]} : vector<8x512xf32> to vector<8x128xf32>
    %173 = math.tanh %172 : vector<8x128xf32>
    %174 = vector.extract_strided_slice %159 {offsets = [0, 384], sizes = [8, 128], strides = [1, 1]} : vector<8x512xf32> to vector<8x128xf32>
    %175 = arith.negf %174 : vector<8x128xf32>
    %176 = math.exp %175 : vector<8x128xf32>
    %cst_58 = arith.constant 1.000000e+00 : f32
    %177 = vector.broadcast %cst_58 : f32 to vector<8x128xf32>
    %178 = arith.addf %177, %176 : vector<8x128xf32>
    %179 = arith.divf %177, %178 : vector<8x128xf32>
    %180 = arith.mulf %171, %148 : vector<8x128xf32>
    %181 = arith.mulf %165, %173 : vector<8x128xf32>
    %182 = arith.addf %180, %181 : vector<8x128xf32>
    %183 = math.tanh %182 : vector<8x128xf32>
    %184 = arith.mulf %179, %183 : vector<8x128xf32>
    %185 = arith.index_cast %c4_i32 : i32 to index
    %c0_59 = arith.constant 0 : index
    %c0_60 = arith.constant 0 : index
    %186 = vector.load %arg13[%185, %c0_59, %c0_60] : memref<8x8x128xf32, #tpu.memory_space<vmem>>, vector<1x8x128xf32>
    %187 = vector.shape_cast %186 : vector<1x8x128xf32> to vector<8x128xf32>
    %188 = vector.shape_cast %184 : vector<8x128xf32> to vector<1x8x128xf32>
    tpu.vector_store %arg13[%185, %c0_59, %c0_60], %188 {strides = array<i32>} : memref<8x8x128xf32, #tpu.memory_space<vmem>>, vector<1x8x128xf32>,
    %c5_i32 = arith.constant 5 : i32
    %189 = arith.index_cast %c5_i32 : i32 to index
    %c0_61 = arith.constant 0 : index
    %c0_62 = arith.constant 0 : index
    %190 = vector.load %arg12[%189, %c0_61, %c0_62] : memref<8x8x512xf32, #tpu.memory_space<vmem>>, vector<1x8x512xf32>
    %191 = vector.shape_cast %190 : vector<1x8x512xf32> to vector<8x512xf32>
    %cst_63 = arith.constant dense<0.000000e+00> : vector<8x512xf32>
    %192 = tpu.matmul %184, %14, %cst_63 {dimension_numbers = #tpu.dot_dimension_numbers<[1], [0], [0], [1], [0, 0, 1, 1], [], []>} : vector<8x128xf32>, vector<128x512xf32>, vector<8x512xf32> -> vector<8x512xf32>
    %193 = arith.addf %191, %192 : vector<8x512xf32>
    %194 = vector.extract_strided_slice %193 {offsets = [0, 0], sizes = [8, 128], strides = [1, 1]} : vector<8x512xf32> to vector<8x128xf32>
    %195 = arith.negf %194 : vector<8x128xf32>
    %196 = math.exp %195 : vector<8x128xf32>
    %cst_64 = arith.constant 1.000000e+00 : f32
    %197 = vector.broadcast %cst_64 : f32 to vector<8x128xf32>
    %198 = arith.addf %197, %196 : vector<8x128xf32>
    %199 = arith.divf %197, %198 : vector<8x128xf32>
    %200 = vector.extract_strided_slice %193 {offsets = [0, 128], sizes = [8, 128], strides = [1, 1]} : vector<8x512xf32> to vector<8x128xf32>
    %201 = arith.negf %200 : vector<8x128xf32>
    %202 = math.exp %201 : vector<8x128xf32>
    %cst_65 = arith.constant 1.000000e+00 : f32
    %203 = vector.broadcast %cst_65 : f32 to vector<8x128xf32>
    %204 = arith.addf %203, %202 : vector<8x128xf32>
    %205 = arith.divf %203, %204 : vector<8x128xf32>
    %206 = vector.extract_strided_slice %193 {offsets = [0, 256], sizes = [8, 128], strides = [1, 1]} : vector<8x512xf32> to vector<8x128xf32>
    %207 = math.tanh %206 : vector<8x128xf32>
    %208 = vector.extract_strided_slice %193 {offsets = [0, 384], sizes = [8, 128], strides = [1, 1]} : vector<8x512xf32> to vector<8x128xf32>
    %209 = arith.negf %208 : vector<8x128xf32>
    %210 = math.exp %209 : vector<8x128xf32>
    %cst_66 = arith.constant 1.000000e+00 : f32
    %211 = vector.broadcast %cst_66 : f32 to vector<8x128xf32>
    %212 = arith.addf %211, %210 : vector<8x128xf32>
    %213 = arith.divf %211, %212 : vector<8x128xf32>
    %214 = arith.mulf %205, %182 : vector<8x128xf32>
    %215 = arith.mulf %199, %207 : vector<8x128xf32>
    %216 = arith.addf %214, %215 : vector<8x128xf32>
    %217 = math.tanh %216 : vector<8x128xf32>
    %218 = arith.mulf %213, %217 : vector<8x128xf32>
    %219 = arith.index_cast %c5_i32 : i32 to index
    %c0_67 = arith.constant 0 : index
    %c0_68 = arith.constant 0 : index
    %220 = vector.load %arg13[%219, %c0_67, %c0_68] : memref<8x8x128xf32, #tpu.memory_space<vmem>>, vector<1x8x128xf32>
    %221 = vector.shape_cast %220 : vector<1x8x128xf32> to vector<8x128xf32>
    %222 = vector.shape_cast %218 : vector<8x128xf32> to vector<1x8x128xf32>
    tpu.vector_store %arg13[%219, %c0_67, %c0_68], %222 {strides = array<i32>} : memref<8x8x128xf32, #tpu.memory_space<vmem>>, vector<1x8x128xf32>,
    %c6_i32 = arith.constant 6 : i32
    %223 = arith.index_cast %c6_i32 : i32 to index
    %c0_69 = arith.constant 0 : index
    %c0_70 = arith.constant 0 : index
    %224 = vector.load %arg12[%223, %c0_69, %c0_70] : memref<8x8x512xf32, #tpu.memory_space<vmem>>, vector<1x8x512xf32>
    %225 = vector.shape_cast %224 : vector<1x8x512xf32> to vector<8x512xf32>
    %cst_71 = arith.constant dense<0.000000e+00> : vector<8x512xf32>
    %226 = tpu.matmul %218, %14, %cst_71 {dimension_numbers = #tpu.dot_dimension_numbers<[1], [0], [0], [1], [0, 0, 1, 1], [], []>} : vector<8x128xf32>, vector<128x512xf32>, vector<8x512xf32> -> vector<8x512xf32>
    %227 = arith.addf %225, %226 : vector<8x512xf32>
    %228 = vector.extract_strided_slice %227 {offsets = [0, 0], sizes = [8, 128], strides = [1, 1]} : vector<8x512xf32> to vector<8x128xf32>
    %229 = arith.negf %228 : vector<8x128xf32>
    %230 = math.exp %229 : vector<8x128xf32>
    %cst_72 = arith.constant 1.000000e+00 : f32
    %231 = vector.broadcast %cst_72 : f32 to vector<8x128xf32>
    %232 = arith.addf %231, %230 : vector<8x128xf32>
    %233 = arith.divf %231, %232 : vector<8x128xf32>
    %234 = vector.extract_strided_slice %227 {offsets = [0, 128], sizes = [8, 128], strides = [1, 1]} : vector<8x512xf32> to vector<8x128xf32>
    %235 = arith.negf %234 : vector<8x128xf32>
    %236 = math.exp %235 : vector<8x128xf32>
    %cst_73 = arith.constant 1.000000e+00 : f32
    %237 = vector.broadcast %cst_73 : f32 to vector<8x128xf32>
    %238 = arith.addf %237, %236 : vector<8x128xf32>
    %239 = arith.divf %237, %238 : vector<8x128xf32>
    %240 = vector.extract_strided_slice %227 {offsets = [0, 256], sizes = [8, 128], strides = [1, 1]} : vector<8x512xf32> to vector<8x128xf32>
    %241 = math.tanh %240 : vector<8x128xf32>
    %242 = vector.extract_strided_slice %227 {offsets = [0, 384], sizes = [8, 128], strides = [1, 1]} : vector<8x512xf32> to vector<8x128xf32>
    %243 = arith.negf %242 : vector<8x128xf32>
    %244 = math.exp %243 : vector<8x128xf32>
    %cst_74 = arith.constant 1.000000e+00 : f32
    %245 = vector.broadcast %cst_74 : f32 to vector<8x128xf32>
    %246 = arith.addf %245, %244 : vector<8x128xf32>
    %247 = arith.divf %245, %246 : vector<8x128xf32>
    %248 = arith.mulf %239, %216 : vector<8x128xf32>
    %249 = arith.mulf %233, %241 : vector<8x128xf32>
    %250 = arith.addf %248, %249 : vector<8x128xf32>
    %251 = math.tanh %250 : vector<8x128xf32>
    %252 = arith.mulf %247, %251 : vector<8x128xf32>
    %253 = arith.index_cast %c6_i32 : i32 to index
    %c0_75 = arith.constant 0 : index
    %c0_76 = arith.constant 0 : index
    %254 = vector.load %arg13[%253, %c0_75, %c0_76] : memref<8x8x128xf32, #tpu.memory_space<vmem>>, vector<1x8x128xf32>
    %255 = vector.shape_cast %254 : vector<1x8x128xf32> to vector<8x128xf32>
    %256 = vector.shape_cast %252 : vector<8x128xf32> to vector<1x8x128xf32>
    tpu.vector_store %arg13[%253, %c0_75, %c0_76], %256 {strides = array<i32>} : memref<8x8x128xf32, #tpu.memory_space<vmem>>, vector<1x8x128xf32>,
    %c7_i32 = arith.constant 7 : i32
    %257 = arith.index_cast %c7_i32 : i32 to index
    %c0_77 = arith.constant 0 : index
    %c0_78 = arith.constant 0 : index
    %258 = vector.load %arg12[%257, %c0_77, %c0_78] : memref<8x8x512xf32, #tpu.memory_space<vmem>>, vector<1x8x512xf32>
    %259 = vector.shape_cast %258 : vector<1x8x512xf32> to vector<8x512xf32>
    %cst_79 = arith.constant dense<0.000000e+00> : vector<8x512xf32>
    %260 = tpu.matmul %252, %14, %cst_79 {dimension_numbers = #tpu.dot_dimension_numbers<[1], [0], [0], [1], [0, 0, 1, 1], [], []>} : vector<8x128xf32>, vector<128x512xf32>, vector<8x512xf32> -> vector<8x512xf32>
    %261 = arith.addf %259, %260 : vector<8x512xf32>
    %262 = vector.extract_strided_slice %261 {offsets = [0, 0], sizes = [8, 128], strides = [1, 1]} : vector<8x512xf32> to vector<8x128xf32>
    %263 = arith.negf %262 : vector<8x128xf32>
    %264 = math.exp %263 : vector<8x128xf32>
    %cst_80 = arith.constant 1.000000e+00 : f32
    %265 = vector.broadcast %cst_80 : f32 to vector<8x128xf32>
    %266 = arith.addf %265, %264 : vector<8x128xf32>
    %267 = arith.divf %265, %266 : vector<8x128xf32>
    %268 = vector.extract_strided_slice %261 {offsets = [0, 128], sizes = [8, 128], strides = [1, 1]} : vector<8x512xf32> to vector<8x128xf32>
    %269 = arith.negf %268 : vector<8x128xf32>
    %270 = math.exp %269 : vector<8x128xf32>
    %cst_81 = arith.constant 1.000000e+00 : f32
    %271 = vector.broadcast %cst_81 : f32 to vector<8x128xf32>
    %272 = arith.addf %271, %270 : vector<8x128xf32>
    %273 = arith.divf %271, %272 : vector<8x128xf32>
    %274 = vector.extract_strided_slice %261 {offsets = [0, 256], sizes = [8, 128], strides = [1, 1]} : vector<8x512xf32> to vector<8x128xf32>
    %275 = math.tanh %274 : vector<8x128xf32>
    %276 = vector.extract_strided_slice %261 {offsets = [0, 384], sizes = [8, 128], strides = [1, 1]} : vector<8x512xf32> to vector<8x128xf32>
    %277 = arith.negf %276 : vector<8x128xf32>
    %278 = math.exp %277 : vector<8x128xf32>
    %cst_82 = arith.constant 1.000000e+00 : f32
    %279 = vector.broadcast %cst_82 : f32 to vector<8x128xf32>
    %280 = arith.addf %279, %278 : vector<8x128xf32>
    %281 = arith.divf %279, %280 : vector<8x128xf32>
    %282 = arith.mulf %273, %250 : vector<8x128xf32>
    %283 = arith.mulf %267, %275 : vector<8x128xf32>
    %284 = arith.addf %282, %283 : vector<8x128xf32>
    %285 = math.tanh %284 : vector<8x128xf32>
    %286 = arith.mulf %281, %285 : vector<8x128xf32>
    %287 = arith.index_cast %c7_i32 : i32 to index
    %c0_83 = arith.constant 0 : index
    %c0_84 = arith.constant 0 : index
    %288 = vector.load %arg13[%287, %c0_83, %c0_84] : memref<8x8x128xf32, #tpu.memory_space<vmem>>, vector<1x8x128xf32>
    %289 = vector.shape_cast %288 : vector<1x8x128xf32> to vector<8x128xf32>
    %290 = vector.shape_cast %286 : vector<8x128xf32> to vector<1x8x128xf32>
    tpu.vector_store %arg13[%287, %c0_83, %c0_84], %290 {strides = array<i32>} : memref<8x8x128xf32, #tpu.memory_space<vmem>>, vector<1x8x128xf32>,
    %c8_i32 = arith.constant 8 : i32
    %c0_85 = arith.constant 0 : index
    %c0_86 = arith.constant 0 : index
    %c0_87 = arith.constant 0 : index
    %291 = vector.load %arg10[%c0_85, %c0_86, %c0_87] : memref<2x8x128xf32, #tpu.memory_space<vmem>>, vector<1x8x128xf32>
    %292 = vector.shape_cast %291 : vector<1x8x128xf32> to vector<8x128xf32>
    %293 = vector.shape_cast %286 : vector<8x128xf32> to vector<1x8x128xf32>
    tpu.vector_store %arg10[%c0_85, %c0_86, %c0_87], %293 {strides = array<i32>} : memref<2x8x128xf32, #tpu.memory_space<vmem>>, vector<1x8x128xf32>,
    %c0_88 = arith.constant 0 : index
    %c0_89 = arith.constant 0 : index
    %c0_90 = arith.constant 0 : index
    %294 = vector.load %arg11[%c0_88, %c0_89, %c0_90] : memref<2x8x128xf32, #tpu.memory_space<vmem>>, vector<1x8x128xf32>
    %295 = vector.shape_cast %294 : vector<1x8x128xf32> to vector<8x128xf32>
    %296 = vector.shape_cast %284 : vector<8x128xf32> to vector<1x8x128xf32>
    tpu.vector_store %arg11[%c0_88, %c0_89, %c0_90], %296 {strides = array<i32>} : memref<2x8x128xf32, #tpu.memory_space<vmem>>, vector<1x8x128xf32>,
    %c0_91 = arith.constant 0 : index
    %c0_92 = arith.constant 0 : index
    %c0_93 = arith.constant 0 : index
    %297 = vector.load %arg13[%c0_91, %c0_92, %c0_93] : memref<8x8x128xf32, #tpu.memory_space<vmem>>, vector<8x8x128xf32>
    %298 = vector.shape_cast %297 : vector<8x8x128xf32> to vector<64x128xf32>
    %c0_94 = arith.constant 0 : index
    %c0_95 = arith.constant 0 : index
    %299 = vector.load %arg4[%c0_94, %c0_95] : memref<128x512xf32, #tpu.memory_space<vmem>>, vector<128x512xf32>
    %cst_96 = arith.constant dense<0.000000e+00> : vector<64x512xf32>
    %300 = tpu.matmul %298, %299, %cst_96 {dimension_numbers = #tpu.dot_dimension_numbers<[1], [0], [0], [1], [0, 0, 1, 1], [], []>} : vector<64x128xf32>, vector<128x512xf32>, vector<64x512xf32> -> vector<64x512xf32>
    %c1 = arith.constant 1 : index
    %c0_97 = arith.constant 0 : index
    %c0_98 = arith.constant 0 : index
    %301 = vector.load %arg6[%c1, %c0_97, %c0_98] : memref<2x1x512xf32, #tpu.memory_space<vmem>>, vector<1x1x512xf32>
    %302 = vector.shape_cast %301 : vector<1x1x512xf32> to vector<1x512xf32>
    %303 = vector.broadcast %302 : vector<1x512xf32> to vector<64x512xf32>
    %304 = arith.addf %300, %303 : vector<64x512xf32>
    %305 = vector.shape_cast %304 : vector<64x512xf32> to vector<8x8x512xf32>
    %c0_99 = arith.constant 0 : index
    %c0_100 = arith.constant 0 : index
    %c0_101 = arith.constant 0 : index
    %306 = vector.load %arg12[%c0_99, %c0_100, %c0_101] : memref<8x8x512xf32, #tpu.memory_space<vmem>>, vector<8x8x512xf32>
    tpu.vector_store %arg12[%c0_99, %c0_100, %c0_101], %305 {strides = array<i32>} : memref<8x8x512xf32, #tpu.memory_space<vmem>>, vector<8x8x512xf32>,
    %c1_102 = arith.constant 1 : index
    %c0_103 = arith.constant 0 : index
    %c0_104 = arith.constant 0 : index
    %307 = vector.load %arg5[%c1_102, %c0_103, %c0_104] : memref<2x128x512xf32, #tpu.memory_space<vmem>>, vector<1x128x512xf32>
    %308 = vector.shape_cast %307 : vector<1x128x512xf32> to vector<128x512xf32>
    %c1_105 = arith.constant 1 : index
    %c0_106 = arith.constant 0 : index
    %c0_107 = arith.constant 0 : index
    %309 = vector.load %arg10[%c1_105, %c0_106, %c0_107] : memref<2x8x128xf32, #tpu.memory_space<vmem>>, vector<1x8x128xf32>
    %310 = vector.shape_cast %309 : vector<1x8x128xf32> to vector<8x128xf32>
    %c1_108 = arith.constant 1 : index
    %c0_109 = arith.constant 0 : index
    %c0_110 = arith.constant 0 : index
    %311 = vector.load %arg11[%c1_108, %c0_109, %c0_110] : memref<2x8x128xf32, #tpu.memory_space<vmem>>, vector<1x8x128xf32>
    %312 = vector.shape_cast %311 : vector<1x8x128xf32> to vector<8x128xf32>
    %c0_i32_111 = arith.constant 0 : i32
    %313 = arith.index_cast %c0_i32_111 : i32 to index
    %c0_112 = arith.constant 0 : index
    %c0_113 = arith.constant 0 : index
    %314 = vector.load %arg12[%313, %c0_112, %c0_113] : memref<8x8x512xf32, #tpu.memory_space<vmem>>, vector<1x8x512xf32>
    %315 = vector.shape_cast %314 : vector<1x8x512xf32> to vector<8x512xf32>
    %cst_114 = arith.constant dense<0.000000e+00> : vector<8x512xf32>
    %316 = tpu.matmul %310, %308, %cst_114 {dimension_numbers = #tpu.dot_dimension_numbers<[1], [0], [0], [1], [0, 0, 1, 1], [], []>} : vector<8x128xf32>, vector<128x512xf32>, vector<8x512xf32> -> vector<8x512xf32>
    %317 = arith.addf %315, %316 : vector<8x512xf32>
    %318 = vector.extract_strided_slice %317 {offsets = [0, 0], sizes = [8, 128], strides = [1, 1]} : vector<8x512xf32> to vector<8x128xf32>
    %319 = arith.negf %318 : vector<8x128xf32>
    %320 = math.exp %319 : vector<8x128xf32>
    %cst_115 = arith.constant 1.000000e+00 : f32
    %321 = vector.broadcast %cst_115 : f32 to vector<8x128xf32>
    %322 = arith.addf %321, %320 : vector<8x128xf32>
    %323 = arith.divf %321, %322 : vector<8x128xf32>
    %324 = vector.extract_strided_slice %317 {offsets = [0, 128], sizes = [8, 128], strides = [1, 1]} : vector<8x512xf32> to vector<8x128xf32>
    %325 = arith.negf %324 : vector<8x128xf32>
    %326 = math.exp %325 : vector<8x128xf32>
    %cst_116 = arith.constant 1.000000e+00 : f32
    %327 = vector.broadcast %cst_116 : f32 to vector<8x128xf32>
    %328 = arith.addf %327, %326 : vector<8x128xf32>
    %329 = arith.divf %327, %328 : vector<8x128xf32>
    %330 = vector.extract_strided_slice %317 {offsets = [0, 256], sizes = [8, 128], strides = [1, 1]} : vector<8x512xf32> to vector<8x128xf32>
    %331 = math.tanh %330 : vector<8x128xf32>
    %332 = vector.extract_strided_slice %317 {offsets = [0, 384], sizes = [8, 128], strides = [1, 1]} : vector<8x512xf32> to vector<8x128xf32>
    %333 = arith.negf %332 : vector<8x128xf32>
    %334 = math.exp %333 : vector<8x128xf32>
    %cst_117 = arith.constant 1.000000e+00 : f32
    %335 = vector.broadcast %cst_117 : f32 to vector<8x128xf32>
    %336 = arith.addf %335, %334 : vector<8x128xf32>
    %337 = arith.divf %335, %336 : vector<8x128xf32>
    %338 = arith.mulf %329, %312 : vector<8x128xf32>
    %339 = arith.mulf %323, %331 : vector<8x128xf32>
    %340 = arith.addf %338, %339 : vector<8x128xf32>
    %341 = math.tanh %340 : vector<8x128xf32>
    %342 = arith.mulf %337, %341 : vector<8x128xf32>
    %343 = arith.index_cast %c0_i32_111 : i32 to index
    %c0_118 = arith.constant 0 : index
    %c0_119 = arith.constant 0 : index
    %344 = vector.load %arg13[%343, %c0_118, %c0_119] : memref<8x8x128xf32, #tpu.memory_space<vmem>>, vector<1x8x128xf32>
    %345 = vector.shape_cast %344 : vector<1x8x128xf32> to vector<8x128xf32>
    %346 = vector.shape_cast %342 : vector<8x128xf32> to vector<1x8x128xf32>
    tpu.vector_store %arg13[%343, %c0_118, %c0_119], %346 {strides = array<i32>} : memref<8x8x128xf32, #tpu.memory_space<vmem>>, vector<1x8x128xf32>,
    %c1_i32_120 = arith.constant 1 : i32
    %347 = arith.index_cast %c1_i32_120 : i32 to index
    %c0_121 = arith.constant 0 : index
    %c0_122 = arith.constant 0 : index
    %348 = vector.load %arg12[%347, %c0_121, %c0_122] : memref<8x8x512xf32, #tpu.memory_space<vmem>>, vector<1x8x512xf32>
    %349 = vector.shape_cast %348 : vector<1x8x512xf32> to vector<8x512xf32>
    %cst_123 = arith.constant dense<0.000000e+00> : vector<8x512xf32>
    %350 = tpu.matmul %342, %308, %cst_123 {dimension_numbers = #tpu.dot_dimension_numbers<[1], [0], [0], [1], [0, 0, 1, 1], [], []>} : vector<8x128xf32>, vector<128x512xf32>, vector<8x512xf32> -> vector<8x512xf32>
    %351 = arith.addf %349, %350 : vector<8x512xf32>
    %352 = vector.extract_strided_slice %351 {offsets = [0, 0], sizes = [8, 128], strides = [1, 1]} : vector<8x512xf32> to vector<8x128xf32>
    %353 = arith.negf %352 : vector<8x128xf32>
    %354 = math.exp %353 : vector<8x128xf32>
    %cst_124 = arith.constant 1.000000e+00 : f32
    %355 = vector.broadcast %cst_124 : f32 to vector<8x128xf32>
    %356 = arith.addf %355, %354 : vector<8x128xf32>
    %357 = arith.divf %355, %356 : vector<8x128xf32>
    %358 = vector.extract_strided_slice %351 {offsets = [0, 128], sizes = [8, 128], strides = [1, 1]} : vector<8x512xf32> to vector<8x128xf32>
    %359 = arith.negf %358 : vector<8x128xf32>
    %360 = math.exp %359 : vector<8x128xf32>
    %cst_125 = arith.constant 1.000000e+00 : f32
    %361 = vector.broadcast %cst_125 : f32 to vector<8x128xf32>
    %362 = arith.addf %361, %360 : vector<8x128xf32>
    %363 = arith.divf %361, %362 : vector<8x128xf32>
    %364 = vector.extract_strided_slice %351 {offsets = [0, 256], sizes = [8, 128], strides = [1, 1]} : vector<8x512xf32> to vector<8x128xf32>
    %365 = math.tanh %364 : vector<8x128xf32>
    %366 = vector.extract_strided_slice %351 {offsets = [0, 384], sizes = [8, 128], strides = [1, 1]} : vector<8x512xf32> to vector<8x128xf32>
    %367 = arith.negf %366 : vector<8x128xf32>
    %368 = math.exp %367 : vector<8x128xf32>
    %cst_126 = arith.constant 1.000000e+00 : f32
    %369 = vector.broadcast %cst_126 : f32 to vector<8x128xf32>
    %370 = arith.addf %369, %368 : vector<8x128xf32>
    %371 = arith.divf %369, %370 : vector<8x128xf32>
    %372 = arith.mulf %363, %340 : vector<8x128xf32>
    %373 = arith.mulf %357, %365 : vector<8x128xf32>
    %374 = arith.addf %372, %373 : vector<8x128xf32>
    %375 = math.tanh %374 : vector<8x128xf32>
    %376 = arith.mulf %371, %375 : vector<8x128xf32>
    %377 = arith.index_cast %c1_i32_120 : i32 to index
    %c0_127 = arith.constant 0 : index
    %c0_128 = arith.constant 0 : index
    %378 = vector.load %arg13[%377, %c0_127, %c0_128] : memref<8x8x128xf32, #tpu.memory_space<vmem>>, vector<1x8x128xf32>
    %379 = vector.shape_cast %378 : vector<1x8x128xf32> to vector<8x128xf32>
    %380 = vector.shape_cast %376 : vector<8x128xf32> to vector<1x8x128xf32>
    tpu.vector_store %arg13[%377, %c0_127, %c0_128], %380 {strides = array<i32>} : memref<8x8x128xf32, #tpu.memory_space<vmem>>, vector<1x8x128xf32>,
    %c2_i32_129 = arith.constant 2 : i32
    %381 = arith.index_cast %c2_i32_129 : i32 to index
    %c0_130 = arith.constant 0 : index
    %c0_131 = arith.constant 0 : index
    %382 = vector.load %arg12[%381, %c0_130, %c0_131] : memref<8x8x512xf32, #tpu.memory_space<vmem>>, vector<1x8x512xf32>
    %383 = vector.shape_cast %382 : vector<1x8x512xf32> to vector<8x512xf32>
    %cst_132 = arith.constant dense<0.000000e+00> : vector<8x512xf32>
    %384 = tpu.matmul %376, %308, %cst_132 {dimension_numbers = #tpu.dot_dimension_numbers<[1], [0], [0], [1], [0, 0, 1, 1], [], []>} : vector<8x128xf32>, vector<128x512xf32>, vector<8x512xf32> -> vector<8x512xf32>
    %385 = arith.addf %383, %384 : vector<8x512xf32>
    %386 = vector.extract_strided_slice %385 {offsets = [0, 0], sizes = [8, 128], strides = [1, 1]} : vector<8x512xf32> to vector<8x128xf32>
    %387 = arith.negf %386 : vector<8x128xf32>
    %388 = math.exp %387 : vector<8x128xf32>
    %cst_133 = arith.constant 1.000000e+00 : f32
    %389 = vector.broadcast %cst_133 : f32 to vector<8x128xf32>
    %390 = arith.addf %389, %388 : vector<8x128xf32>
    %391 = arith.divf %389, %390 : vector<8x128xf32>
    %392 = vector.extract_strided_slice %385 {offsets = [0, 128], sizes = [8, 128], strides = [1, 1]} : vector<8x512xf32> to vector<8x128xf32>
    %393 = arith.negf %392 : vector<8x128xf32>
    %394 = math.exp %393 : vector<8x128xf32>
    %cst_134 = arith.constant 1.000000e+00 : f32
    %395 = vector.broadcast %cst_134 : f32 to vector<8x128xf32>
    %396 = arith.addf %395, %394 : vector<8x128xf32>
    %397 = arith.divf %395, %396 : vector<8x128xf32>
    %398 = vector.extract_strided_slice %385 {offsets = [0, 256], sizes = [8, 128], strides = [1, 1]} : vector<8x512xf32> to vector<8x128xf32>
    %399 = math.tanh %398 : vector<8x128xf32>
    %400 = vector.extract_strided_slice %385 {offsets = [0, 384], sizes = [8, 128], strides = [1, 1]} : vector<8x512xf32> to vector<8x128xf32>
    %401 = arith.negf %400 : vector<8x128xf32>
    %402 = math.exp %401 : vector<8x128xf32>
    %cst_135 = arith.constant 1.000000e+00 : f32
    %403 = vector.broadcast %cst_135 : f32 to vector<8x128xf32>
    %404 = arith.addf %403, %402 : vector<8x128xf32>
    %405 = arith.divf %403, %404 : vector<8x128xf32>
    %406 = arith.mulf %397, %374 : vector<8x128xf32>
    %407 = arith.mulf %391, %399 : vector<8x128xf32>
    %408 = arith.addf %406, %407 : vector<8x128xf32>
    %409 = math.tanh %408 : vector<8x128xf32>
    %410 = arith.mulf %405, %409 : vector<8x128xf32>
    %411 = arith.index_cast %c2_i32_129 : i32 to index
    %c0_136 = arith.constant 0 : index
    %c0_137 = arith.constant 0 : index
    %412 = vector.load %arg13[%411, %c0_136, %c0_137] : memref<8x8x128xf32, #tpu.memory_space<vmem>>, vector<1x8x128xf32>
    %413 = vector.shape_cast %412 : vector<1x8x128xf32> to vector<8x128xf32>
    %414 = vector.shape_cast %410 : vector<8x128xf32> to vector<1x8x128xf32>
    tpu.vector_store %arg13[%411, %c0_136, %c0_137], %414 {strides = array<i32>} : memref<8x8x128xf32, #tpu.memory_space<vmem>>, vector<1x8x128xf32>,
    %c3_i32_138 = arith.constant 3 : i32
    %415 = arith.index_cast %c3_i32_138 : i32 to index
    %c0_139 = arith.constant 0 : index
    %c0_140 = arith.constant 0 : index
    %416 = vector.load %arg12[%415, %c0_139, %c0_140] : memref<8x8x512xf32, #tpu.memory_space<vmem>>, vector<1x8x512xf32>
    %417 = vector.shape_cast %416 : vector<1x8x512xf32> to vector<8x512xf32>
    %cst_141 = arith.constant dense<0.000000e+00> : vector<8x512xf32>
    %418 = tpu.matmul %410, %308, %cst_141 {dimension_numbers = #tpu.dot_dimension_numbers<[1], [0], [0], [1], [0, 0, 1, 1], [], []>} : vector<8x128xf32>, vector<128x512xf32>, vector<8x512xf32> -> vector<8x512xf32>
    %419 = arith.addf %417, %418 : vector<8x512xf32>
    %420 = vector.extract_strided_slice %419 {offsets = [0, 0], sizes = [8, 128], strides = [1, 1]} : vector<8x512xf32> to vector<8x128xf32>
    %421 = arith.negf %420 : vector<8x128xf32>
    %422 = math.exp %421 : vector<8x128xf32>
    %cst_142 = arith.constant 1.000000e+00 : f32
    %423 = vector.broadcast %cst_142 : f32 to vector<8x128xf32>
    %424 = arith.addf %423, %422 : vector<8x128xf32>
    %425 = arith.divf %423, %424 : vector<8x128xf32>
    %426 = vector.extract_strided_slice %419 {offsets = [0, 128], sizes = [8, 128], strides = [1, 1]} : vector<8x512xf32> to vector<8x128xf32>
    %427 = arith.negf %426 : vector<8x128xf32>
    %428 = math.exp %427 : vector<8x128xf32>
    %cst_143 = arith.constant 1.000000e+00 : f32
    %429 = vector.broadcast %cst_143 : f32 to vector<8x128xf32>
    %430 = arith.addf %429, %428 : vector<8x128xf32>
    %431 = arith.divf %429, %430 : vector<8x128xf32>
    %432 = vector.extract_strided_slice %419 {offsets = [0, 256], sizes = [8, 128], strides = [1, 1]} : vector<8x512xf32> to vector<8x128xf32>
    %433 = math.tanh %432 : vector<8x128xf32>
    %434 = vector.extract_strided_slice %419 {offsets = [0, 384], sizes = [8, 128], strides = [1, 1]} : vector<8x512xf32> to vector<8x128xf32>
    %435 = arith.negf %434 : vector<8x128xf32>
    %436 = math.exp %435 : vector<8x128xf32>
    %cst_144 = arith.constant 1.000000e+00 : f32
    %437 = vector.broadcast %cst_144 : f32 to vector<8x128xf32>
    %438 = arith.addf %437, %436 : vector<8x128xf32>
    %439 = arith.divf %437, %438 : vector<8x128xf32>
    %440 = arith.mulf %431, %408 : vector<8x128xf32>
    %441 = arith.mulf %425, %433 : vector<8x128xf32>
    %442 = arith.addf %440, %441 : vector<8x128xf32>
    %443 = math.tanh %442 : vector<8x128xf32>
    %444 = arith.mulf %439, %443 : vector<8x128xf32>
    %445 = arith.index_cast %c3_i32_138 : i32 to index
    %c0_145 = arith.constant 0 : index
    %c0_146 = arith.constant 0 : index
    %446 = vector.load %arg13[%445, %c0_145, %c0_146] : memref<8x8x128xf32, #tpu.memory_space<vmem>>, vector<1x8x128xf32>
    %447 = vector.shape_cast %446 : vector<1x8x128xf32> to vector<8x128xf32>
    %448 = vector.shape_cast %444 : vector<8x128xf32> to vector<1x8x128xf32>
    tpu.vector_store %arg13[%445, %c0_145, %c0_146], %448 {strides = array<i32>} : memref<8x8x128xf32, #tpu.memory_space<vmem>>, vector<1x8x128xf32>,
    %c4_i32_147 = arith.constant 4 : i32
    %449 = arith.index_cast %c4_i32_147 : i32 to index
    %c0_148 = arith.constant 0 : index
    %c0_149 = arith.constant 0 : index
    %450 = vector.load %arg12[%449, %c0_148, %c0_149] : memref<8x8x512xf32, #tpu.memory_space<vmem>>, vector<1x8x512xf32>
    %451 = vector.shape_cast %450 : vector<1x8x512xf32> to vector<8x512xf32>
    %cst_150 = arith.constant dense<0.000000e+00> : vector<8x512xf32>
    %452 = tpu.matmul %444, %308, %cst_150 {dimension_numbers = #tpu.dot_dimension_numbers<[1], [0], [0], [1], [0, 0, 1, 1], [], []>} : vector<8x128xf32>, vector<128x512xf32>, vector<8x512xf32> -> vector<8x512xf32>
    %453 = arith.addf %451, %452 : vector<8x512xf32>
    %454 = vector.extract_strided_slice %453 {offsets = [0, 0], sizes = [8, 128], strides = [1, 1]} : vector<8x512xf32> to vector<8x128xf32>
    %455 = arith.negf %454 : vector<8x128xf32>
    %456 = math.exp %455 : vector<8x128xf32>
    %cst_151 = arith.constant 1.000000e+00 : f32
    %457 = vector.broadcast %cst_151 : f32 to vector<8x128xf32>
    %458 = arith.addf %457, %456 : vector<8x128xf32>
    %459 = arith.divf %457, %458 : vector<8x128xf32>
    %460 = vector.extract_strided_slice %453 {offsets = [0, 128], sizes = [8, 128], strides = [1, 1]} : vector<8x512xf32> to vector<8x128xf32>
    %461 = arith.negf %460 : vector<8x128xf32>
    %462 = math.exp %461 : vector<8x128xf32>
    %cst_152 = arith.constant 1.000000e+00 : f32
    %463 = vector.broadcast %cst_152 : f32 to vector<8x128xf32>
    %464 = arith.addf %463, %462 : vector<8x128xf32>
    %465 = arith.divf %463, %464 : vector<8x128xf32>
    %466 = vector.extract_strided_slice %453 {offsets = [0, 256], sizes = [8, 128], strides = [1, 1]} : vector<8x512xf32> to vector<8x128xf32>
    %467 = math.tanh %466 : vector<8x128xf32>
    %468 = vector.extract_strided_slice %453 {offsets = [0, 384], sizes = [8, 128], strides = [1, 1]} : vector<8x512xf32> to vector<8x128xf32>
    %469 = arith.negf %468 : vector<8x128xf32>
    %470 = math.exp %469 : vector<8x128xf32>
    %cst_153 = arith.constant 1.000000e+00 : f32
    %471 = vector.broadcast %cst_153 : f32 to vector<8x128xf32>
    %472 = arith.addf %471, %470 : vector<8x128xf32>
    %473 = arith.divf %471, %472 : vector<8x128xf32>
    %474 = arith.mulf %465, %442 : vector<8x128xf32>
    %475 = arith.mulf %459, %467 : vector<8x128xf32>
    %476 = arith.addf %474, %475 : vector<8x128xf32>
    %477 = math.tanh %476 : vector<8x128xf32>
    %478 = arith.mulf %473, %477 : vector<8x128xf32>
    %479 = arith.index_cast %c4_i32_147 : i32 to index
    %c0_154 = arith.constant 0 : index
    %c0_155 = arith.constant 0 : index
    %480 = vector.load %arg13[%479, %c0_154, %c0_155] : memref<8x8x128xf32, #tpu.memory_space<vmem>>, vector<1x8x128xf32>
    %481 = vector.shape_cast %480 : vector<1x8x128xf32> to vector<8x128xf32>
    %482 = vector.shape_cast %478 : vector<8x128xf32> to vector<1x8x128xf32>
    tpu.vector_store %arg13[%479, %c0_154, %c0_155], %482 {strides = array<i32>} : memref<8x8x128xf32, #tpu.memory_space<vmem>>, vector<1x8x128xf32>,
    %c5_i32_156 = arith.constant 5 : i32
    %483 = arith.index_cast %c5_i32_156 : i32 to index
    %c0_157 = arith.constant 0 : index
    %c0_158 = arith.constant 0 : index
    %484 = vector.load %arg12[%483, %c0_157, %c0_158] : memref<8x8x512xf32, #tpu.memory_space<vmem>>, vector<1x8x512xf32>
    %485 = vector.shape_cast %484 : vector<1x8x512xf32> to vector<8x512xf32>
    %cst_159 = arith.constant dense<0.000000e+00> : vector<8x512xf32>
    %486 = tpu.matmul %478, %308, %cst_159 {dimension_numbers = #tpu.dot_dimension_numbers<[1], [0], [0], [1], [0, 0, 1, 1], [], []>} : vector<8x128xf32>, vector<128x512xf32>, vector<8x512xf32> -> vector<8x512xf32>
    %487 = arith.addf %485, %486 : vector<8x512xf32>
    %488 = vector.extract_strided_slice %487 {offsets = [0, 0], sizes = [8, 128], strides = [1, 1]} : vector<8x512xf32> to vector<8x128xf32>
    %489 = arith.negf %488 : vector<8x128xf32>
    %490 = math.exp %489 : vector<8x128xf32>
    %cst_160 = arith.constant 1.000000e+00 : f32
    %491 = vector.broadcast %cst_160 : f32 to vector<8x128xf32>
    %492 = arith.addf %491, %490 : vector<8x128xf32>
    %493 = arith.divf %491, %492 : vector<8x128xf32>
    %494 = vector.extract_strided_slice %487 {offsets = [0, 128], sizes = [8, 128], strides = [1, 1]} : vector<8x512xf32> to vector<8x128xf32>
    %495 = arith.negf %494 : vector<8x128xf32>
    %496 = math.exp %495 : vector<8x128xf32>
    %cst_161 = arith.constant 1.000000e+00 : f32
    %497 = vector.broadcast %cst_161 : f32 to vector<8x128xf32>
    %498 = arith.addf %497, %496 : vector<8x128xf32>
    %499 = arith.divf %497, %498 : vector<8x128xf32>
    %500 = vector.extract_strided_slice %487 {offsets = [0, 256], sizes = [8, 128], strides = [1, 1]} : vector<8x512xf32> to vector<8x128xf32>
    %501 = math.tanh %500 : vector<8x128xf32>
    %502 = vector.extract_strided_slice %487 {offsets = [0, 384], sizes = [8, 128], strides = [1, 1]} : vector<8x512xf32> to vector<8x128xf32>
    %503 = arith.negf %502 : vector<8x128xf32>
    %504 = math.exp %503 : vector<8x128xf32>
    %cst_162 = arith.constant 1.000000e+00 : f32
    %505 = vector.broadcast %cst_162 : f32 to vector<8x128xf32>
    %506 = arith.addf %505, %504 : vector<8x128xf32>
    %507 = arith.divf %505, %506 : vector<8x128xf32>
    %508 = arith.mulf %499, %476 : vector<8x128xf32>
    %509 = arith.mulf %493, %501 : vector<8x128xf32>
    %510 = arith.addf %508, %509 : vector<8x128xf32>
    %511 = math.tanh %510 : vector<8x128xf32>
    %512 = arith.mulf %507, %511 : vector<8x128xf32>
    %513 = arith.index_cast %c5_i32_156 : i32 to index
    %c0_163 = arith.constant 0 : index
    %c0_164 = arith.constant 0 : index
    %514 = vector.load %arg13[%513, %c0_163, %c0_164] : memref<8x8x128xf32, #tpu.memory_space<vmem>>, vector<1x8x128xf32>
    %515 = vector.shape_cast %514 : vector<1x8x128xf32> to vector<8x128xf32>
    %516 = vector.shape_cast %512 : vector<8x128xf32> to vector<1x8x128xf32>
    tpu.vector_store %arg13[%513, %c0_163, %c0_164], %516 {strides = array<i32>} : memref<8x8x128xf32, #tpu.memory_space<vmem>>, vector<1x8x128xf32>,
    %c6_i32_165 = arith.constant 6 : i32
    %517 = arith.index_cast %c6_i32_165 : i32 to index
    %c0_166 = arith.constant 0 : index
    %c0_167 = arith.constant 0 : index
    %518 = vector.load %arg12[%517, %c0_166, %c0_167] : memref<8x8x512xf32, #tpu.memory_space<vmem>>, vector<1x8x512xf32>
    %519 = vector.shape_cast %518 : vector<1x8x512xf32> to vector<8x512xf32>
    %cst_168 = arith.constant dense<0.000000e+00> : vector<8x512xf32>
    %520 = tpu.matmul %512, %308, %cst_168 {dimension_numbers = #tpu.dot_dimension_numbers<[1], [0], [0], [1], [0, 0, 1, 1], [], []>} : vector<8x128xf32>, vector<128x512xf32>, vector<8x512xf32> -> vector<8x512xf32>
    %521 = arith.addf %519, %520 : vector<8x512xf32>
    %522 = vector.extract_strided_slice %521 {offsets = [0, 0], sizes = [8, 128], strides = [1, 1]} : vector<8x512xf32> to vector<8x128xf32>
    %523 = arith.negf %522 : vector<8x128xf32>
    %524 = math.exp %523 : vector<8x128xf32>
    %cst_169 = arith.constant 1.000000e+00 : f32
    %525 = vector.broadcast %cst_169 : f32 to vector<8x128xf32>
    %526 = arith.addf %525, %524 : vector<8x128xf32>
    %527 = arith.divf %525, %526 : vector<8x128xf32>
    %528 = vector.extract_strided_slice %521 {offsets = [0, 128], sizes = [8, 128], strides = [1, 1]} : vector<8x512xf32> to vector<8x128xf32>
    %529 = arith.negf %528 : vector<8x128xf32>
    %530 = math.exp %529 : vector<8x128xf32>
    %cst_170 = arith.constant 1.000000e+00 : f32
    %531 = vector.broadcast %cst_170 : f32 to vector<8x128xf32>
    %532 = arith.addf %531, %530 : vector<8x128xf32>
    %533 = arith.divf %531, %532 : vector<8x128xf32>
    %534 = vector.extract_strided_slice %521 {offsets = [0, 256], sizes = [8, 128], strides = [1, 1]} : vector<8x512xf32> to vector<8x128xf32>
    %535 = math.tanh %534 : vector<8x128xf32>
    %536 = vector.extract_strided_slice %521 {offsets = [0, 384], sizes = [8, 128], strides = [1, 1]} : vector<8x512xf32> to vector<8x128xf32>
    %537 = arith.negf %536 : vector<8x128xf32>
    %538 = math.exp %537 : vector<8x128xf32>
    %cst_171 = arith.constant 1.000000e+00 : f32
    %539 = vector.broadcast %cst_171 : f32 to vector<8x128xf32>
    %540 = arith.addf %539, %538 : vector<8x128xf32>
    %541 = arith.divf %539, %540 : vector<8x128xf32>
    %542 = arith.mulf %533, %510 : vector<8x128xf32>
    %543 = arith.mulf %527, %535 : vector<8x128xf32>
    %544 = arith.addf %542, %543 : vector<8x128xf32>
    %545 = math.tanh %544 : vector<8x128xf32>
    %546 = arith.mulf %541, %545 : vector<8x128xf32>
    %547 = arith.index_cast %c6_i32_165 : i32 to index
    %c0_172 = arith.constant 0 : index
    %c0_173 = arith.constant 0 : index
    %548 = vector.load %arg13[%547, %c0_172, %c0_173] : memref<8x8x128xf32, #tpu.memory_space<vmem>>, vector<1x8x128xf32>
    %549 = vector.shape_cast %548 : vector<1x8x128xf32> to vector<8x128xf32>
    %550 = vector.shape_cast %546 : vector<8x128xf32> to vector<1x8x128xf32>
    tpu.vector_store %arg13[%547, %c0_172, %c0_173], %550 {strides = array<i32>} : memref<8x8x128xf32, #tpu.memory_space<vmem>>, vector<1x8x128xf32>,
    %c7_i32_174 = arith.constant 7 : i32
    %551 = arith.index_cast %c7_i32_174 : i32 to index
    %c0_175 = arith.constant 0 : index
    %c0_176 = arith.constant 0 : index
    %552 = vector.load %arg12[%551, %c0_175, %c0_176] : memref<8x8x512xf32, #tpu.memory_space<vmem>>, vector<1x8x512xf32>
    %553 = vector.shape_cast %552 : vector<1x8x512xf32> to vector<8x512xf32>
    %cst_177 = arith.constant dense<0.000000e+00> : vector<8x512xf32>
    %554 = tpu.matmul %546, %308, %cst_177 {dimension_numbers = #tpu.dot_dimension_numbers<[1], [0], [0], [1], [0, 0, 1, 1], [], []>} : vector<8x128xf32>, vector<128x512xf32>, vector<8x512xf32> -> vector<8x512xf32>
    %555 = arith.addf %553, %554 : vector<8x512xf32>
    %556 = vector.extract_strided_slice %555 {offsets = [0, 0], sizes = [8, 128], strides = [1, 1]} : vector<8x512xf32> to vector<8x128xf32>
    %557 = arith.negf %556 : vector<8x128xf32>
    %558 = math.exp %557 : vector<8x128xf32>
    %cst_178 = arith.constant 1.000000e+00 : f32
    %559 = vector.broadcast %cst_178 : f32 to vector<8x128xf32>
    %560 = arith.addf %559, %558 : vector<8x128xf32>
    %561 = arith.divf %559, %560 : vector<8x128xf32>
    %562 = vector.extract_strided_slice %555 {offsets = [0, 128], sizes = [8, 128], strides = [1, 1]} : vector<8x512xf32> to vector<8x128xf32>
    %563 = arith.negf %562 : vector<8x128xf32>
    %564 = math.exp %563 : vector<8x128xf32>
    %cst_179 = arith.constant 1.000000e+00 : f32
    %565 = vector.broadcast %cst_179 : f32 to vector<8x128xf32>
    %566 = arith.addf %565, %564 : vector<8x128xf32>
    %567 = arith.divf %565, %566 : vector<8x128xf32>
    %568 = vector.extract_strided_slice %555 {offsets = [0, 256], sizes = [8, 128], strides = [1, 1]} : vector<8x512xf32> to vector<8x128xf32>
    %569 = math.tanh %568 : vector<8x128xf32>
    %570 = vector.extract_strided_slice %555 {offsets = [0, 384], sizes = [8, 128], strides = [1, 1]} : vector<8x512xf32> to vector<8x128xf32>
    %571 = arith.negf %570 : vector<8x128xf32>
    %572 = math.exp %571 : vector<8x128xf32>
    %cst_180 = arith.constant 1.000000e+00 : f32
    %573 = vector.broadcast %cst_180 : f32 to vector<8x128xf32>
    %574 = arith.addf %573, %572 : vector<8x128xf32>
    %575 = arith.divf %573, %574 : vector<8x128xf32>
    %576 = arith.mulf %567, %544 : vector<8x128xf32>
    %577 = arith.mulf %561, %569 : vector<8x128xf32>
    %578 = arith.addf %576, %577 : vector<8x128xf32>
    %579 = math.tanh %578 : vector<8x128xf32>
    %580 = arith.mulf %575, %579 : vector<8x128xf32>
    %581 = arith.index_cast %c7_i32_174 : i32 to index
    %c0_181 = arith.constant 0 : index
    %c0_182 = arith.constant 0 : index
    %582 = vector.load %arg13[%581, %c0_181, %c0_182] : memref<8x8x128xf32, #tpu.memory_space<vmem>>, vector<1x8x128xf32>
    %583 = vector.shape_cast %582 : vector<1x8x128xf32> to vector<8x128xf32>
    %584 = vector.shape_cast %580 : vector<8x128xf32> to vector<1x8x128xf32>
    tpu.vector_store %arg13[%581, %c0_181, %c0_182], %584 {strides = array<i32>} : memref<8x8x128xf32, #tpu.memory_space<vmem>>, vector<1x8x128xf32>,
    %c8_i32_183 = arith.constant 8 : i32
    %c1_184 = arith.constant 1 : index
    %c0_185 = arith.constant 0 : index
    %c0_186 = arith.constant 0 : index
    %585 = vector.load %arg10[%c1_184, %c0_185, %c0_186] : memref<2x8x128xf32, #tpu.memory_space<vmem>>, vector<1x8x128xf32>
    %586 = vector.shape_cast %585 : vector<1x8x128xf32> to vector<8x128xf32>
    %587 = vector.shape_cast %580 : vector<8x128xf32> to vector<1x8x128xf32>
    tpu.vector_store %arg10[%c1_184, %c0_185, %c0_186], %587 {strides = array<i32>} : memref<2x8x128xf32, #tpu.memory_space<vmem>>, vector<1x8x128xf32>,
    %c1_187 = arith.constant 1 : index
    %c0_188 = arith.constant 0 : index
    %c0_189 = arith.constant 0 : index
    %588 = vector.load %arg11[%c1_187, %c0_188, %c0_189] : memref<2x8x128xf32, #tpu.memory_space<vmem>>, vector<1x8x128xf32>
    %589 = vector.shape_cast %588 : vector<1x8x128xf32> to vector<8x128xf32>
    %590 = vector.shape_cast %578 : vector<8x128xf32> to vector<1x8x128xf32>
    tpu.vector_store %arg11[%c1_187, %c0_188, %c0_189], %590 {strides = array<i32>} : memref<2x8x128xf32, #tpu.memory_space<vmem>>, vector<1x8x128xf32>,
    %c0_190 = arith.constant 0 : index
    %c0_191 = arith.constant 0 : index
    %c0_192 = arith.constant 0 : index
    %591 = vector.load %arg13[%c0_190, %c0_191, %c0_192] : memref<8x8x128xf32, #tpu.memory_space<vmem>>, vector<8x1x128xf32>
    %592 = vector.shape_cast %591 : vector<8x1x128xf32> to vector<8x128xf32>
    %c0_193 = arith.constant 0 : index
    %c0_194 = arith.constant 0 : index
    %c0_195 = arith.constant 0 : index
    %593 = vector.load %arg9[%c0_193, %c0_194, %c0_195] : memref<8x8x128xf32, #tpu.memory_space<vmem>>, vector<1x8x128xf32>
    %594 = vector.shape_cast %593 : vector<1x8x128xf32> to vector<8x128xf32>
    %595 = vector.shape_cast %592 : vector<8x128xf32> to vector<1x8x128xf32>
    tpu.vector_store %arg9[%c0_193, %c0_194, %c0_195], %595 {strides = array<i32>} : memref<8x8x128xf32, #tpu.memory_space<vmem>>, vector<1x8x128xf32>,
    %c0_196 = arith.constant 0 : index
    %c1_197 = arith.constant 1 : index
    %c0_198 = arith.constant 0 : index
    %596 = vector.load %arg13[%c0_196, %c1_197, %c0_198] : memref<8x8x128xf32, #tpu.memory_space<vmem>>, vector<8x1x128xf32>
    %597 = vector.shape_cast %596 : vector<8x1x128xf32> to vector<8x128xf32>
    %c1_199 = arith.constant 1 : index
    %c0_200 = arith.constant 0 : index
    %c0_201 = arith.constant 0 : index
    %598 = vector.load %arg9[%c1_199, %c0_200, %c0_201] : memref<8x8x128xf32, #tpu.memory_space<vmem>>, vector<1x8x128xf32>
    %599 = vector.shape_cast %598 : vector<1x8x128xf32> to vector<8x128xf32>
    %600 = vector.shape_cast %597 : vector<8x128xf32> to vector<1x8x128xf32>
    tpu.vector_store %arg9[%c1_199, %c0_200, %c0_201], %600 {strides = array<i32>} : memref<8x8x128xf32, #tpu.memory_space<vmem>>, vector<1x8x128xf32>,
    %c0_202 = arith.constant 0 : index
    %c2 = arith.constant 2 : index
    %c0_203 = arith.constant 0 : index
    %601 = vector.load %arg13[%c0_202, %c2, %c0_203] : memref<8x8x128xf32, #tpu.memory_space<vmem>>, vector<8x1x128xf32>
    %602 = vector.shape_cast %601 : vector<8x1x128xf32> to vector<8x128xf32>
    %c2_204 = arith.constant 2 : index
    %c0_205 = arith.constant 0 : index
    %c0_206 = arith.constant 0 : index
    %603 = vector.load %arg9[%c2_204, %c0_205, %c0_206] : memref<8x8x128xf32, #tpu.memory_space<vmem>>, vector<1x8x128xf32>
    %604 = vector.shape_cast %603 : vector<1x8x128xf32> to vector<8x128xf32>
    %605 = vector.shape_cast %602 : vector<8x128xf32> to vector<1x8x128xf32>
    tpu.vector_store %arg9[%c2_204, %c0_205, %c0_206], %605 {strides = array<i32>} : memref<8x8x128xf32, #tpu.memory_space<vmem>>, vector<1x8x128xf32>,
    %c0_207 = arith.constant 0 : index
    %c3 = arith.constant 3 : index
    %c0_208 = arith.constant 0 : index
    %606 = vector.load %arg13[%c0_207, %c3, %c0_208] : memref<8x8x128xf32, #tpu.memory_space<vmem>>, vector<8x1x128xf32>
    %607 = vector.shape_cast %606 : vector<8x1x128xf32> to vector<8x128xf32>
    %c3_209 = arith.constant 3 : index
    %c0_210 = arith.constant 0 : index
    %c0_211 = arith.constant 0 : index
    %608 = vector.load %arg9[%c3_209, %c0_210, %c0_211] : memref<8x8x128xf32, #tpu.memory_space<vmem>>, vector<1x8x128xf32>
    %609 = vector.shape_cast %608 : vector<1x8x128xf32> to vector<8x128xf32>
    %610 = vector.shape_cast %607 : vector<8x128xf32> to vector<1x8x128xf32>
    tpu.vector_store %arg9[%c3_209, %c0_210, %c0_211], %610 {strides = array<i32>} : memref<8x8x128xf32, #tpu.memory_space<vmem>>, vector<1x8x128xf32>,
    %c0_212 = arith.constant 0 : index
    %c4 = arith.constant 4 : index
    %c0_213 = arith.constant 0 : index
    %611 = vector.load %arg13[%c0_212, %c4, %c0_213] : memref<8x8x128xf32, #tpu.memory_space<vmem>>, vector<8x1x128xf32>
    %612 = vector.shape_cast %611 : vector<8x1x128xf32> to vector<8x128xf32>
    %c4_214 = arith.constant 4 : index
    %c0_215 = arith.constant 0 : index
    %c0_216 = arith.constant 0 : index
    %613 = vector.load %arg9[%c4_214, %c0_215, %c0_216] : memref<8x8x128xf32, #tpu.memory_space<vmem>>, vector<1x8x128xf32>
    %614 = vector.shape_cast %613 : vector<1x8x128xf32> to vector<8x128xf32>
    %615 = vector.shape_cast %612 : vector<8x128xf32> to vector<1x8x128xf32>
    tpu.vector_store %arg9[%c4_214, %c0_215, %c0_216], %615 {strides = array<i32>} : memref<8x8x128xf32, #tpu.memory_space<vmem>>, vector<1x8x128xf32>,
    %c0_217 = arith.constant 0 : index
    %c5 = arith.constant 5 : index
    %c0_218 = arith.constant 0 : index
    %616 = vector.load %arg13[%c0_217, %c5, %c0_218] : memref<8x8x128xf32, #tpu.memory_space<vmem>>, vector<8x1x128xf32>
    %617 = vector.shape_cast %616 : vector<8x1x128xf32> to vector<8x128xf32>
    %c5_219 = arith.constant 5 : index
    %c0_220 = arith.constant 0 : index
    %c0_221 = arith.constant 0 : index
    %618 = vector.load %arg9[%c5_219, %c0_220, %c0_221] : memref<8x8x128xf32, #tpu.memory_space<vmem>>, vector<1x8x128xf32>
    %619 = vector.shape_cast %618 : vector<1x8x128xf32> to vector<8x128xf32>
    %620 = vector.shape_cast %617 : vector<8x128xf32> to vector<1x8x128xf32>
    tpu.vector_store %arg9[%c5_219, %c0_220, %c0_221], %620 {strides = array<i32>} : memref<8x8x128xf32, #tpu.memory_space<vmem>>, vector<1x8x128xf32>,
    %c0_222 = arith.constant 0 : index
    %c6 = arith.constant 6 : index
    %c0_223 = arith.constant 0 : index
    %621 = vector.load %arg13[%c0_222, %c6, %c0_223] : memref<8x8x128xf32, #tpu.memory_space<vmem>>, vector<8x1x128xf32>
    %622 = vector.shape_cast %621 : vector<8x1x128xf32> to vector<8x128xf32>
    %c6_224 = arith.constant 6 : index
    %c0_225 = arith.constant 0 : index
    %c0_226 = arith.constant 0 : index
    %623 = vector.load %arg9[%c6_224, %c0_225, %c0_226] : memref<8x8x128xf32, #tpu.memory_space<vmem>>, vector<1x8x128xf32>
    %624 = vector.shape_cast %623 : vector<1x8x128xf32> to vector<8x128xf32>
    %625 = vector.shape_cast %622 : vector<8x128xf32> to vector<1x8x128xf32>
    tpu.vector_store %arg9[%c6_224, %c0_225, %c0_226], %625 {strides = array<i32>} : memref<8x8x128xf32, #tpu.memory_space<vmem>>, vector<1x8x128xf32>,
    %c0_227 = arith.constant 0 : index
    %c7 = arith.constant 7 : index
    %c0_228 = arith.constant 0 : index
    %626 = vector.load %arg13[%c0_227, %c7, %c0_228] : memref<8x8x128xf32, #tpu.memory_space<vmem>>, vector<8x1x128xf32>
    %627 = vector.shape_cast %626 : vector<8x1x128xf32> to vector<8x128xf32>
    %c7_229 = arith.constant 7 : index
    %c0_230 = arith.constant 0 : index
    %c0_231 = arith.constant 0 : index
    %628 = vector.load %arg9[%c7_229, %c0_230, %c0_231] : memref<8x8x128xf32, #tpu.memory_space<vmem>>, vector<1x8x128xf32>
    %629 = vector.shape_cast %628 : vector<1x8x128xf32> to vector<8x128xf32>
    %630 = vector.shape_cast %627 : vector<8x128xf32> to vector<1x8x128xf32>
    tpu.vector_store %arg9[%c7_229, %c0_230, %c0_231], %630 {strides = array<i32>} : memref<8x8x128xf32, #tpu.memory_space<vmem>>, vector<1x8x128xf32>,
    return
  }
  func.func @transform_0(%arg0: i32, %arg1: i32) -> (i32, i32, i32) {
    %c0_i32 = arith.constant 0 : i32
    %c0_i32_0 = arith.constant 0 : i32
    return %arg1, %arg0, %c0_i32 : i32, i32, i32
  }
  func.func @transform_1(%arg0: i32, %arg1: i32) -> (i32, i32) {
    %c0_i32 = arith.constant 0 : i32
    %c0_i32_0 = arith.constant 0 : i32
    %c0_i32_1 = arith.constant 0 : i32
    return %c0_i32, %c0_i32_0 : i32, i32
  }
  func.func @transform_2(%arg0: i32, %arg1: i32) -> (i32, i32) {
    %c0_i32 = arith.constant 0 : i32
    %c0_i32_0 = arith.constant 0 : i32
    %c0_i32_1 = arith.constant 0 : i32
    return %c0_i32, %c0_i32_0 : i32, i32
  }
  func.func @transform_3(%arg0: i32, %arg1: i32) -> (i32, i32, i32) {
    %c0_i32 = arith.constant 0 : i32
    %c0_i32_0 = arith.constant 0 : i32
    %c0_i32_1 = arith.constant 0 : i32
    %c0_i32_2 = arith.constant 0 : i32
    return %c0_i32, %c0_i32_0, %c0_i32_1 : i32, i32, i32
  }
  func.func @transform_4(%arg0: i32, %arg1: i32) -> (i32, i32, i32) {
    %c0_i32 = arith.constant 0 : i32
    %c0_i32_0 = arith.constant 0 : i32
    %c0_i32_1 = arith.constant 0 : i32
    %c0_i32_2 = arith.constant 0 : i32
    return %c0_i32, %c0_i32_0, %c0_i32_1 : i32, i32, i32
  }
  func.func @transform_5(%arg0: i32, %arg1: i32) -> (i32, i32, i32) {
    %c0_i32 = arith.constant 0 : i32
    %c0_i32_0 = arith.constant 0 : i32
    %c0_i32_1 = arith.constant 0 : i32
    return %c0_i32, %arg0, %c0_i32_0 : i32, i32, i32
  }
  func.func @transform_6(%arg0: i32, %arg1: i32) -> (i32, i32, i32) {
    %c0_i32 = arith.constant 0 : i32
    %c0_i32_0 = arith.constant 0 : i32
    %c0_i32_1 = arith.constant 0 : i32
    return %c0_i32, %arg0, %c0_i32_0 : i32, i32, i32
  }
  func.func @transform_7(%arg0: i32, %arg1: i32) -> (i32, i32, i32) {
    %c0_i32 = arith.constant 0 : i32
    %c0_i32_0 = arith.constant 0 : i32
    return %arg0, %arg1, %c0_i32 : i32, i32, i32
  }
  func.func @transform_8(%arg0: i32, %arg1: i32) -> (i32, i32, i32) {
    %c0_i32 = arith.constant 0 : i32
    %c0_i32_0 = arith.constant 0 : i32
    %c0_i32_1 = arith.constant 0 : i32
    return %c0_i32, %arg0, %c0_i32_0 : i32, i32, i32
  }
  func.func @transform_9(%arg0: i32, %arg1: i32) -> (i32, i32, i32) {
    %c0_i32 = arith.constant 0 : i32
    %c0_i32_0 = arith.constant 0 : i32
    %c0_i32_1 = arith.constant 0 : i32
    return %c0_i32, %arg0, %c0_i32_0 : i32, i32, i32
  }
}

</mosaic_0001>

<bundles_post_ra>
// kernel: tpu_custom_call.1
= control target key start
LH: loop header
LB: loop body
LE: loop exit
PB: predicated region body
PF: predicated region fallthrough
CT: control target
= control target key end

     0   :  { %15 = vsyncpa [#allocation5], 0  ;;  %s7194_s0 = inlined_call_operand.hbm [shape: f32[8,8,128], index: 0, kind: input, shape index: {}]   ;;  %s7195_s1 = inlined_call_operand.hbm [shape: f32[128,512], index: 1, kind: input, shape index: {}]   ;;  %s7196_s2 = inlined_call_operand.hbm [shape: f32[128,512], index: 2, kind: input, shape index: {}]   ;;  %s7197_s3 = inlined_call_operand.hbm [shape: f32[2,128,512], index: 3, kind: input, shape index: {}]   ;;  %s7198_s4 = inlined_call_operand.hbm [shape: f32[2,1,512], index: 4, kind: input, shape index: {}]   ;;  %s7199_s5 = inlined_call_operand.vmem [shape: f32[2,8,128], index: 5, kind: input, shape index: {}]   ;;  %s7200_s6 = inlined_call_operand.hbm [shape: f32[2,8,128], index: 6, kind: input, shape index: {}]   ;;  %s7201_s7 = inlined_call_operand.hbm [shape: f32[8,8,128], index: 7, kind: output, shape index: {0}]   ;;  %s7202_s8 = inlined_call_operand.hbm [shape: f32[2,8,128], index: 8, kind: output, shape index: {1}]   ;;  %s7203_s9 = inlined_call_operand.hbm [shape: f32[2,8,128], index: 9, kind: output, shape index: {2}]  }
   0x1   :  { %16 = vsyncpa [#allocation8], 0 }
   0x2   :  { %17 = vsyncpa [#allocation11], 0 }
   0x3   :  { %18 = vsyncpa [#allocation14], 0 }
   0x4   :  { %19 = vsyncpa [#allocation6], 0 }
   0x5   :  { %20 = vsyncpa [#allocation17], 0  ;;  %s5914_s30 = smov [#allocation7]   ;;  %s5704_s13 = scalar_lea.hbm %s7195_s1, 8192 }
   0x6   :  { %s38_s10 = sshll.u32 %s5914_s30, 4  ;;  %p5705_p0 = scmp.ne.s32.totalorder %s7195_s1, %s5704_s13  ;;  %s39_s10 = int_to_ptr.vmem [resolvable:$true] %s38_s10 }
   0x7   :  { %p5708_p1 = scmp.lt.u32.totalorder %s5704_s13, %s7195_s1 }
   0x9   :  { %p5710_p2 = pnand %p5708_p1, %p5705_p0 }
   0xb   :  { %5713 = shalt.err (!%p5710_p2)
}
   0xc   :  { %s5714_s18 = scalar_lea.vmem %s39_s10, 8192  ;;  %p5719_p4 = scmp.lt.s32.totalorder %s39_s10, %s39_s10 }
   0xd   :  { %p5715_p3 = scmp.ne.s32.totalorder %s39_s10, %s5714_s18  ;;  %p5720_p5 = scmp.lt.s32.totalorder %s5714_s18, %s5714_s18 }
   0xf   :  { %p5721_p6 = por %p5720_p5, %p5719_p4 }
  0x11   :  { %p5722_p7 = pnand %p5721_p6, %p5715_p3 }
  0x13   :  { %5725 = shalt.err (!%p5722_p7)
}
  0x14   :  { %s5915_s19 = smov 512   ;;  %s5916_s20 = smov 32  }
  0x15   :  { %44 = dma.hbm_to_vmem [thread:$0]  %s7195_s1, 8192, %s39_s10, [#allocation8], %s5915_s19, %s5915_s19, %s5916_s20  }
  0x16   :  { %s5917_s23 = smov [#allocation10]   ;;  %s5918_s25 = smov [#allocation4]  }
  0x17   :  { %s62_s24 = sshll.u32 %s5917_s23, 4  ;;  %s26_s26 = sshll.u32 %s5918_s25, 4  ;;  %s63_s24 = int_to_ptr.vmem [resolvable:$true] %s62_s24  ;;  %s27_s26 = int_to_ptr.vmem [resolvable:$true] %s26_s26 }
  0x18   :  { %s5726_s29 = scalar_lea.hbm %s7197_s3, 16384 }
  0x19   :  { %p5727_p8 = scmp.ne.s32.totalorder %s7197_s3, %s5726_s29  ;;  %p5730_p9 = scmp.lt.u32.totalorder %s5726_s29, %s7197_s3 }
  0x1b   :  { %p5732_p10 = pnand %p5730_p9, %p5727_p8 }
  0x1d   :  { %5735 = shalt.err (!%p5732_p10)
}
  0x1e   :  { %s5736_s1 = scalar_lea.vmem %s63_s24, 16384  ;;  %p5741_p12 = scmp.lt.s32.totalorder %s63_s24, %s63_s24 }
  0x1f   :  { %p5737_p11 = scmp.ne.s32.totalorder %s63_s24, %s5736_s1  ;;  %p5742_p13 = scmp.lt.s32.totalorder %s5736_s1, %s5736_s1 }
  0x21   :  { %p5743_p0 = por %p5742_p13, %p5741_p12 }
  0x23   :  { %p5744_p1 = pnand %p5743_p0, %p5737_p11 }
  0x25   :  { %5747 = shalt.err (!%p5744_p1)
}
  0x26   :  { %68 = dma.hbm_to_vmem [thread:$0]  %s7197_s3, 16384, %s63_s24, [#allocation11], %s5915_s19, %s5915_s19, %s5916_s20  }
  0x27   :  { %s5748_s17 = scalar_lea.hbm %s7194_s0, 1024 }
  0x28   :  { %p5749_p2 = scmp.ne.s32.totalorder %s7194_s0, %s5748_s17  ;;  %p5752_p3 = scmp.lt.u32.totalorder %s5748_s17, %s7194_s0 }
  0x2a   :  { %p5754_p4 = pnand %p5752_p3, %p5749_p2 }
  0x2c   :  { %5757 = shalt.err (!%p5754_p4)
}
  0x2d   :  { %s5758_s25 = scalar_lea.vmem %s27_s26, 1024  ;;  %p5763_p6 = scmp.lt.s32.totalorder %s27_s26, %s27_s26 }
  0x2e   :  { %p5759_p5 = scmp.ne.s32.totalorder %s27_s26, %s5758_s25  ;;  %p5764_p7 = scmp.lt.s32.totalorder %s5758_s25, %s5758_s25 }
  0x30   :  { %p5765_p8 = por %p5764_p7, %p5763_p6 }
  0x32   :  { %p5766_p9 = pnand %p5765_p8, %p5759_p5 }
  0x34   :  { %5769 = shalt.err (!%p5766_p9)
}
  0x35   :  { %s5919_s3 = smov 128   ;;  %s5920_s24 = smov 8  }
  0x36   :  { %32 = dma.hbm_to_vmem [thread:$0]  %s7194_s0, 1024, %s27_s26, [#allocation5], %s5919_s3, %s5919_s3, %s5920_s24  }
  0x37   :  { %s5921_s29 = smov [#allocation9]   ;;  %s5922_s11 = smov [#allocation12]  }
  0x38   :  { %s50_s30 = sshll.u32 %s5921_s29, 4  ;;  %s74_s12 = sshll.u32 %s5922_s11, 4  ;;  %s51_s30 = int_to_ptr.vmem [resolvable:$true] %s50_s30  ;;  %s75_s12 = int_to_ptr.vmem [resolvable:$true] %s74_s12 }
  0x39   :  { %s5770_s10 = scalar_lea.hbm %s7196_s2, 8192 }
  0x3a   :  { %p5771_p10 = scmp.ne.s32.totalorder %s7196_s2, %s5770_s10  ;;  %p5774_p11 = scmp.lt.u32.totalorder %s5770_s10, %s7196_s2 }
  0x3c   :  { %p5776_p12 = pnand %p5774_p11, %p5771_p10 }
  0x3e   :  { %5779 = shalt.err (!%p5776_p12)
}
  0x3f   :  { %s5780_s0 = scalar_lea.vmem %s51_s30, 8192  ;;  %p5785_p0 = scmp.lt.s32.totalorder %s51_s30, %s51_s30 }
  0x40   :  { %p5781_p13 = scmp.ne.s32.totalorder %s51_s30, %s5780_s0  ;;  %p5786_p1 = scmp.lt.s32.totalorder %s5780_s0, %s5780_s0 }
  0x42   :  { %p5787_p2 = por %p5786_p1, %p5785_p0 }
  0x44   :  { %p5788_p3 = pnand %p5787_p2, %p5781_p13 }
  0x46   :  { %5791 = shalt.err (!%p5788_p3)
}
  0x47   :  { %56 = dma.hbm_to_vmem [thread:$0]  %s7196_s2, 8192, %s51_s30, [#allocation8], %s5915_s19, %s5915_s19, %s5916_s20  }
  0x48   :  { %s5792_s23 = scalar_lea.hbm %s7198_s4, 128 }
  0x49   :  { %p5793_p4 = scmp.ne.s32.totalorder %s7198_s4, %s5792_s23  ;;  %p5796_p5 = scmp.lt.u32.totalorder %s5792_s23, %s7198_s4 }
  0x4b   :  { %p5798_p6 = pnand %p5796_p5, %p5793_p4 }
  0x4d   :  { %5801 = shalt.err (!%p5798_p6)
}
  0x4e   :  { %s5802_s11 = scalar_lea.vmem %s75_s12, 128  ;;  %p5807_p8 = scmp.lt.s32.totalorder %s75_s12, %s75_s12 }
  0x4f   :  { %p5803_p7 = scmp.ne.s32.totalorder %s75_s12, %s5802_s11  ;;  %p5808_p9 = scmp.lt.s32.totalorder %s5802_s11, %s5802_s11 }
  0x51   :  { %p5809_p10 = por %p5808_p9, %p5807_p8 }
  0x53   :  { %p5810_p11 = pnand %p5809_p10, %p5803_p7 }
  0x55   :  { %5813 = shalt.err (!%p5810_p11)
}
  0x56   :  { %s5923_s2 = smov 64   ;;  %s5924_s19 = smov 4  }
  0x57   :  { %80 = dma.hbm_to_vmem [thread:$0]  %s7198_s4, 128, %s75_s12, [#allocation11], %s5923_s2, %s5923_s2, %s5924_s19  }
  0x58   :  { %s5925_s13 = smov [#allocation13]   ;;  %s5814_s15 = scalar_lea.hbm %s7200_s6, 256 }
  0x59   :  { %s88_s1 = sshll.u32 %s5925_s13, 4  ;;  %p5815_p12 = scmp.ne.s32.totalorder %s7200_s6, %s5814_s15  ;;  %s89_s1 = int_to_ptr.vmem [resolvable:$true] %s88_s1 }
  0x5a   :  { %p5818_p13 = scmp.lt.u32.totalorder %s5814_s15, %s7200_s6 }
  0x5c   :  { %p5820_p0 = pnand %p5818_p13, %p5815_p12 }
  0x5e   :  { %5823 = shalt.err (!%p5820_p0)
}
  0x5f   :  { %s5824_s18 = scalar_lea.vmem %s89_s1, 256  ;;  %p5829_p2 = scmp.lt.s32.totalorder %s89_s1, %s89_s1 }
  0x60   :  { %p5825_p1 = scmp.ne.s32.totalorder %s89_s1, %s5824_s18  ;;  %p5830_p3 = scmp.lt.s32.totalorder %s5824_s18, %s5824_s18 }
  0x62   :  { %p5831_p4 = por %p5830_p3, %p5829_p2 }
  0x64   :  { %p5832_p5 = pnand %p5831_p4, %p5825_p1 }
  0x66   :  { %5835 = shalt.err (!%p5832_p5)
}
  0x67   :  { %94 = dma.hbm_to_vmem [thread:$0]  %s7200_s6, 256, %s89_s1, [#allocation14], %s5919_s3, %s5919_s3, %s5920_s24  }
  0x68   :  { %5902 = dma.done.wait [#allocation5], 1024  }
  0x69   :  { %5903 = vsyncadd [#allocation5], 4294966272 }
  0x6a   :  { %5904 = dma.done.wait [#allocation8], 16384  }
  0x6b   :  { %5905 = vsyncadd [#allocation8], 4294950912 }
  0x6c   :  { %5906 = dma.done.wait [#allocation11], 16512  }
  0x6d   :  { %5907 = vsyncadd [#allocation11], 4294950784 }
  0x6e   :  { %5908 = dma.done.wait [#allocation14], 256  }
  0x6f   :  { %5909 = vsyncadd [#allocation14], 4294967040  ;;  %v5926_v0 = vmov 0.0   ;;  %v134_v1 = vld [vmem:[#allocation7 + $0x8] sm:$0xff]  ;;  %v136_v3 = vld [vmem:[#allocation7 + $0x18] sm:$0xff]  ;;  %vm3800_vm0 = vcmask 1041409  }
  0x70   :  { %283 = vmatprep.mubr.f32.mxu0 %v5926_v0  ;;  %396 = vmatprep.mubr.f32.mxu1 %v5926_v0  ;;  %v138_v2 = vld [vmem:[#allocation7 + $0x28] sm:$0xff]  ;;  %v140_v5 = vld [vmem:[#allocation7 + $0x38] sm:$0xff]  ;;  %v133_v6 = vld [vmem:[#allocation7] sm:$0xff]  ;;  %vm3803_vm1 = vcmask 1042434   ;;  %vm3806_vm2 = vcmask 1043459   ;;  %vm3809_vm3 = vcmask 1044484  }
  0x71   :  { %v4152_v4 = vpack.c.bf16 %v138_v2, %v134_v1  ;;  %v137_v7 = vld [vmem:[#allocation7 + $0x20] sm:$0xff]  ;;  %v4184_v8 = vpack.c.bf16 %v140_v5, %v136_v3  ;;  %v135_v10 = vld [vmem:[#allocation7 + $0x10] sm:$0xff]  ;;  %v142_v12 = vld [vmem:[#allocation7 + $0x48] sm:$0xff]  ;;  %s5928_s27 = smov [#allocation18]   ;;  %vm3812_vm4 = vcmask 1045509  }
  0x72   :  { %v4154_v9 = vpack.c.bf16 %v137_v7, %v133_v6  ;;  %v139_v11 = vld [vmem:[#allocation7 + $0x30] sm:$0xff]  ;;  %v146_v14 = vld [vmem:[#allocation7 + $0x68] sm:$0xff]  ;;  %v144_v15 = vld [vmem:[#allocation7 + $0x58] sm:$0xff]  ;;  %s4082_s28 = sshll.u32 %s5928_s27, 4  ;;  %s7090_s28 = int_to_ptr.vmem [resolvable:$true] %s4082_s28 }
  0x73   :  { %4153 = vmatprep.subr.bf16.mxu0 %v4152_v4  ;;  %v4186_v13 = vpack.c.bf16 %v139_v11, %v135_v10  ;;  %v148_v16 = vld [vmem:[#allocation7 + $0x78] sm:$0xff]  ;;  %4185 = vmatprep.subr.bf16.mxu1 %v4184_v8  ;;  %v4156_v17 = vpack.c.bf16 %v146_v14, %v142_v12  ;;  %v141_v19 = vld [vmem:[#allocation7 + $0x40] sm:$0xff]  ;;  %v143_v21 = vld [vmem:[#allocation7 + $0x50] sm:$0xff] }
  0x74   :  { %4155 = vmatpush1.bf16.msra.mxu0 %v4154_v9  ;;  %v4188_v18 = vpack.c.bf16 %v148_v16, %v144_v15  ;;  %v145_v20 = vld [vmem:[#allocation7 + $0x60] sm:$0xff]  ;;  %v147_v23 = vld [vmem:[#allocation7 + $0x70] sm:$0xff]  ;;  %v150_v24 = vld [vmem:[#allocation7 + $0x88] sm:$0xff] }
  0x75   :  { %4187 = vmatpush1.bf16.msra.mxu1 %v4186_v13  ;;  %v4158_v22 = vpack.c.bf16 %v145_v20, %v141_v19  ;;  %v154_v25 = vld [vmem:[#allocation7 + $0xa8] sm:$0xff]  ;;  %4157 = vmatprep.subr.bf16.mxu0 %v4156_v17  ;;  %v4190_v26 = vpack.c.bf16 %v147_v23, %v143_v21  ;;  %v152_v28 = vld [vmem:[#allocation7 + $0x98] sm:$0xff]  ;;  %v149_v30 = vld [vmem:[#allocation7 + $0x80] sm:$0xff] }
  0x76   :  { %4189 = vmatprep.subr.bf16.mxu1 %v4188_v18  ;;  %v4160_v27 = vpack.c.bf16 %v154_v25, %v150_v24  ;;  %v156_v29 = vld [vmem:[#allocation7 + $0xb8] sm:$0xff]  ;;  %v153_v32 = vld [vmem:[#allocation7 + $0xa0] sm:$0xff]  ;;  %v151_v33 = vld [vmem:[#allocation7 + $0x90] sm:$0xff] }
  0x77   :  { %v4192_v31 = vpack.c.bf16 %v156_v29, %v152_v28  ;;  %v155_v34 = vld [vmem:[#allocation7 + $0xb0] sm:$0xff]  ;;  %v4162_v35 = vpack.c.bf16 %v153_v32, %v149_v30  ;;  %v158_v36 = vld [vmem:[#allocation7 + $0xc8] sm:$0xff]  ;;  %v160_v38 = vld [vmem:[#allocation7 + $0xd8] sm:$0xff] }
  0x78   :  { %4159 = vmatpush1.bf16.msra.mxu0 %v4158_v22  ;;  %v162_v37 = vld [vmem:[#allocation7 + $0xe8] sm:$0xff]  ;;  %v4194_v39 = vpack.c.bf16 %v155_v34, %v151_v33  ;;  %v164_v41 = vld [vmem:[#allocation7 + $0xf8] sm:$0xff]  ;;  %v157_v42 = vld [vmem:[#allocation7 + $0xc0] sm:$0xff] }
  0x79   :  { %4191 = vmatpush1.bf16.msra.mxu1 %v4190_v26  ;;  %4161 = vmatprep.subr.bf16.mxu0 %v4160_v27  ;;  %v4164_v40 = vpack.c.bf16 %v162_v37, %v158_v36  ;;  %v161_v43 = vld [vmem:[#allocation7 + $0xe0] sm:$0xff]  ;;  %v4196_v44 = vpack.c.bf16 %v164_v41, %v160_v38  ;;  %v159_v45 = vld [vmem:[#allocation7 + $0xd0] sm:$0xff]  ;;  %v166_v47 = vld [vmem:[#allocation7 + $0x108] sm:$0xff] }
  0x7a   :  { %4193 = vmatprep.subr.bf16.mxu1 %v4192_v31  ;;  %v163_v46 = vld [vmem:[#allocation7 + $0xf0] sm:$0xff]  ;;  %v170_v48 = vld [vmem:[#allocation7 + $0x128] sm:$0xff]  ;;  %v168_v49 = vld [vmem:[#allocation7 + $0x118] sm:$0xff]  ;;  %v4166_v51 = vpack.c.bf16 %v161_v43, %v157_v42 }
  0x7b   :  { %v172_v50 = vld [vmem:[#allocation7 + $0x138] sm:$0xff]  ;;  %v4198_v52 = vpack.c.bf16 %v163_v46, %v159_v45  ;;  %v4168_v53 = vpack.c.bf16 %v170_v48, %v166_v47  ;;  %v165_v54 = vld [vmem:[#allocation7 + $0x100] sm:$0xff]  ;;  %v167_v56 = vld [vmem:[#allocation7 + $0x110] sm:$0xff] }
  0x7c   :  { %4163 = vmatpush1.bf16.msra.mxu0 %v4162_v35  ;;  %v169_v55 = vld [vmem:[#allocation7 + $0x120] sm:$0xff]  ;;  %v4200_v57 = vpack.c.bf16 %v172_v50, %v168_v49  ;;  %v171_v58 = vld [vmem:[#allocation7 + $0x130] sm:$0xff]  ;;  %v174_v59 = vld [vmem:[#allocation7 + $0x148] sm:$0xff] }
  0x7d   :  { %4195 = vmatpush1.bf16.msra.mxu1 %v4194_v39  ;;  %4165 = vmatprep.subr.bf16.mxu0 %v4164_v40  ;;  %v178_v60 = vld [vmem:[#allocation7 + $0x168] sm:$0xff]  ;;  %v176_v61 = vld [vmem:[#allocation7 + $0x158] sm:$0xff]  ;;  %v4170_v63 = vpack.c.bf16 %v169_v55, %v165_v54  ;;  %v4202_v1 = vpack.c.bf16 %v171_v58, %v167_v56  ;;  %v173_v3 = vld [vmem:[#allocation7 + $0x140] sm:$0xff] }
  0x7e   :  { %4197 = vmatprep.subr.bf16.mxu1 %v4196_v44  ;;  %v180_v62 = vld [vmem:[#allocation7 + $0x178] sm:$0xff]  ;;  %v4172_v2 = vpack.c.bf16 %v178_v60, %v174_v59  ;;  %v177_v4 = vld [vmem:[#allocation7 + $0x160] sm:$0xff]  ;;  %v175_v5 = vld [vmem:[#allocation7 + $0x150] sm:$0xff] }
  0x7f   :  { %v4204_v6 = vpack.c.bf16 %v180_v62, %v176_v61  ;;  %v179_v7 = vld [vmem:[#allocation7 + $0x170] sm:$0xff]  ;;  %v182_v8 = vld [vmem:[#allocation7 + $0x188] sm:$0xff]  ;;  %v184_v10 = vld [vmem:[#allocation7 + $0x198] sm:$0xff]  ;;  %v4174_v12 = vpack.c.bf16 %v177_v4, %v173_v3 }
  0x80   :  { %4167 = vmatpush1.bf16.msra.mxu0 %v4166_v51  ;;  %v186_v9 = vld [vmem:[#allocation7 + $0x1a8] sm:$0xff]  ;;  %v188_v11 = vld [vmem:[#allocation7 + $0x1b8] sm:$0xff]  ;;  %v4206_v13 = vpack.c.bf16 %v179_v7, %v175_v5  ;;  %v181_v15 = vld [vmem:[#allocation7 + $0x180] sm:$0xff] }
  0x81   :  { %4199 = vmatpush1.bf16.msra.mxu1 %v4198_v52  ;;  %4169 = vmatprep.subr.bf16.mxu0 %v4168_v53  ;;  %v4176_v14 = vpack.c.bf16 %v186_v9, %v182_v8  ;;  %v185_v16 = vld [vmem:[#allocation7 + $0x1a0] sm:$0xff]  ;;  %v183_v17 = vld [vmem:[#allocation7 + $0x190] sm:$0xff]  ;;  %v4208_v18 = vpack.c.bf16 %v188_v11, %v184_v10  ;;  %v190_v20 = vld [vmem:[#allocation7 + $0x1c8] sm:$0xff] }
  0x82   :  { %4201 = vmatprep.subr.bf16.mxu1 %v4200_v57  ;;  %v187_v19 = vld [vmem:[#allocation7 + $0x1b0] sm:$0xff]  ;;  %v194_v21 = vld [vmem:[#allocation7 + $0x1e8] sm:$0xff]  ;;  %v192_v22 = vld [vmem:[#allocation7 + $0x1d8] sm:$0xff]  ;;  %v4178_v24 = vpack.c.bf16 %v185_v16, %v181_v15 }
  0x83   :  { %v196_v23 = vld [vmem:[#allocation7 + $0x1f8] sm:$0xff]  ;;  %v4210_v25 = vpack.c.bf16 %v187_v19, %v183_v17  ;;  %v4180_v26 = vpack.c.bf16 %v194_v21, %v190_v20  ;;  %v189_v27 = vld [vmem:[#allocation7 + $0x1c0] sm:$0xff]  ;;  %v191_v29 = vld [vmem:[#allocation7 + $0x1d0] sm:$0xff] }
  0x84   :  { %4171 = vmatpush1.bf16.msra.mxu0 %v4170_v63  ;;  %v193_v28 = vld [vmem:[#allocation7 + $0x1e0] sm:$0xff]  ;;  %v4212_v30 = vpack.c.bf16 %v196_v23, %v192_v22  ;;  %v195_v31 = vld [vmem:[#allocation7 + $0x1f0] sm:$0xff]  ;;  %v478_v32 = vld [vmem:[#allocation10 + $0x8] sm:$0xff] }
  0x85   :  { %4203 = vmatpush1.bf16.msra.mxu1 %v4202_v1  ;;  %4173 = vmatprep.subr.bf16.mxu0 %v4172_v2  ;;  %v482_v33 = vld [vmem:[#allocation10 + $0x28] sm:$0xff]  ;;  %v480_v34 = vld [vmem:[#allocation10 + $0x18] sm:$0xff]  ;;  %v4182_v36 = vpack.c.bf16 %v193_v28, %v189_v27  ;;  %v4214_v37 = vpack.c.bf16 %v195_v31, %v191_v29  ;;  %v477_v39 = vld [vmem:[#allocation10] sm:$0xff] }
  0x86   :  { %4205 = vmatprep.subr.bf16.mxu1 %v4204_v6  ;;  %v484_v35 = vld [vmem:[#allocation10 + $0x38] sm:$0xff]  ;;  %v6069_v38 = vpack.c.bf16 %v482_v33, %v478_v32  ;;  %v481_v40 = vld [vmem:[#allocation10 + $0x20] sm:$0xff]  ;;  %v479_v42 = vld [vmem:[#allocation10 + $0x10] sm:$0xff] }
  0x87   :  { %v6071_v41 = vpack.c.bf16 %v484_v35, %v480_v34  ;;  %v483_v43 = vld [vmem:[#allocation10 + $0x30] sm:$0xff]  ;;  %v486_v44 = vld [vmem:[#allocation10 + $0x48] sm:$0xff]  ;;  %v125_v46 = vld [vmem:[#allocation4] sm:$0xff]  ;;  %v6073_v47 = vpack.c.bf16 %v481_v40, %v477_v39 }
  0x88   :  { %4175 = vmatpush1.bf16.msra.mxu0 %v4174_v12  ;;  %v490_v45 = vld [vmem:[#allocation10 + $0x68] sm:$0xff]  ;;  %v488_v48 = vld [vmem:[#allocation10 + $0x58] sm:$0xff]  ;;  %v6076_v50 = vpack.c.bf16 %v483_v43, %v479_v42  ;;  %v485_v51 = vld [vmem:[#allocation10 + $0x40] sm:$0xff] }
  0x89   :  { %4207 = vmatpush1.bf16.msra.mxu1 %v4206_v13  ;;  %4177 = vmatprep.subr.bf16.mxu0 %v4176_v14  ;;  %v492_v49 = vld [vmem:[#allocation10 + $0x78] sm:$0xff]  ;;  %v489_v52 = vld [vmem:[#allocation10 + $0x60] sm:$0xff]  ;;  %v6079_v53 = vpack.c.bf16 %v490_v45, %v486_v44  ;;  %v487_v54 = vld [vmem:[#allocation10 + $0x50] sm:$0xff] }
  0x8a   :  { %4209 = vmatprep.subr.bf16.mxu1 %v4208_v18  ;;  %v491_v55 = vld [vmem:[#allocation10 + $0x70] sm:$0xff]  ;;  %v6081_v56 = vpack.c.bf16 %v492_v49, %v488_v48  ;;  %v494_v57 = vld [vmem:[#allocation10 + $0x88] sm:$0xff]  ;;  %v6084_v60 = vpack.c.bf16 %v489_v52, %v485_v51  ;;  %v496_v61 = vld [vmem:[#allocation10 + $0x98] sm:$0xff] }
  0x8b   :  { %v498_v58 = vld [vmem:[#allocation10 + $0xa8] sm:$0xff]  ;;  %v500_v62 = vld [vmem:[#allocation10 + $0xb8] sm:$0xff]  ;;  %v6088_v63 = vpack.c.bf16 %v491_v55, %v487_v54  ;;  %v493_v1 = vld [vmem:[#allocation10 + $0x80] sm:$0xff] }
  0x8c   :  { %4179 = vmatpush1.bf16.msra.mxu0 %v4178_v24  ;;  %v126_v59 = vld [vmem:[#allocation4 + $0x8] sm:$0xff]  ;;  %v497_v2 = vld [vmem:[#allocation10 + $0xa0] sm:$0xff]  ;;  %v6092_v3 = vpack.c.bf16 %v498_v58, %v494_v57  ;;  %v495_v4 = vld [vmem:[#allocation10 + $0x90] sm:$0xff]  ;;  %v6095_v6 = vpack.c.bf16 %v500_v62, %v496_v61 }
  0x8d   :  { %4211 = vmatpush1.bf16.msra.mxu1 %v4210_v25  ;;  %4181 = vmatprep.subr.bf16.mxu0 %v4180_v26  ;;  %v499_v5 = vld [vmem:[#allocation10 + $0xb0] sm:$0xff]  ;;  %v502_v7 = vld [vmem:[#allocation10 + $0xc8] sm:$0xff]  ;;  %v6098_v10 = vpack.c.bf16 %v497_v2, %v493_v1  ;;  %v504_v11 = vld [vmem:[#allocation10 + $0xd8] sm:$0xff] }
  0x8e   :  { %4213 = vmatprep.subr.bf16.mxu1 %v4212_v30  ;;  %v506_v8 = vld [vmem:[#allocation10 + $0xe8] sm:$0xff]  ;;  %v127_v9 = vld [vmem:[#allocation4 + $0x10] sm:$0xff]  ;;  %v508_v12 = vld [vmem:[#allocation10 + $0xf8] sm:$0xff]  ;;  %v6102_v13 = vpack.c.bf16 %v499_v5, %v495_v4 }
  0x8f   :  { %v501_v14 = vld [vmem:[#allocation10 + $0xc0] sm:$0xff]  ;;  %v6106_v16 = vpack.c.bf16 %v506_v8, %v502_v7  ;;  %v503_v17 = vld [vmem:[#allocation10 + $0xd0] sm:$0xff]  ;;  %v6109_v19 = vpack.c.bf16 %v508_v12, %v504_v11  ;;  %v510_v20 = vld [vmem:[#allocation10 + $0x108] sm:$0xff] }
  0x90   :  { %4183 = vmatpush1.bf16.msra.mxu0 %v4182_v36  ;;  %v505_v15 = vld [vmem:[#allocation10 + $0xe0] sm:$0xff]  ;;  %v507_v18 = vld [vmem:[#allocation10 + $0xf0] sm:$0xff]  ;;  %v514_v21 = vld [vmem:[#allocation10 + $0x128] sm:$0xff] }
  0x91   :  { %4215 = vmatpush1.bf16.msra.mxu1 %v4214_v37  ;;  %4217 = vmatprep.subr.bf16.mxu0 %v6069_v38  ;;  %v128_v22 = vld [vmem:[#allocation4 + $0x18] sm:$0xff]  ;;  %v6112_v23 = vpack.c.bf16 %v505_v15, %v501_v14  ;;  %v6116_v26 = vpack.c.bf16 %v507_v18, %v503_v17  ;;  %v509_v27 = vld [vmem:[#allocation10 + $0x100] sm:$0xff]  ;;  %v6120_v29 = vpack.c.bf16 %v514_v21, %v510_v20  ;;  %v511_v30 = vld [vmem:[#allocation10 + $0x110] sm:$0xff] }
  0x92   :  { %4249 = vmatprep.subr.bf16.mxu1 %v6071_v41  ;;  %v512_v24 = vld [vmem:[#allocation10 + $0x118] sm:$0xff]  ;;  %v513_v28 = vld [vmem:[#allocation10 + $0x120] sm:$0xff]  ;;  %v515_v31 = vld [vmem:[#allocation10 + $0x130] sm:$0xff] }
  0x93   :  { %284 = vmatmul.mubr.f32.vlgmr.msra.gmra.mrb[0].mxu0 %v125_v46  ;;  %v516_v25 = vld [vmem:[#allocation10 + $0x138] sm:$0xff]  ;;  %v518_v33 = vld [vmem:[#allocation10 + $0x148] sm:$0xff]  ;;  %v129_v35 = vld [vmem:[#allocation4 + $0x20] sm:$0xff]  ;;  %v6126_v36 = vpack.c.bf16 %v513_v28, %v509_v27  ;;  %v6130_v40 = vpack.c.bf16 %v515_v31, %v511_v30  ;;  %v199_v30 = vlaneseq }
  0x94   :  { %397 = vmatmul.mubr.f32.vlgmr.msra.gmra.mrb[0].mxu1 %v125_v46  ;;  %4219 = vmatpush1.bf16.msra.mxu0 %v6073_v47  ;;  %v6123_v32 = vpack.c.bf16 %v516_v25, %v512_v24  ;;  %v522_v34 = vld [vmem:[#allocation10 + $0x168] sm:$0xff]  ;;  %v520_v37 = vld [vmem:[#allocation10 + $0x158] sm:$0xff]  ;;  %v517_v42 = vld [vmem:[#allocation10 + $0x140] sm:$0xff] }
  0x95   :  { %4251 = vmatpush1.bf16.msra.mxu1 %v6076_v50  ;;  %289 = vmatprep.mubr.f32.mxu0 %v5926_v0  ;;  %v524_v39 = vld [vmem:[#allocation10 + $0x178] sm:$0xff]  ;;  %v521_v43 = vld [vmem:[#allocation10 + $0x160] sm:$0xff]  ;;  %v6134_v44 = vpack.c.bf16 %v522_v34, %v518_v33  ;;  %v519_v45 = vld [vmem:[#allocation10 + $0x150] sm:$0xff]  ;;  %v6220_v31 = vshrl.u32 %v199_v30, 7 }
  0x96   :  { %402 = vmatprep.mubr.f32.mxu1 %v5926_v0  ;;  %4221 = vmatprep.subr.bf16.mxu0 %v6079_v53  ;;  %v523_v46 = vld [vmem:[#allocation10 + $0x170] sm:$0xff]  ;;  %v6137_v48 = vpack.c.bf16 %v524_v39, %v520_v37  ;;  %v526_v49 = vld [vmem:[#allocation10 + $0x188] sm:$0xff]  ;;  %v6140_v54 = vpack.c.bf16 %v521_v43, %v517_v42  ;;  %v528_v55 = vld [vmem:[#allocation10 + $0x198] sm:$0xff] }
  0x97   :  { %290 = vmatmul.mubr.f32.gmra.mrb[2].mxu0 %v126_v59  ;;  %4253 = vmatprep.subr.bf16.mxu1 %v6081_v56  ;;  %v530_v51 = vld [vmem:[#allocation10 + $0x1a8] sm:$0xff]  ;;  %v532_v57 = vld [vmem:[#allocation10 + $0x1b8] sm:$0xff]  ;;  %v6144_v58 = vpack.c.bf16 %v523_v46, %v519_v45  ;;  %v529_v61 = vld [vmem:[#allocation10 + $0x1a0] sm:$0xff]  ;;  %v201_v33 = vsub.s32 0, %v6220_v31  ;;  %v213_v43 = vsub.s32 3, %v6220_v31 }
  0x98   :  { %403 = vmatmul.mubr.f32.gmra.mrb[2].mxu1 %v126_v59  ;;  %4223 = vmatpush1.bf16.msra.mxu0 %v6084_v60  ;;  %v130_v52 = vld [vmem:[#allocation4 + $0x28] sm:$0xff]  ;;  %v525_v59 = vld [vmem:[#allocation10 + $0x180] sm:$0xff]  ;;  %v6148_v62 = vpack.c.bf16 %v530_v51, %v526_v49  ;;  %v527_v1 = vld [vmem:[#allocation10 + $0x190] sm:$0xff]  ;;  %v6151_v4 = vpack.c.bf16 %v532_v57, %v528_v55 }
  0x99   :  { %4255 = vmatpush1.bf16.msra.mxu1 %v6088_v63  ;;  %295 = vmatprep.mubr.f32.mxu0 %v5926_v0  ;;  %v531_v2 = vld [vmem:[#allocation10 + $0x1b0] sm:$0xff]  ;;  %v534_v5 = vld [vmem:[#allocation10 + $0x1c8] sm:$0xff]  ;;  %v536_v11 = vld [vmem:[#allocation10 + $0x1d8] sm:$0xff] }
  0x9a   :  { %408 = vmatprep.mubr.f32.mxu1 %v5926_v0  ;;  %4225 = vmatprep.subr.bf16.mxu0 %v6092_v3  ;;  %v538_v7 = vld [vmem:[#allocation10 + $0x1e8] sm:$0xff]  ;;  %v131_v8 = vld [vmem:[#allocation4 + $0x30] sm:$0xff]  ;;  %v540_v12 = vld [vmem:[#allocation10 + $0x1f8] sm:$0xff]  ;;  %v6158_v14 = vpack.c.bf16 %v531_v2, %v527_v1 }
  0x9b   :  { %296 = vmatmul.mubr.f32.gmra.mrb[4].mxu0 %v127_v9  ;;  %4257 = vmatprep.subr.bf16.mxu1 %v6095_v6  ;;  %v533_v15 = vld [vmem:[#allocation10 + $0x1c0] sm:$0xff]  ;;  %v6162_v18 = vpack.c.bf16 %v538_v7, %v534_v5  ;;  %v535_v20 = vld [vmem:[#allocation10 + $0x1d0] sm:$0xff]  ;;  %v132_v24 = vld [vmem:[#allocation4 + $0x38] sm:$0xff] }
  0x9c   :  { %409 = vmatmul.mubr.f32.gmra.mrb[4].mxu1 %v127_v9  ;;  %4227 = vmatpush1.bf16.msra.mxu0 %v6098_v10  ;;  %v6154_v9 = vpack.c.bf16 %v529_v61, %v525_v59  ;;  %v537_v17 = vld [vmem:[#allocation10 + $0x1e0] sm:$0xff]  ;;  %v539_v21 = vld [vmem:[#allocation10 + $0x1f0] sm:$0xff]  ;;  %v209_v61 = vsub.s32 2, %v6220_v31 }
  0x9d   :  { %4259 = vmatpush1.bf16.msra.mxu1 %v6102_v13  ;;  %301 = vmatprep.mubr.f32.mxu0 %v5926_v0  ;;  %v6168_v25 = vpack.c.bf16 %v537_v17, %v533_v15  ;;  %v6172_v27 = vpack.c.bf16 %v539_v21, %v535_v20  ;;  %v117_v28 = vld [vmem:[%s7199_s5] sm:$0xff]  ;;  %v121_v21 = vld [vmem:[#allocation13] sm:$0xff] }
  0x9e   :  { %414 = vmatprep.mubr.f32.mxu1 %v5926_v0  ;;  %4229 = vmatprep.subr.bf16.mxu0 %v6106_v16  ;;  %v197_v34 = vld [vmem:[#allocation12] sm:$0xf] }
  0x9f   :  { %302 = vmatmul.mubr.f32.gmra.mrb[6].mxu0 %v128_v22  ;;  %4261 = vmatprep.subr.bf16.mxu1 %v6109_v19  ;;  %v6226_v37 = vrot.slane %v197_v34, %v201_v33  ;;  %v6237_v59 = vrot.slane %v197_v34, %v213_v43  ;;  %v6243_v2 = vrot.slane %v197_v34, %v209_v61 }
  0xa0   :  { %415 = vmatmul.mubr.f32.gmra.mrb[6].mxu1 %v128_v22  ;;  %4231 = vmatpush1.bf16.msra.mxu0 %v6112_v23  ;;  %v6165_v22 = vpack.c.bf16 %v540_v12, %v536_v11 }
  0xa1   :  { %4263 = vmatpush1.bf16.msra.mxu1 %v6116_v26  ;;  %307 = vmatprep.mubr.f32.mxu0 %v5926_v0 }
  0xa2   :  { %420 = vmatprep.mubr.f32.mxu1 %v5926_v0  ;;  %4233 = vmatprep.subr.bf16.mxu0 %v6120_v29 }
  0xa3   :  { %308 = vmatmul.mubr.f32.gmra.mrb[8].mxu0 %v129_v35  ;;  %4265 = vmatprep.subr.bf16.mxu1 %v6123_v32 }
  0xa4   :  { %421 = vmatmul.mubr.f32.gmra.mrb[8].mxu1 %v129_v35  ;;  %4235 = vmatpush1.bf16.msra.mxu0 %v6126_v36  ;;  %v205_v35 = vsub.s32 1, %v6220_v31 }
  0xa5   :  { %4267 = vmatpush1.bf16.msra.mxu1 %v6130_v40  ;;  %313 = vmatprep.mubr.f32.mxu0 %v5926_v0 }
  0xa6   :  { %426 = vmatprep.mubr.f32.mxu1 %v5926_v0  ;;  %4237 = vmatprep.subr.bf16.mxu0 %v6134_v44  ;;  %v6230_v39 = vrot.slane %v197_v34, %v205_v35 }
  0xa7   :  { %314 = vmatmul.mubr.f32.gmra.mrb[10].mxu0 %v130_v52  ;;  %4269 = vmatprep.subr.bf16.mxu1 %v6137_v48 }
  0xa8   :  { %427 = vmatmul.mubr.f32.gmra.mrb[10].mxu1 %v130_v52  ;;  %4239 = vmatpush1.bf16.msra.mxu0 %v6140_v54 }
  0xa9   :  { %4271 = vmatpush1.bf16.msra.mxu1 %v6144_v58  ;;  %319 = vmatprep.mubr.f32.mxu0 %v5926_v0 }
  0xaa   :  { %432 = vmatprep.mubr.f32.mxu1 %v5926_v0  ;;  %4241 = vmatprep.subr.bf16.mxu0 %v6148_v62 }
  0xab   :  { %320 = vmatmul.mubr.f32.gmra.mrb[12].mxu0 %v131_v8  ;;  %4273 = vmatprep.subr.bf16.mxu1 %v6151_v4 }
  0xac   :  { %433 = vmatmul.mubr.f32.gmra.mrb[12].mxu1 %v131_v8  ;;  %4243 = vmatpush1.bf16.msra.mxu0 %v6154_v9 }
  0xad   :  { %4275 = vmatpush1.bf16.msra.mxu1 %v6158_v14  ;;  %325 = vmatprep.mubr.f32.mxu0 %v5926_v0 }
  0xae   :  { %438 = vmatprep.mubr.f32.mxu1 %v5926_v0  ;;  %4245 = vmatprep.subr.bf16.mxu0 %v6162_v18 }
  0xaf   :  { %326 = vmatmul.mubr.f32.gmra.mrb[14].mxu0 %v132_v24  ;;  %4277 = vmatprep.subr.bf16.mxu1 %v6165_v22 }
  0xb0   :  { %439 = vmatmul.mubr.f32.gmra.mrb[14].mxu1 %v132_v24  ;;  %4247 = vmatpush1.bf16.msra.mxu0 %v6168_v25 }
  0xb1   :  { %4279 = vmatpush1.bf16.msra.mxu1 %v6172_v27  ;;  %611 = vmatprep.mubr.f32.mxu0 %v5926_v0 }
  0xb2   :  { %682 = vmatprep.mubr.f32.mxu1 %v5926_v0  ;;  %4281 = vmatprep.subr.bf16.mxu0 %v6069_v38 }
  0xb3   :  { %612 = vmatmul.mubr.f32.vlgmr.msra.gmra.mrb[0].mxu0 %v117_v28  ;;  %4313 = vmatprep.subr.bf16.mxu1 %v6071_v41 }
  0xb4   :  { %683 = vmatmul.mubr.f32.vlgmr.msra.gmra.mrb[0].mxu1 %v117_v28  ;;  %4283 = vmatpush1.bf16.msra.mxu0 %v6073_v47 }
  0xb5   :  { %4315 = vmatpush1.bf16.msra.mxu1 %v6076_v50  ;;  %4285 = vmatprep.subr.bf16.mxu0 %v6079_v53 }
  0xb6   :  { %4317 = vmatprep.subr.bf16.mxu1 %v6081_v56  ;;  %787 = vmatprep.mubr.f32.mxu0 %v5926_v0 }
  0xb7   :  { %858 = vmatprep.mubr.f32.mxu1 %v5926_v0 }
  0xb8   :  { %4287 = vmatpush1.bf16.msra.mxu0 %v6084_v60 }
  0xb9   :  { %4319 = vmatpush1.bf16.msra.mxu1 %v6088_v63  ;;  %4289 = vmatprep.subr.bf16.mxu0 %v6092_v3 }
  0xba   :  { %4321 = vmatprep.subr.bf16.mxu1 %v6095_v6 }
  0xbc   :  { %4291 = vmatpush1.bf16.msra.mxu0 %v6098_v10 }
  0xbd   :  { %4323 = vmatpush1.bf16.msra.mxu1 %v6102_v13  ;;  %4293 = vmatprep.subr.bf16.mxu0 %v6106_v16 }
  0xbe   :  { %4325 = vmatprep.subr.bf16.mxu1 %v6109_v19 }
  0xc0   :  { %4295 = vmatpush1.bf16.msra.mxu0 %v6112_v23 }
  0xc1   :  { %4327 = vmatpush1.bf16.msra.mxu1 %v6116_v26  ;;  %4297 = vmatprep.subr.bf16.mxu0 %v6120_v29 }
  0xc2   :  { %4329 = vmatprep.subr.bf16.mxu1 %v6123_v32 }
  0xc4   :  { %4299 = vmatpush1.bf16.msra.mxu0 %v6126_v36 }
  0xc5   :  { %4331 = vmatpush1.bf16.msra.mxu1 %v6130_v40  ;;  %4301 = vmatprep.subr.bf16.mxu0 %v6134_v44 }
  0xc6   :  { %4333 = vmatprep.subr.bf16.mxu1 %v6137_v48 }
  0xc8   :  { %4303 = vmatpush1.bf16.msra.mxu0 %v6140_v54 }
  0xc9   :  { %4335 = vmatpush1.bf16.msra.mxu1 %v6144_v58  ;;  %4305 = vmatprep.subr.bf16.mxu0 %v6148_v62 }
  0xca   :  { %4337 = vmatprep.subr.bf16.mxu1 %v6151_v4 }
  0xcc   :  { %4307 = vmatpush1.bf16.msra.mxu0 %v6154_v9 }
  0xcd   :  { %4339 = vmatpush1.bf16.msra.mxu1 %v6158_v14  ;;  %4309 = vmatprep.subr.bf16.mxu0 %v6162_v18 }
  0xce   :  { %4341 = vmatprep.subr.bf16.mxu1 %v6165_v22 }
  0xd0   :  { %4311 = vmatpush1.bf16.msra.mxu0 %v6168_v25 }
  0xd1   :  { %4343 = vmatpush1.bf16.msra.mxu1 %v6172_v27  ;;  %4345 = vmatprep.subr.bf16.mxu0 %v6069_v38 }
  0xd2   :  { %4377 = vmatprep.subr.bf16.mxu1 %v6071_v41 }
 0x186   :  { %v613_v42 = vpop.f32.mrb[0].mxu0 }
 0x187   :  { %v5304_v45 = vadd.f32 %v613_v42, %v6226_v37  ;;  %v684_v46 = vpop.f32.mrb[0].mxu1  ;;  %v615_v49 = vpop.f32.mrb[1].mxu0 }
 0x188   :  { %v5305_v51 = vadd.f32 %v615_v49, %v6230_v39  ;;  %v686_v52 = vpop.f32.mrb[1].mxu1  ;;  %v5320_v7 = vadd.f32 %v684_v46, %v6243_v2 }
 0x189   :  { %v4104_v55 = vmul.f32 -1.442695, %v5304_v45  ;;  %v5321_v1 = vadd.f32 %v686_v52, %v6237_v59 }
 0x18a   :  { %v4105_v57 = vmul.f32 -1.442695, %v5305_v51 }
 0x18b   :  { %5448 = vpow2.f32 %v4104_v55  ;;  %v4106_v5 = vmul.f32 -1.442695, %v5321_v1 }
 0x18c   :  { %5450 = vpow2.f32 %v4105_v57 }
 0x18d   :  { %5452 = vpow2.f32 %v4106_v5 }
 0x18e   :  { %5454 = vtanh.f32 %v5320_v7 }
 0x195   :  { %v5449_v8 = vpop.eup %5448 }
 0x196   :  { %v5451_v11 = vpop.eup %5450  ;;  %v696_v12 = vadd.f32 1.0, %v5449_v8 }
 0x197   :  { %v702_v15 = vadd.f32 1.0, %v5451_v11  ;;  %v5453_v17 = vpop.eup %5452 }
 0x198   :  { %5456 = vrcp.f32 %v696_v12  ;;  %v5455_v20 = vpop.eup %5454  ;;  %v709_v42 = vadd.f32 1.0, %v5453_v17 }
 0x199   :  { %5458 = vrcp.f32 %v702_v15 }
 0x19a   :  { %5460 = vrcp.f32 %v709_v42 }
 0x1a2   :  { %v5457_v24 = vpop.eup %5456 }
 0x1a3   :  { %v5459_v28 = vpop.eup %5458  ;;  %v713_v30 = vmul.f32 %v5457_v24, %v5455_v20 }
 0x1a4   :  { %v712_v34 = vmul.f32 %v5459_v28, %v121_v21  ;;  %v5461_v46 = vpop.eup %5460 }
 0x1a6   :  { %v6246_v45 = vadd.f32 %v713_v30, %v712_v34 }
 0x1a8   :  { %5462 = vtanh.f32 %v6246_v45 }
 0x1b2   :  { %v5463_v49 = vpop.eup %5462 }
 0x1b3   :  { %v6249_v51 = vmul.f32 %v5463_v49, %v5461_v46 }
 0x1b5   :  { %788 = vmatmul.mubr.f32.vlgmr.msra.gmra.mrb[2].mxu0 %v6249_v51  ;;  %859 = vmatmul.mubr.f32.vlgmr.msra.gmra.mrb[2].mxu1 %v6249_v51 }
 0x1b6   :  { %4347 = vmatpush1.bf16.msra.mxu0 %v6073_v47  ;;  %4379 = vmatpush1.bf16.msra.mxu1 %v6076_v50 }
 0x1b7   :  { %4349 = vmatprep.subr.bf16.mxu0 %v6079_v53  ;;  %4381 = vmatprep.subr.bf16.mxu1 %v6081_v56 }
 0x1b8   :  { %964 = vmatprep.mubr.f32.mxu0 %v5926_v0  ;;  %1035 = vmatprep.mubr.f32.mxu1 %v5926_v0 }
 0x1ba   :  { %4351 = vmatpush1.bf16.msra.mxu0 %v6084_v60  ;;  %4383 = vmatpush1.bf16.msra.mxu1 %v6088_v63 }
 0x1bb   :  { %4353 = vmatprep.subr.bf16.mxu0 %v6092_v3  ;;  %4385 = vmatprep.subr.bf16.mxu1 %v6095_v6 }
 0x1be   :  { %4355 = vmatpush1.bf16.msra.mxu0 %v6098_v10  ;;  %4387 = vmatpush1.bf16.msra.mxu1 %v6102_v13 }
 0x1bf   :  { %4357 = vmatprep.subr.bf16.mxu0 %v6106_v16  ;;  %4389 = vmatprep.subr.bf16.mxu1 %v6109_v19 }
 0x1c2   :  { %4359 = vmatpush1.bf16.msra.mxu0 %v6112_v23  ;;  %4391 = vmatpush1.bf16.msra.mxu1 %v6116_v26 }
 0x1c3   :  { %4361 = vmatprep.subr.bf16.mxu0 %v6120_v29  ;;  %4393 = vmatprep.subr.bf16.mxu1 %v6123_v32 }
 0x1c6   :  { %4363 = vmatpush1.bf16.msra.mxu0 %v6126_v36  ;;  %4395 = vmatpush1.bf16.msra.mxu1 %v6130_v40 }
 0x1c7   :  { %4365 = vmatprep.subr.bf16.mxu0 %v6134_v44  ;;  %4397 = vmatprep.subr.bf16.mxu1 %v6137_v48 }
 0x1ca   :  { %4367 = vmatpush1.bf16.msra.mxu0 %v6140_v54  ;;  %4399 = vmatpush1.bf16.msra.mxu1 %v6144_v58 }
 0x1cb   :  { %4369 = vmatprep.subr.bf16.mxu0 %v6148_v62  ;;  %4401 = vmatprep.subr.bf16.mxu1 %v6151_v4 }
 0x1ce   :  { %4371 = vmatpush1.bf16.msra.mxu0 %v6154_v9  ;;  %4403 = vmatpush1.bf16.msra.mxu1 %v6158_v14 }
 0x1cf   :  { %4373 = vmatprep.subr.bf16.mxu0 %v6162_v18  ;;  %4405 = vmatprep.subr.bf16.mxu1 %v6165_v22 }
 0x1d2   :  { %4375 = vmatpush1.bf16.msra.mxu0 %v6168_v25  ;;  %4407 = vmatpush1.bf16.msra.mxu1 %v6172_v27 }
 0x1d3   :  { %4409 = vmatprep.subr.bf16.mxu0 %v6069_v38  ;;  %4441 = vmatprep.subr.bf16.mxu1 %v6071_v41 }
 0x288   :  { %v789_v52 = vpop.f32.mrb[2].mxu0  ;;  %v860_v55 = vpop.f32.mrb[2].mxu1 }
 0x289   :  { %v5306_v57 = vadd.f32 %v789_v52, %v6226_v37  ;;  %v791_v1 = vpop.f32.mrb[3].mxu0  ;;  %v862_v5 = vpop.f32.mrb[3].mxu1  ;;  %v5322_v17 = vadd.f32 %v860_v55, %v6243_v2 }
 0x28a   :  { %v5307_v7 = vadd.f32 %v791_v1, %v6230_v39  ;;  %v5323_v12 = vadd.f32 %v862_v5, %v6237_v59 }
 0x28b   :  { %v4107_v8 = vmul.f32 -1.442695, %v5306_v57 }
 0x28c   :  { %v4108_v11 = vmul.f32 -1.442695, %v5307_v7  ;;  %v4109_v15 = vmul.f32 -1.442695, %v5323_v12 }
 0x28d   :  { %5464 = vpow2.f32 %v4107_v8 }
 0x28e   :  { %5466 = vpow2.f32 %v4108_v11 }
 0x28f   :  { %5468 = vpow2.f32 %v4109_v15 }
 0x290   :  { %5470 = vtanh.f32 %v5322_v17 }
 0x297   :  { %v5465_v20 = vpop.eup %5464 }
 0x298   :  { %v5467_v21 = vpop.eup %5466  ;;  %v872_v24 = vadd.f32 1.0, %v5465_v20 }
 0x299   :  { %v878_v28 = vadd.f32 1.0, %v5467_v21  ;;  %v5469_v30 = vpop.eup %5468 }
 0x29a   :  { %5472 = vrcp.f32 %v872_v24  ;;  %v5471_v42 = vpop.eup %5470  ;;  %v885_v52 = vadd.f32 1.0, %v5469_v30 }
 0x29b   :  { %5474 = vrcp.f32 %v878_v28 }
 0x29c   :  { %5476 = vrcp.f32 %v885_v52 }
 0x2a4   :  { %v5473_v34 = vpop.eup %5472 }
 0x2a5   :  { %v5475_v46 = vpop.eup %5474  ;;  %v889_v49 = vmul.f32 %v5473_v34, %v5471_v42 }
 0x2a6   :  { %v888_v57 = vmul.f32 %v5475_v46, %v6246_v45  ;;  %v5477_v55 = vpop.eup %5476 }
 0x2a8   :  { %v6292_v1 = vadd.f32 %v889_v49, %v888_v57 }
 0x2aa   :  { %5478 = vtanh.f32 %v6292_v1 }
 0x2b4   :  { %v5479_v5 = vpop.eup %5478 }
 0x2b5   :  { %v6295_v7 = vmul.f32 %v5479_v5, %v5477_v55 }
 0x2b7   :  { %965 = vmatmul.mubr.f32.vlgmr.msra.gmra.mrb[4].mxu0 %v6295_v7  ;;  %1036 = vmatmul.mubr.f32.vlgmr.msra.gmra.mrb[4].mxu1 %v6295_v7 }
 0x2b8   :  { %4411 = vmatpush1.bf16.msra.mxu0 %v6073_v47  ;;  %4443 = vmatpush1.bf16.msra.mxu1 %v6076_v50 }
 0x2b9   :  { %4413 = vmatprep.subr.bf16.mxu0 %v6079_v53  ;;  %4445 = vmatprep.subr.bf16.mxu1 %v6081_v56 }
 0x2ba   :  { %1141 = vmatprep.mubr.f32.mxu0 %v5926_v0  ;;  %1212 = vmatprep.mubr.f32.mxu1 %v5926_v0 }
 0x2bc   :  { %4415 = vmatpush1.bf16.msra.mxu0 %v6084_v60  ;;  %4447 = vmatpush1.bf16.msra.mxu1 %v6088_v63 }
 0x2bd   :  { %4417 = vmatprep.subr.bf16.mxu0 %v6092_v3  ;;  %4449 = vmatprep.subr.bf16.mxu1 %v6095_v6 }
 0x2c0   :  { %4419 = vmatpush1.bf16.msra.mxu0 %v6098_v10  ;;  %4451 = vmatpush1.bf16.msra.mxu1 %v6102_v13 }
 0x2c1   :  { %4421 = vmatprep.subr.bf16.mxu0 %v6106_v16  ;;  %4453 = vmatprep.subr.bf16.mxu1 %v6109_v19 }
 0x2c4   :  { %4423 = vmatpush1.bf16.msra.mxu0 %v6112_v23  ;;  %4455 = vmatpush1.bf16.msra.mxu1 %v6116_v26 }
 0x2c5   :  { %4425 = vmatprep.subr.bf16.mxu0 %v6120_v29  ;;  %4457 = vmatprep.subr.bf16.mxu1 %v6123_v32 }
 0x2c8   :  { %4427 = vmatpush1.bf16.msra.mxu0 %v6126_v36  ;;  %4459 = vmatpush1.bf16.msra.mxu1 %v6130_v40 }
 0x2c9   :  { %4429 = vmatprep.subr.bf16.mxu0 %v6134_v44  ;;  %4461 = vmatprep.subr.bf16.mxu1 %v6137_v48 }
 0x2cc   :  { %4431 = vmatpush1.bf16.msra.mxu0 %v6140_v54  ;;  %4463 = vmatpush1.bf16.msra.mxu1 %v6144_v58 }
 0x2cd   :  { %4433 = vmatprep.subr.bf16.mxu0 %v6148_v62  ;;  %4465 = vmatprep.subr.bf16.mxu1 %v6151_v4 }
 0x2d0   :  { %4435 = vmatpush1.bf16.msra.mxu0 %v6154_v9  ;;  %4467 = vmatpush1.bf16.msra.mxu1 %v6158_v14 }
 0x2d1   :  { %4437 = vmatprep.subr.bf16.mxu0 %v6162_v18  ;;  %4469 = vmatprep.subr.bf16.mxu1 %v6165_v22 }
 0x2d4   :  { %4439 = vmatpush1.bf16.msra.mxu0 %v6168_v25  ;;  %4471 = vmatpush1.bf16.msra.mxu1 %v6172_v27 }
 0x2d5   :  { %4473 = vmatprep.subr.bf16.mxu0 %v6069_v38  ;;  %4505 = vmatprep.subr.bf16.mxu1 %v6071_v41 }
 0x38a   :  { %v966_v45 = vpop.f32.mrb[4].mxu0  ;;  %v1037_v8 = vpop.f32.mrb[4].mxu1 }
 0x38b   :  { %v5308_v11 = vadd.f32 %v966_v45, %v6226_v37  ;;  %v968_v12 = vpop.f32.mrb[5].mxu0  ;;  %v1039_v15 = vpop.f32.mrb[5].mxu1  ;;  %v5324_v30 = vadd.f32 %v1037_v8, %v6243_v2 }
 0x38c   :  { %v5309_v17 = vadd.f32 %v968_v12, %v6230_v39  ;;  %v5325_v24 = vadd.f32 %v1039_v15, %v6237_v59 }
 0x38d   :  { %v4110_v20 = vmul.f32 -1.442695, %v5308_v11 }
 0x38e   :  { %v4111_v21 = vmul.f32 -1.442695, %v5309_v17  ;;  %v4112_v28 = vmul.f32 -1.442695, %v5325_v24 }
 0x38f   :  { %5480 = vpow2.f32 %v4110_v20 }
 0x390   :  { %5482 = vpow2.f32 %v4111_v21 }
 0x391   :  { %5484 = vpow2.f32 %v4112_v28 }
 0x392   :  { %5486 = vtanh.f32 %v5324_v30 }
 0x399   :  { %v5481_v42 = vpop.eup %5480 }
 0x39a   :  { %v5483_v34 = vpop.eup %5482  ;;  %v1049_v46 = vadd.f32 1.0, %v5481_v42 }
 0x39b   :  { %v1055_v49 = vadd.f32 1.0, %v5483_v34  ;;  %v5485_v52 = vpop.eup %5484 }
 0x39c   :  { %5488 = vrcp.f32 %v1049_v46  ;;  %v5487_v57 = vpop.eup %5486  ;;  %v1062_v11 = vadd.f32 1.0, %v5485_v52 }
 0x39d   :  { %5490 = vrcp.f32 %v1055_v49 }
 0x39e   :  { %5492 = vrcp.f32 %v1062_v11 }
 0x3a6   :  { %v5489_v55 = vpop.eup %5488 }
 0x3a7   :  { %v5491_v5 = vpop.eup %5490  ;;  %v1066_v45 = vmul.f32 %v5489_v55, %v5487_v57 }
 0x3a8   :  { %v1065_v12 = vmul.f32 %v5491_v5, %v6292_v1  ;;  %v5493_v8 = vpop.eup %5492 }
 0x3aa   :  { %v6338_v15 = vadd.f32 %v1066_v45, %v1065_v12 }
 0x3ac   :  { %5494 = vtanh.f32 %v6338_v15 }
 0x3b6   :  { %v5495_v17 = vpop.eup %5494 }
 0x3b7   :  { %v6341_v20 = vmul.f32 %v5495_v17, %v5493_v8 }
 0x3b9   :  { %1142 = vmatmul.mubr.f32.vlgmr.msra.gmra.mrb[6].mxu0 %v6341_v20  ;;  %1213 = vmatmul.mubr.f32.vlgmr.msra.gmra.mrb[6].mxu1 %v6341_v20 }
 0x3ba   :  { %4475 = vmatpush1.bf16.msra.mxu0 %v6073_v47  ;;  %4507 = vmatpush1.bf16.msra.mxu1 %v6076_v50 }
 0x3bb   :  { %4477 = vmatprep.subr.bf16.mxu0 %v6079_v53  ;;  %4509 = vmatprep.subr.bf16.mxu1 %v6081_v56 }
 0x3bc   :  { %1318 = vmatprep.mubr.f32.mxu0 %v5926_v0  ;;  %1389 = vmatprep.mubr.f32.mxu1 %v5926_v0 }
 0x3be   :  { %4479 = vmatpush1.bf16.msra.mxu0 %v6084_v60  ;;  %4511 = vmatpush1.bf16.msra.mxu1 %v6088_v63 }
 0x3bf   :  { %4481 = vmatprep.subr.bf16.mxu0 %v6092_v3  ;;  %4513 = vmatprep.subr.bf16.mxu1 %v6095_v6 }
 0x3c2   :  { %4483 = vmatpush1.bf16.msra.mxu0 %v6098_v10  ;;  %4515 = vmatpush1.bf16.msra.mxu1 %v6102_v13 }
 0x3c3   :  { %4485 = vmatprep.subr.bf16.mxu0 %v6106_v16  ;;  %4517 = vmatprep.subr.bf16.mxu1 %v6109_v19 }
 0x3c6   :  { %4487 = vmatpush1.bf16.msra.mxu0 %v6112_v23  ;;  %4519 = vmatpush1.bf16.msra.mxu1 %v6116_v26 }
 0x3c7   :  { %4489 = vmatprep.subr.bf16.mxu0 %v6120_v29  ;;  %4521 = vmatprep.subr.bf16.mxu1 %v6123_v32 }
 0x3ca   :  { %4491 = vmatpush1.bf16.msra.mxu0 %v6126_v36  ;;  %4523 = vmatpush1.bf16.msra.mxu1 %v6130_v40 }
 0x3cb   :  { %4493 = vmatprep.subr.bf16.mxu0 %v6134_v44  ;;  %4525 = vmatprep.subr.bf16.mxu1 %v6137_v48 }
 0x3ce   :  { %4495 = vmatpush1.bf16.msra.mxu0 %v6140_v54  ;;  %4527 = vmatpush1.bf16.msra.mxu1 %v6144_v58 }
 0x3cf   :  { %4497 = vmatprep.subr.bf16.mxu0 %v6148_v62  ;;  %4529 = vmatprep.subr.bf16.mxu1 %v6151_v4 }
 0x3d2   :  { %4499 = vmatpush1.bf16.msra.mxu0 %v6154_v9  ;;  %4531 = vmatpush1.bf16.msra.mxu1 %v6158_v14 }
 0x3d3   :  { %4501 = vmatprep.subr.bf16.mxu0 %v6162_v18  ;;  %4533 = vmatprep.subr.bf16.mxu1 %v6165_v22 }
 0x3d6   :  { %4503 = vmatpush1.bf16.msra.mxu0 %v6168_v25  ;;  %4535 = vmatpush1.bf16.msra.mxu1 %v6172_v27 }
 0x3d7   :  { %4537 = vmatprep.subr.bf16.mxu0 %v6069_v38  ;;  %4569 = vmatprep.subr.bf16.mxu1 %v6071_v41 }
 0x48c   :  { %v1143_v1 = vpop.f32.mrb[6].mxu0  ;;  %v1214_v21 = vpop.f32.mrb[6].mxu1 }
 0x48d   :  { %v5310_v24 = vadd.f32 %v1143_v1, %v6226_v37  ;;  %v1145_v28 = vpop.f32.mrb[7].mxu0  ;;  %v1216_v30 = vpop.f32.mrb[7].mxu1  ;;  %v5326_v57 = vadd.f32 %v1214_v21, %v6243_v2 }
 0x48e   :  { %v5311_v42 = vadd.f32 %v1145_v28, %v6230_v39  ;;  %v5327_v49 = vadd.f32 %v1216_v30, %v6237_v59 }
 0x48f   :  { %v4113_v34 = vmul.f32 -1.442695, %v5310_v24 }
 0x490   :  { %v4114_v46 = vmul.f32 -1.442695, %v5311_v42  ;;  %v4115_v52 = vmul.f32 -1.442695, %v5327_v49 }
 0x491   :  { %5496 = vpow2.f32 %v4113_v34 }
 0x492   :  { %5498 = vpow2.f32 %v4114_v46 }
 0x493   :  { %5500 = vpow2.f32 %v4115_v52 }
 0x494   :  { %5502 = vtanh.f32 %v5326_v57 }
 0x49b   :  { %v5497_v55 = vpop.eup %5496 }
 0x49c   :  { %v5499_v5 = vpop.eup %5498  ;;  %v1226_v45 = vadd.f32 1.0, %v5497_v55 }
 0x49d   :  { %v1232_v11 = vadd.f32 1.0, %v5499_v5  ;;  %v5501_v12 = vpop.eup %5500 }
 0x49e   :  { %5504 = vrcp.f32 %v1226_v45  ;;  %v5503_v8 = vpop.eup %5502  ;;  %v1239_v28 = vadd.f32 1.0, %v5501_v12 }
 0x49f   :  { %5506 = vrcp.f32 %v1232_v11 }
 0x4a0   :  { %5508 = vrcp.f32 %v1239_v28 }
 0x4a8   :  { %v5505_v17 = vpop.eup %5504 }
 0x4a9   :  { %v5507_v1 = vpop.eup %5506  ;;  %v1243_v24 = vmul.f32 %v5505_v17, %v5503_v8 }
 0x4aa   :  { %v1242_v42 = vmul.f32 %v5507_v1, %v6338_v15  ;;  %v5509_v21 = vpop.eup %5508 }
 0x4ac   :  { %v6384_v30 = vadd.f32 %v1243_v24, %v1242_v42 }
 0x4ae   :  { %5510 = vtanh.f32 %v6384_v30 }
 0x4b8   :  { %v5511_v34 = vpop.eup %5510 }
 0x4b9   :  { %v6387_v46 = vmul.f32 %v5511_v34, %v5509_v21 }
 0x4bb   :  { %1319 = vmatmul.mubr.f32.vlgmr.msra.gmra.mrb[8].mxu0 %v6387_v46  ;;  %1390 = vmatmul.mubr.f32.vlgmr.msra.gmra.mrb[8].mxu1 %v6387_v46 }
 0x4bc   :  { %4539 = vmatpush1.bf16.msra.mxu0 %v6073_v47  ;;  %4571 = vmatpush1.bf16.msra.mxu1 %v6076_v50 }
 0x4bd   :  { %4541 = vmatprep.subr.bf16.mxu0 %v6079_v53  ;;  %4573 = vmatprep.subr.bf16.mxu1 %v6081_v56 }
 0x4be   :  { %1495 = vmatprep.mubr.f32.mxu0 %v5926_v0  ;;  %1566 = vmatprep.mubr.f32.mxu1 %v5926_v0 }
 0x4c0   :  { %4543 = vmatpush1.bf16.msra.mxu0 %v6084_v60  ;;  %4575 = vmatpush1.bf16.msra.mxu1 %v6088_v63 }
 0x4c1   :  { %4545 = vmatprep.subr.bf16.mxu0 %v6092_v3  ;;  %4577 = vmatprep.subr.bf16.mxu1 %v6095_v6 }
 0x4c4   :  { %4547 = vmatpush1.bf16.msra.mxu0 %v6098_v10  ;;  %4579 = vmatpush1.bf16.msra.mxu1 %v6102_v13 }
 0x4c5   :  { %4549 = vmatprep.subr.bf16.mxu0 %v6106_v16  ;;  %4581 = vmatprep.subr.bf16.mxu1 %v6109_v19 }
 0x4c8   :  { %4551 = vmatpush1.bf16.msra.mxu0 %v6112_v23  ;;  %4583 = vmatpush1.bf16.msra.mxu1 %v6116_v26 }
 0x4c9   :  { %4553 = vmatprep.subr.bf16.mxu0 %v6120_v29  ;;  %4585 = vmatprep.subr.bf16.mxu1 %v6123_v32 }
 0x4cc   :  { %4555 = vmatpush1.bf16.msra.mxu0 %v6126_v36  ;;  %4587 = vmatpush1.bf16.msra.mxu1 %v6130_v40 }
 0x4cd   :  { %4557 = vmatprep.subr.bf16.mxu0 %v6134_v44  ;;  %4589 = vmatprep.subr.bf16.mxu1 %v6137_v48 }
 0x4d0   :  { %4559 = vmatpush1.bf16.msra.mxu0 %v6140_v54  ;;  %4591 = vmatpush1.bf16.msra.mxu1 %v6144_v58 }
 0x4d1   :  { %4561 = vmatprep.subr.bf16.mxu0 %v6148_v62  ;;  %4593 = vmatprep.subr.bf16.mxu1 %v6151_v4 }
 0x4d4   :  { %4563 = vmatpush1.bf16.msra.mxu0 %v6154_v9  ;;  %4595 = vmatpush1.bf16.msra.mxu1 %v6158_v14 }
 0x4d5   :  { %4565 = vmatprep.subr.bf16.mxu0 %v6162_v18  ;;  %4597 = vmatprep.subr.bf16.mxu1 %v6165_v22 }
 0x4d8   :  { %4567 = vmatpush1.bf16.msra.mxu0 %v6168_v25  ;;  %4599 = vmatpush1.bf16.msra.mxu1 %v6172_v27 }
 0x4d9   :  { %4601 = vmatprep.subr.bf16.mxu0 %v6069_v38  ;;  %4633 = vmatprep.subr.bf16.mxu1 %v6071_v41 }
 0x58e   :  { %v1320_v15 = vpop.f32.mrb[8].mxu0  ;;  %v1391_v49 = vpop.f32.mrb[8].mxu1 }
 0x58f   :  { %v5312_v52 = vadd.f32 %v1320_v15, %v6226_v37  ;;  %v1322_v57 = vpop.f32.mrb[9].mxu0  ;;  %v1393_v55 = vpop.f32.mrb[9].mxu1  ;;  %v5328_v17 = vadd.f32 %v1391_v49, %v6243_v2 }
 0x590   :  { %v5313_v5 = vadd.f32 %v1322_v57, %v6230_v39  ;;  %v5329_v12 = vadd.f32 %v1393_v55, %v6237_v59 }
 0x591   :  { %v4116_v45 = vmul.f32 -1.442695, %v5312_v52 }
 0x592   :  { %v4117_v11 = vmul.f32 -1.442695, %v5313_v5  ;;  %v4118_v8 = vmul.f32 -1.442695, %v5329_v12 }
 0x593   :  { %5512 = vpow2.f32 %v4116_v45 }
 0x594   :  { %5514 = vpow2.f32 %v4117_v11 }
 0x595   :  { %5516 = vpow2.f32 %v4118_v8 }
 0x596   :  { %5518 = vtanh.f32 %v5328_v17 }
 0x59d   :  { %v5513_v1 = vpop.eup %5512 }
 0x59e   :  { %v5515_v24 = vpop.eup %5514  ;;  %v1403_v28 = vadd.f32 1.0, %v5513_v1 }
 0x59f   :  { %v1409_v42 = vadd.f32 1.0, %v5515_v24  ;;  %v5517_v21 = vpop.eup %5516 }
 0x5a0   :  { %5520 = vrcp.f32 %v1403_v28  ;;  %v5519_v34 = vpop.eup %5518  ;;  %v1416_v5 = vadd.f32 1.0, %v5517_v21 }
 0x5a1   :  { %5522 = vrcp.f32 %v1409_v42 }
 0x5a2   :  { %5524 = vrcp.f32 %v1416_v5 }
 0x5aa   :  { %v5521_v15 = vpop.eup %5520 }
 0x5ab   :  { %v5523_v52 = vpop.eup %5522  ;;  %v1420_v57 = vmul.f32 %v5521_v15, %v5519_v34 }
 0x5ac   :  { %v1419_v45 = vmul.f32 %v5523_v52, %v6384_v30  ;;  %v5525_v49 = vpop.eup %5524 }
 0x5ae   :  { %v6430_v55 = vadd.f32 %v1420_v57, %v1419_v45 }
 0x5b0   :  { %5526 = vtanh.f32 %v6430_v55 }
 0x5ba   :  { %v5527_v11 = vpop.eup %5526 }
 0x5bb   :  { %v6433_v12 = vmul.f32 %v5527_v11, %v5525_v49 }
 0x5bd   :  { %1496 = vmatmul.mubr.f32.vlgmr.msra.gmra.mrb[10].mxu0 %v6433_v12  ;;  %1567 = vmatmul.mubr.f32.vlgmr.msra.gmra.mrb[10].mxu1 %v6433_v12 }
 0x5be   :  { %4603 = vmatpush1.bf16.msra.mxu0 %v6073_v47  ;;  %4635 = vmatpush1.bf16.msra.mxu1 %v6076_v50 }
 0x5bf   :  { %4605 = vmatprep.subr.bf16.mxu0 %v6079_v53  ;;  %4637 = vmatprep.subr.bf16.mxu1 %v6081_v56 }
 0x5c0   :  { %1672 = vmatprep.mubr.f32.mxu0 %v5926_v0  ;;  %1743 = vmatprep.mubr.f32.mxu1 %v5926_v0 }
 0x5c2   :  { %4607 = vmatpush1.bf16.msra.mxu0 %v6084_v60  ;;  %4639 = vmatpush1.bf16.msra.mxu1 %v6088_v63 }
 0x5c3   :  { %4609 = vmatprep.subr.bf16.mxu0 %v6092_v3  ;;  %4641 = vmatprep.subr.bf16.mxu1 %v6095_v6 }
 0x5c6   :  { %4611 = vmatpush1.bf16.msra.mxu0 %v6098_v10  ;;  %4643 = vmatpush1.bf16.msra.mxu1 %v6102_v13 }
 0x5c7   :  { %4613 = vmatprep.subr.bf16.mxu0 %v6106_v16  ;;  %4645 = vmatprep.subr.bf16.mxu1 %v6109_v19 }
 0x5ca   :  { %4615 = vmatpush1.bf16.msra.mxu0 %v6112_v23  ;;  %4647 = vmatpush1.bf16.msra.mxu1 %v6116_v26 }
 0x5cb   :  { %4617 = vmatprep.subr.bf16.mxu0 %v6120_v29  ;;  %4649 = vmatprep.subr.bf16.mxu1 %v6123_v32 }
 0x5ce   :  { %4619 = vmatpush1.bf16.msra.mxu0 %v6126_v36  ;;  %4651 = vmatpush1.bf16.msra.mxu1 %v6130_v40 }
 0x5cf   :  { %4621 = vmatprep.subr.bf16.mxu0 %v6134_v44  ;;  %4653 = vmatprep.subr.bf16.mxu1 %v6137_v48 }
 0x5d2   :  { %4623 = vmatpush1.bf16.msra.mxu0 %v6140_v54  ;;  %4655 = vmatpush1.bf16.msra.mxu1 %v6144_v58 }
 0x5d3   :  { %4625 = vmatprep.subr.bf16.mxu0 %v6148_v62  ;;  %4657 = vmatprep.subr.bf16.mxu1 %v6151_v4 }
 0x5d6   :  { %4627 = vmatpush1.bf16.msra.mxu0 %v6154_v9  ;;  %4659 = vmatpush1.bf16.msra.mxu1 %v6158_v14 }
 0x5d7   :  { %4629 = vmatprep.subr.bf16.mxu0 %v6162_v18  ;;  %4661 = vmatprep.subr.bf16.mxu1 %v6165_v22 }
 0x5da   :  { %4631 = vmatpush1.bf16.msra.mxu0 %v6168_v25  ;;  %4663 = vmatpush1.bf16.msra.mxu1 %v6172_v27 }
 0x5db   :  { %4665 = vmatprep.subr.bf16.mxu0 %v6069_v38  ;;  %4697 = vmatprep.subr.bf16.mxu1 %v6071_v41 }
 0x690   :  { %v1497_v30 = vpop.f32.mrb[10].mxu0  ;;  %v1568_v8 = vpop.f32.mrb[10].mxu1 }
 0x691   :  { %v5314_v17 = vadd.f32 %v1497_v30, %v6226_v37  ;;  %v1499_v1 = vpop.f32.mrb[11].mxu0  ;;  %v1570_v24 = vpop.f32.mrb[11].mxu1  ;;  %v5330_v52 = vadd.f32 %v1568_v8, %v6243_v2 }
 0x692   :  { %v5315_v28 = vadd.f32 %v1499_v1, %v6230_v39  ;;  %v5331_v34 = vadd.f32 %v1570_v24, %v6237_v59 }
 0x693   :  { %v4119_v42 = vmul.f32 -1.442695, %v5314_v17 }
 0x694   :  { %v4120_v21 = vmul.f32 -1.442695, %v5315_v28  ;;  %v4121_v15 = vmul.f32 -1.442695, %v5331_v34  ;;  %v1969_v34 = vld [vmem:[#allocation9 + $0x10] sm:$0xff] }
 0x695   :  { %5528 = vpow2.f32 %v4119_v42 }
 0x696   :  { %5530 = vpow2.f32 %v4120_v21 }
 0x697   :  { %5532 = vpow2.f32 %v4121_v15  ;;  %v1973_v15 = vld [vmem:[#allocation9 + $0x30] sm:$0xff] }
 0x698   :  { %5534 = vtanh.f32 %v5330_v52  ;;  %v1976_v52 = vld [vmem:[#allocation9 + $0x48] sm:$0xff] }
 0x69f   :  { %v5529_v38 = vpop.eup %5528 }
 0x6a0   :  { %v5531_v57 = vpop.eup %5530  ;;  %v1580_v41 = vadd.f32 1.0, %v5529_v38  ;;  %v1980_v38 = vld [vmem:[#allocation9 + $0x68] sm:$0xff] }
 0x6a1   :  { %v1586_v5 = vadd.f32 1.0, %v5531_v57  ;;  %v5533_v45 = vpop.eup %5532  ;;  %v1978_v57 = vld [vmem:[#allocation9 + $0x58] sm:$0xff] }
 0x6a2   :  { %5536 = vrcp.f32 %v1580_v41  ;;  %v5535_v49 = vpop.eup %5534  ;;  %v1593_v1 = vadd.f32 1.0, %v5533_v45  ;;  %v1982_v41 = vld [vmem:[#allocation9 + $0x78] sm:$0xff] }
 0x6a3   :  { %5538 = vrcp.f32 %v1586_v5 }
 0x6a4   :  { %5540 = vrcp.f32 %v1593_v1 }
 0x6ac   :  { %v5537_v11 = vpop.eup %5536 }
 0x6ad   :  { %v5539_v30 = vpop.eup %5538  ;;  %v1597_v17 = vmul.f32 %v5537_v11, %v5535_v49  ;;  %v4762_v11 = vpack.c.bf16 %v1973_v15, %v1969_v34  ;;  %v1999_v34 = vld [vmem:[#allocation9 + $0x100] sm:$0xff] }
 0x6ae   :  { %v1596_v28 = vmul.f32 %v5539_v30, %v6430_v55  ;;  %v5541_v8 = vpop.eup %5540  ;;  %v1971_v55 = vld [vmem:[#allocation9 + $0x20] sm:$0xff] }
 0x6af   :  { %v1975_v30 = vld [vmem:[#allocation9 + $0x40] sm:$0xff] }
 0x6b0   :  { %v6476_v24 = vadd.f32 %v1597_v17, %v1596_v28  ;;  %v1979_v17 = vld [vmem:[#allocation9 + $0x60] sm:$0xff]  ;;  %v4732_v28 = vpack.c.bf16 %v1980_v38, %v1976_v52 }
 0x6b1   :  { %v2003_v15 = vld [vmem:[#allocation9 + $0x120] sm:$0xff] }
 0x6b2   :  { %5542 = vtanh.f32 %v6476_v24 }
 0x6bc   :  { %v5543_v42 = vpop.eup %5542 }
 0x6bd   :  { %v6479_v21 = vmul.f32 %v5543_v42, %v5541_v8  ;;  %v1977_v8 = vld [vmem:[#allocation9 + $0x50] sm:$0xff] }
 0x6be   :  { %v1981_v42 = vld [vmem:[#allocation9 + $0x70] sm:$0xff] }
 0x6bf   :  { %1673 = vmatmul.mubr.f32.vlgmr.msra.gmra.mrb[12].mxu0 %v6479_v21  ;;  %1744 = vmatmul.mubr.f32.vlgmr.msra.gmra.mrb[12].mxu1 %v6479_v21 }
 0x6c0   :  { %4667 = vmatpush1.bf16.msra.mxu0 %v6073_v47  ;;  %4699 = vmatpush1.bf16.msra.mxu1 %v6076_v50  ;;  %v1968_v47 = vld [vmem:[#allocation9 + $0x8] sm:$0xff] }
 0x6c1   :  { %4669 = vmatprep.subr.bf16.mxu0 %v6079_v53  ;;  %4701 = vmatprep.subr.bf16.mxu1 %v6081_v56  ;;  %v1972_v50 = vld [vmem:[#allocation9 + $0x28] sm:$0xff]  ;;  %v1970_v53 = vld [vmem:[#allocation9 + $0x18] sm:$0xff] }
 0x6c2   :  { %1849 = vmatprep.mubr.f32.mxu0 %v5926_v0  ;;  %1920 = vmatprep.mubr.f32.mxu1 %v5926_v0  ;;  %v4728_v56 = vpack.c.bf16 %v1972_v50, %v1968_v47  ;;  %v1984_v47 = vld [vmem:[#allocation9 + $0x88] sm:$0xff] }
 0x6c3   :  { %v1988_v50 = vld [vmem:[#allocation9 + $0xa8] sm:$0xff] }
 0x6c4   :  { %4671 = vmatpush1.bf16.msra.mxu0 %v6084_v60  ;;  %4703 = vmatpush1.bf16.msra.mxu1 %v6088_v63  ;;  %v1974_v60 = vld [vmem:[#allocation9 + $0x38] sm:$0xff] }
 0x6c5   :  { %4673 = vmatprep.subr.bf16.mxu0 %v6092_v3  ;;  %4705 = vmatprep.subr.bf16.mxu1 %v6095_v6  ;;  %v4760_v63 = vpack.c.bf16 %v1974_v60, %v1970_v53  ;;  %v1986_v53 = vld [vmem:[#allocation9 + $0x98] sm:$0xff]  ;;  %v4734_v60 = vpack.c.bf16 %v1979_v17, %v1975_v30  ;;  %v4746_v30 = vpack.c.bf16 %v2003_v15, %v1999_v34  ;;  %v2315_v15 = vld [vmem:[#allocation10 + $0x210] sm:$0xff] }
 0x6c8   :  { %4675 = vmatpush1.bf16.msra.mxu0 %v6098_v10  ;;  %4707 = vmatpush1.bf16.msra.mxu1 %v6102_v13 }
 0x6c9   :  { %4677 = vmatprep.subr.bf16.mxu0 %v6106_v16  ;;  %4709 = vmatprep.subr.bf16.mxu1 %v6109_v19 }
 0x6cc   :  { %4679 = vmatpush1.bf16.msra.mxu0 %v6112_v23  ;;  %4711 = vmatpush1.bf16.msra.mxu1 %v6116_v26 }
 0x6cd   :  { %4681 = vmatprep.subr.bf16.mxu0 %v6120_v29  ;;  %4713 = vmatprep.subr.bf16.mxu1 %v6123_v32 }
 0x6d0   :  { %4683 = vmatpush1.bf16.msra.mxu0 %v6126_v36  ;;  %4715 = vmatpush1.bf16.msra.mxu1 %v6130_v40 }
 0x6d1   :  { %4685 = vmatprep.subr.bf16.mxu0 %v6134_v44  ;;  %4717 = vmatprep.subr.bf16.mxu1 %v6137_v48 }
 0x6d4   :  { %4687 = vmatpush1.bf16.msra.mxu0 %v6140_v54  ;;  %4719 = vmatpush1.bf16.msra.mxu1 %v6144_v58 }
 0x6d5   :  { %4689 = vmatprep.subr.bf16.mxu0 %v6148_v62  ;;  %4721 = vmatprep.subr.bf16.mxu1 %v6151_v4 }
 0x6d8   :  { %4691 = vmatpush1.bf16.msra.mxu0 %v6154_v9  ;;  %4723 = vmatpush1.bf16.msra.mxu1 %v6158_v14 }
 0x6d9   :  { %4693 = vmatprep.subr.bf16.mxu0 %v6162_v18  ;;  %4725 = vmatprep.subr.bf16.mxu1 %v6165_v22 }
 0x6dc   :  { %4695 = vmatpush1.bf16.msra.mxu0 %v6168_v25  ;;  %4727 = vmatpush1.bf16.msra.mxu1 %v6172_v27  ;;  %v1967_v27 = vld [vmem:[#allocation9] sm:$0xff] }
 0x6dd   :  { %4729 = vmatprep.subr.bf16.mxu0 %v4728_v56  ;;  %4761 = vmatprep.subr.bf16.mxu1 %v4760_v63  ;;  %v4730_v49 = vpack.c.bf16 %v1971_v55, %v1967_v27  ;;  %v1990_v56 = vld [vmem:[#allocation9 + $0xb8] sm:$0xff]  ;;  %v4766_v63 = vpack.c.bf16 %v1981_v42, %v1977_v8 }
 0x792   :  { %v1674_v3 = vpop.f32.mrb[12].mxu0  ;;  %v1745_v6 = vpop.f32.mrb[12].mxu1 }
 0x793   :  { %v5316_v10 = vadd.f32 %v1674_v3, %v6226_v37  ;;  %v1676_v13 = vpop.f32.mrb[13].mxu0  ;;  %v1747_v16 = vpop.f32.mrb[13].mxu1  ;;  %v5332_v36 = vadd.f32 %v1745_v6, %v6243_v2  ;;  %v1983_v3 = vld [vmem:[#allocation9 + $0x80] sm:$0xff] }
 0x794   :  { %v5317_v19 = vadd.f32 %v1676_v13, %v6230_v39  ;;  %v5333_v29 = vadd.f32 %v1747_v16, %v6237_v59  ;;  %v1987_v6 = vld [vmem:[#allocation9 + $0xa0] sm:$0xff]  ;;  %v4768_v13 = vpack.c.bf16 %v1990_v56, %v1986_v53  ;;  %v1985_v16 = vld [vmem:[#allocation9 + $0x90] sm:$0xff]  ;;  %v2016_v53 = vld [vmem:[#allocation9 + $0x188] sm:$0xff] }
 0x795   :  { %v4122_v23 = vmul.f32 -1.442695, %v5316_v10  ;;  %v4736_v10 = vpack.c.bf16 %v1988_v50, %v1984_v47  ;;  %v2009_v47 = vld [vmem:[#allocation9 + $0x150] sm:$0xff]  ;;  %v2020_v56 = vld [vmem:[#allocation9 + $0x1a8] sm:$0xff] }
 0x796   :  { %v4123_v26 = vmul.f32 -1.442695, %v5317_v19  ;;  %v4124_v32 = vmul.f32 -1.442695, %v5333_v29  ;;  %v1989_v19 = vld [vmem:[#allocation9 + $0xb0] sm:$0xff]  ;;  %v1994_v29 = vld [vmem:[#allocation9 + $0xd8] sm:$0xff] }
 0x797   :  { %5544 = vpow2.f32 %v4122_v23  ;;  %v1992_v23 = vld [vmem:[#allocation9 + $0xc8] sm:$0xff]  ;;  %v2013_v50 = vld [vmem:[#allocation9 + $0x170] sm:$0xff] }
 0x798   :  { %5546 = vpow2.f32 %v4123_v26  ;;  %v1996_v26 = vld [vmem:[#allocation9 + $0xe8] sm:$0xff] }
 0x799   :  { %5548 = vpow2.f32 %v4124_v32  ;;  %v1998_v32 = vld [vmem:[#allocation9 + $0xf8] sm:$0xff] }
 0x79a   :  { %5550 = vtanh.f32 %v5332_v36  ;;  %v4738_v36 = vpack.c.bf16 %v1987_v6, %v1983_v3  ;;  %v4782_v6 = vpack.c.bf16 %v2013_v50, %v2009_v47  ;;  %v2334_v47 = vld [vmem:[#allocation10 + $0x2a8] sm:$0xff]  ;;  %v2332_v50 = vld [vmem:[#allocation10 + $0x298] sm:$0xff] }
 0x7a1   :  { %v5545_v40 = vpop.eup %5544 }
 0x7a2   :  { %v5547_v44 = vpop.eup %5546  ;;  %v1757_v48 = vadd.f32 1.0, %v5545_v40  ;;  %v4770_v40 = vpack.c.bf16 %v1989_v19, %v1985_v16  ;;  %v4752_v16 = vpack.c.bf16 %v2020_v56, %v2016_v53  ;;  %v2336_v56 = vld [vmem:[#allocation10 + $0x2b8] sm:$0xff] }
 0x7a3   :  { %v1763_v54 = vadd.f32 1.0, %v5547_v44  ;;  %v5549_v58 = vpop.eup %5548  ;;  %v1991_v44 = vld [vmem:[#allocation9 + $0xc0] sm:$0xff] }
 0x7a4   :  { %5552 = vrcp.f32 %v1757_v48  ;;  %v5551_v62 = vpop.eup %5550  ;;  %v1770_v18 = vadd.f32 1.0, %v5549_v58  ;;  %v1995_v48 = vld [vmem:[#allocation9 + $0xe0] sm:$0xff]  ;;  %v4772_v58 = vpack.c.bf16 %v1998_v32, %v1994_v29  ;;  %v2024_v29 = vld [vmem:[#allocation9 + $0x1c8] sm:$0xff] }
 0x7a5   :  { %5554 = vrcp.f32 %v1763_v54  ;;  %v4740_v54 = vpack.c.bf16 %v1996_v26, %v1992_v23  ;;  %v4742_v27 = vpack.c.bf16 %v1995_v48, %v1991_v44  ;;  %v2017_v23 = vld [vmem:[#allocation9 + $0x190] sm:$0xff]  ;;  %v2028_v32 = vld [vmem:[#allocation9 + $0x1e8] sm:$0xff] }
 0x7a6   :  { %5556 = vrcp.f32 %v1770_v18  ;;  %v2002_v18 = vld [vmem:[#allocation9 + $0x118] sm:$0xff]  ;;  %v2021_v26 = vld [vmem:[#allocation9 + $0x1b0] sm:$0xff] }
 0x7a7   :  { %v4786_v48 = vpack.c.bf16 %v2021_v26, %v2017_v23  ;;  %v2342_v23 = vld [vmem:[#allocation10 + $0x2e8] sm:$0xff]  ;;  %v2340_v26 = vld [vmem:[#allocation10 + $0x2d8] sm:$0xff] }
 0x7ae   :  { %v5553_v4 = vpop.eup %5552 }
 0x7af   :  { %v5555_v9 = vpop.eup %5554  ;;  %v1774_v14 = vmul.f32 %v5553_v4, %v5551_v62  ;;  %v1993_v62 = vld [vmem:[#allocation9 + $0xd0] sm:$0xff] }
 0x7b0   :  { %v1773_v22 = vmul.f32 %v5555_v9, %v6476_v24  ;;  %v5557_v5 = vpop.eup %5556  ;;  %v4764_v24 = vpack.c.bf16 %v1982_v41, %v1978_v57  ;;  %v1997_v4 = vld [vmem:[#allocation9 + $0xf0] sm:$0xff]  ;;  %v2000_v9 = vld [vmem:[#allocation9 + $0x108] sm:$0xff] }
 0x7b1   :  { %v4774_v55 = vpack.c.bf16 %v1997_v4, %v1993_v62  ;;  %v2001_v57 = vld [vmem:[#allocation9 + $0x110] sm:$0xff]  ;;  %v2027_v4 = vld [vmem:[#allocation9 + $0x1e0] sm:$0xff] }
 0x7b2   :  { %v6520_v25 = vadd.f32 %v1774_v14, %v1773_v22  ;;  %v2004_v14 = vld [vmem:[#allocation9 + $0x128] sm:$0xff]  ;;  %v2006_v22 = vld [vmem:[#allocation9 + $0x138] sm:$0xff]  ;;  %v2005_v41 = vld [vmem:[#allocation9 + $0x130] sm:$0xff] }
 0x7b3   :  { %v4744_v52 = vpack.c.bf16 %v2004_v14, %v2000_v9  ;;  %v4776_v38 = vpack.c.bf16 %v2006_v22, %v2002_v18  ;;  %v4778_v17 = vpack.c.bf16 %v2005_v41, %v2001_v57  ;;  %v2025_v9 = vld [vmem:[#allocation9 + $0x1d0] sm:$0xff]  ;;  %v2326_v57 = vld [vmem:[#allocation10 + $0x268] sm:$0xff]  ;;  %v2324_v41 = vld [vmem:[#allocation10 + $0x258] sm:$0xff] }
 0x7b4   :  { %5558 = vtanh.f32 %v6520_v25  ;;  %v2029_v14 = vld [vmem:[#allocation9 + $0x1f0] sm:$0xff] }
 0x7b5   :  { %v4790_v22 = vpack.c.bf16 %v2029_v14, %v2025_v9  ;;  %v2350_v9 = vld [vmem:[#allocation10 + $0x328] sm:$0xff]  ;;  %v2348_v14 = vld [vmem:[#allocation10 + $0x318] sm:$0xff] }
 0x7be   :  { %v5559_v45 = vpop.eup %5558 }
 0x7bf   :  { %v6523_v1 = vmul.f32 %v5559_v45, %v5557_v5  ;;  %v2008_v5 = vld [vmem:[#allocation9 + $0x148] sm:$0xff] }
 0x7c0   :  { %v2012_v45 = vld [vmem:[#allocation9 + $0x168] sm:$0xff] }
 0x7c1   :  { %1850 = vmatmul.mubr.f32.vlgmr.msra.gmra.mrb[14].mxu0 %v6523_v1  ;;  %1921 = vmatmul.mubr.f32.vlgmr.msra.gmra.mrb[14].mxu1 %v6523_v1  ;;  %v4748_v8 = vpack.c.bf16 %v2012_v45, %v2008_v5  ;;  %v2328_v45 = vld [vmem:[#allocation10 + $0x278] sm:$0xff] }
 0x7c2   :  { %4731 = vmatpush1.bf16.msra.mxu0 %v4730_v49  ;;  %4763 = vmatpush1.bf16.msra.mxu1 %v4762_v11  ;;  %v2010_v49 = vld [vmem:[#allocation9 + $0x158] sm:$0xff] }
 0x7c3   :  { %4733 = vmatprep.subr.bf16.mxu0 %v4732_v28  ;;  %4765 = vmatprep.subr.bf16.mxu1 %v4764_v24  ;;  %v2014_v11 = vld [vmem:[#allocation9 + $0x178] sm:$0xff]  ;;  %v2007_v28 = vld [vmem:[#allocation9 + $0x140] sm:$0xff] }
 0x7c4   :  { %2118 = vmatprep.mubr.f32.mxu0 %v5926_v0  ;;  %2231 = vmatprep.mubr.f32.mxu1 %v5926_v0  ;;  %v2011_v24 = vld [vmem:[#allocation9 + $0x160] sm:$0xff]  ;;  %v4780_v42 = vpack.c.bf16 %v2014_v11, %v2010_v49 }
 0x7c5   :  { %v4750_v3 = vpack.c.bf16 %v2011_v24, %v2007_v28  ;;  %v2321_v49 = vld [vmem:[#allocation10 + $0x240] sm:$0xff]  ;;  %v2323_v28 = vld [vmem:[#allocation10 + $0x250] sm:$0xff] }
 0x7c6   :  { %4735 = vmatpush1.bf16.msra.mxu0 %v4734_v60  ;;  %4767 = vmatpush1.bf16.msra.mxu1 %v4766_v63  ;;  %v2018_v60 = vld [vmem:[#allocation9 + $0x198] sm:$0xff]  ;;  %v2325_v11 = vld [vmem:[#allocation10 + $0x260] sm:$0xff]  ;;  %v2327_v24 = vld [vmem:[#allocation10 + $0x270] sm:$0xff] }
 0x7c7   :  { %4737 = vmatprep.subr.bf16.mxu0 %v4736_v10  ;;  %4769 = vmatprep.subr.bf16.mxu1 %v4768_v13  ;;  %v2022_v63 = vld [vmem:[#allocation9 + $0x1b8] sm:$0xff]  ;;  %v2015_v10 = vld [vmem:[#allocation9 + $0x180] sm:$0xff] }
 0x7c8   :  { %v2019_v13 = vld [vmem:[#allocation9 + $0x1a0] sm:$0xff]  ;;  %v4784_v19 = vpack.c.bf16 %v2022_v63, %v2018_v60 }
 0x7c9   :  { %v4754_v44 = vpack.c.bf16 %v2019_v13, %v2015_v10  ;;  %v2329_v60 = vld [vmem:[#allocation10 + $0x280] sm:$0xff]  ;;  %v2331_v10 = vld [vmem:[#allocation10 + $0x290] sm:$0xff] }
 0x7ca   :  { %4739 = vmatpush1.bf16.msra.mxu0 %v4738_v36  ;;  %4771 = vmatpush1.bf16.msra.mxu1 %v4770_v40  ;;  %v2026_v36 = vld [vmem:[#allocation9 + $0x1d8] sm:$0xff]  ;;  %v2333_v63 = vld [vmem:[#allocation10 + $0x2a0] sm:$0xff]  ;;  %v2335_v13 = vld [vmem:[#allocation10 + $0x2b0] sm:$0xff] }
 0x7cb   :  { %4741 = vmatprep.subr.bf16.mxu0 %v4740_v54  ;;  %4773 = vmatprep.subr.bf16.mxu1 %v4772_v58  ;;  %v2030_v40 = vld [vmem:[#allocation9 + $0x1f8] sm:$0xff]  ;;  %v2023_v54 = vld [vmem:[#allocation9 + $0x1c0] sm:$0xff]  ;;  %v4756_v58 = vpack.c.bf16 %v2028_v32, %v2024_v29 }
 0x7cc   :  { %v4788_v62 = vpack.c.bf16 %v2030_v40, %v2026_v36  ;;  %v4758_v18 = vpack.c.bf16 %v2027_v4, %v2023_v54  ;;  %v2344_v32 = vld [vmem:[#allocation10 + $0x2f8] sm:$0xff]  ;;  %v2337_v36 = vld [vmem:[#allocation10 + $0x2c0] sm:$0xff]  ;;  %v2339_v54 = vld [vmem:[#allocation10 + $0x2d0] sm:$0xff] }
 0x7cd   :  { %v2341_v40 = vld [vmem:[#allocation10 + $0x2e0] sm:$0xff]  ;;  %v2346_v4 = vld [vmem:[#allocation10 + $0x308] sm:$0xff] }
 0x7ce   :  { %4743 = vmatpush1.bf16.msra.mxu0 %v4742_v27  ;;  %4775 = vmatpush1.bf16.msra.mxu1 %v4774_v55  ;;  %v2313_v27 = vld [vmem:[#allocation10 + $0x200] sm:$0xff] }
 0x7cf   :  { %4745 = vmatprep.subr.bf16.mxu0 %v4744_v52  ;;  %4777 = vmatprep.subr.bf16.mxu1 %v4776_v38  ;;  %v2319_v52 = vld [vmem:[#allocation10 + $0x230] sm:$0xff]  ;;  %v2322_v38 = vld [vmem:[#allocation10 + $0x248] sm:$0xff] }
 0x7d0   :  { %v6569_v5 = vpack.c.bf16 %v2326_v57, %v2322_v38  ;;  %v2358_v38 = vld [vmem:[#allocation10 + $0x368] sm:$0xff]  ;;  %v2356_v57 = vld [vmem:[#allocation10 + $0x358] sm:$0xff] }
 0x7d2   :  { %4747 = vmatpush1.bf16.msra.mxu0 %v4746_v30  ;;  %4779 = vmatpush1.bf16.msra.mxu1 %v4778_v17  ;;  %v6571_v30 = vpack.c.bf16 %v2328_v45, %v2324_v41  ;;  %v6573_v17 = vpack.c.bf16 %v2325_v11, %v2321_v49  ;;  %v2360_v45 = vld [vmem:[#allocation10 + $0x378] sm:$0xff]  ;;  %v2353_v49 = vld [vmem:[#allocation10 + $0x340] sm:$0xff] }
 0x7d3   :  { %4749 = vmatprep.subr.bf16.mxu0 %v4748_v8  ;;  %4781 = vmatprep.subr.bf16.mxu1 %v4780_v42  ;;  %v6576_v8 = vpack.c.bf16 %v2327_v24, %v2323_v28  ;;  %v2330_v42 = vld [vmem:[#allocation10 + $0x288] sm:$0xff]  ;;  %v2357_v11 = vld [vmem:[#allocation10 + $0x360] sm:$0xff]  ;;  %v6619_v28 = vpack.c.bf16 %v2360_v45, %v2356_v57 }
 0x7d4   :  { %v6581_v53 = vpack.c.bf16 %v2334_v47, %v2330_v42  ;;  %v6621_v24 = vpack.c.bf16 %v2357_v11, %v2353_v49  ;;  %v2355_v42 = vld [vmem:[#allocation10 + $0x350] sm:$0xff] }
 0x7d5   :  { %v2359_v47 = vld [vmem:[#allocation10 + $0x370] sm:$0xff] }
 0x7d6   :  { %4751 = vmatpush1.bf16.msra.mxu0 %v4750_v3  ;;  %4783 = vmatpush1.bf16.msra.mxu1 %v4782_v6  ;;  %v6583_v3 = vpack.c.bf16 %v2336_v56, %v2332_v50  ;;  %v6585_v6 = vpack.c.bf16 %v2333_v63, %v2329_v60  ;;  %v6624_v50 = vpack.c.bf16 %v2359_v47, %v2355_v42  ;;  %v2362_v56 = vld [vmem:[#allocation10 + $0x388] sm:$0xff]  ;;  %v2364_v63 = vld [vmem:[#allocation10 + $0x398] sm:$0xff] }
 0x7d7   :  { %4753 = vmatprep.subr.bf16.mxu0 %v4752_v16  ;;  %4785 = vmatprep.subr.bf16.mxu1 %v4784_v19  ;;  %v6588_v16 = vpack.c.bf16 %v2335_v13, %v2331_v10  ;;  %v2338_v19 = vld [vmem:[#allocation10 + $0x2c8] sm:$0xff]  ;;  %v2368_v13 = vld [vmem:[#allocation10 + $0x3b8] sm:$0xff] }
 0x7d8   :  { %v6593_v29 = vpack.c.bf16 %v2342_v23, %v2338_v19  ;;  %v2366_v60 = vld [vmem:[#allocation10 + $0x3a8] sm:$0xff]  ;;  %v2361_v19 = vld [vmem:[#allocation10 + $0x380] sm:$0xff] }
 0x7d9   :  { %v6629_v10 = vpack.c.bf16 %v2366_v60, %v2362_v56  ;;  %v2365_v23 = vld [vmem:[#allocation10 + $0x3a0] sm:$0xff] }
 0x7da   :  { %4755 = vmatpush1.bf16.msra.mxu0 %v4754_v44  ;;  %4787 = vmatpush1.bf16.msra.mxu1 %v4786_v48  ;;  %v6595_v44 = vpack.c.bf16 %v2344_v32, %v2340_v26  ;;  %v6597_v48 = vpack.c.bf16 %v2341_v40, %v2337_v36  ;;  %v6631_v26 = vpack.c.bf16 %v2368_v13, %v2364_v63  ;;  %v2363_v36 = vld [vmem:[#allocation10 + $0x390] sm:$0xff] }
 0x7db   :  { %4757 = vmatprep.subr.bf16.mxu0 %v4756_v58  ;;  %4789 = vmatprep.subr.bf16.mxu1 %v4788_v62  ;;  %v2343_v58 = vld [vmem:[#allocation10 + $0x2f0] sm:$0xff]  ;;  %v6633_v32 = vpack.c.bf16 %v2365_v23, %v2361_v19 }
 0x7dc   :  { %v6600_v62 = vpack.c.bf16 %v2343_v58, %v2339_v54  ;;  %v2367_v40 = vld [vmem:[#allocation10 + $0x3b0] sm:$0xff]  ;;  %v2370_v58 = vld [vmem:[#allocation10 + $0x3c8] sm:$0xff] }
 0x7dd   :  { %v6636_v54 = vpack.c.bf16 %v2367_v40, %v2363_v36 }
 0x7de   :  { %4759 = vmatpush1.bf16.msra.mxu0 %v4758_v18  ;;  %4791 = vmatpush1.bf16.msra.mxu1 %v4790_v22  ;;  %v6605_v18 = vpack.c.bf16 %v2350_v9, %v2346_v4  ;;  %v2352_v22 = vld [vmem:[#allocation10 + $0x338] sm:$0xff]  ;;  %v2374_v4 = vld [vmem:[#allocation10 + $0x3e8] sm:$0xff] }
 0x7df   :  { %v2372_v9 = vld [vmem:[#allocation10 + $0x3d8] sm:$0xff] }
 0x7e1   :  { %2119 = vmatmul.mubr.f32.vlgmr.msra.gmra.mrb[16].mxu0 %v6249_v51  ;;  %2232 = vmatmul.mubr.f32.vlgmr.msra.gmra.mrb[16].mxu1 %v6249_v51  ;;  %v2314_v51 = vld [vmem:[#allocation10 + $0x208] sm:$0xff] }
 0x7e2   :  { %2124 = vmatprep.mubr.f32.mxu0 %v5926_v0  ;;  %2237 = vmatprep.mubr.f32.mxu1 %v5926_v0 }
 0x7e5   :  { %2125 = vmatmul.mubr.f32.gmra.mrb[18].mxu0 %v6295_v7  ;;  %2238 = vmatmul.mubr.f32.gmra.mrb[18].mxu1 %v6295_v7  ;;  %v2318_v7 = vld [vmem:[#allocation10 + $0x228] sm:$0xff] }
 0x7e6   :  { %2130 = vmatprep.mubr.f32.mxu0 %v5926_v0  ;;  %2243 = vmatprep.mubr.f32.mxu1 %v5926_v0 }
 0x7e9   :  { %2131 = vmatmul.mubr.f32.gmra.mrb[20].mxu0 %v6341_v20  ;;  %2244 = vmatmul.mubr.f32.gmra.mrb[20].mxu1 %v6341_v20  ;;  %v2316_v20 = vld [vmem:[#allocation10 + $0x218] sm:$0xff] }
 0x7ea   :  { %2136 = vmatprep.mubr.f32.mxu0 %v5926_v0  ;;  %2249 = vmatprep.mubr.f32.mxu1 %v5926_v0 }
 0x7ed   :  { %2137 = vmatmul.mubr.f32.gmra.mrb[22].mxu0 %v6387_v46  ;;  %2250 = vmatmul.mubr.f32.gmra.mrb[22].mxu1 %v6387_v46  ;;  %v6557_v46 = vpack.c.bf16 %v2318_v7, %v2314_v51  ;;  %v2345_v51 = vld [vmem:[#allocation10 + $0x300] sm:$0xff] }
 0x7ee   :  { %2142 = vmatprep.mubr.f32.mxu0 %v5926_v0  ;;  %2255 = vmatprep.mubr.f32.mxu1 %v5926_v0  ;;  %v2349_v7 = vld [vmem:[#allocation10 + $0x320] sm:$0xff] }
 0x7ef   :  { %4793 = vmatprep.subr.bf16.mxu0 %v6557_v46 }
 0x7f1   :  { %2143 = vmatmul.mubr.f32.gmra.mrb[24].mxu0 %v6433_v12  ;;  %2256 = vmatmul.mubr.f32.gmra.mrb[24].mxu1 %v6433_v12  ;;  %v2320_v12 = vld [vmem:[#allocation10 + $0x238] sm:$0xff] }
 0x7f2   :  { %2148 = vmatprep.mubr.f32.mxu0 %v5926_v0  ;;  %2261 = vmatprep.mubr.f32.mxu1 %v5926_v0  ;;  %v6559_v55 = vpack.c.bf16 %v2320_v12, %v2316_v20  ;;  %v6607_v20 = vpack.c.bf16 %v2352_v22, %v2348_v14  ;;  %v6609_v12 = vpack.c.bf16 %v2349_v7, %v2345_v51  ;;  %v2376_v22 = vld [vmem:[#allocation10 + $0x3f8] sm:$0xff]  ;;  %v2369_v51 = vld [vmem:[#allocation10 + $0x3c0] sm:$0xff] }
 0x7f3   :  { %v6641_v14 = vpack.c.bf16 %v2374_v4, %v2370_v58  ;;  %v2373_v7 = vld [vmem:[#allocation10 + $0x3e0] sm:$0xff] }
 0x7f4   :  { %4825 = vmatprep.subr.bf16.mxu1 %v6559_v55 }
 0x7f5   :  { %2149 = vmatmul.mubr.f32.gmra.mrb[26].mxu0 %v6479_v21  ;;  %2262 = vmatmul.mubr.f32.gmra.mrb[26].mxu1 %v6479_v21  ;;  %v2317_v21 = vld [vmem:[#allocation10 + $0x220] sm:$0xff] }
 0x7f6   :  { %2154 = vmatprep.mubr.f32.mxu0 %v5926_v0  ;;  %2267 = vmatprep.mubr.f32.mxu1 %v5926_v0  ;;  %v6561_v34 = vpack.c.bf16 %v2317_v21, %v2313_v27  ;;  %v2347_v27 = vld [vmem:[#allocation10 + $0x310] sm:$0xff] }
 0x7f7   :  { %v2351_v21 = vld [vmem:[#allocation10 + $0x330] sm:$0xff] }
 0x7f8   :  { %4795 = vmatpush1.bf16.msra.mxu0 %v6561_v34 }
 0x7f9   :  { %2155 = vmatmul.mubr.f32.gmra.mrb[28].mxu0 %v6523_v1  ;;  %2268 = vmatmul.mubr.f32.gmra.mrb[28].mxu1 %v6523_v1  ;;  %v6564_v1 = vpack.c.bf16 %v2319_v52, %v2315_v15  ;;  %v6612_v15 = vpack.c.bf16 %v2351_v21, %v2347_v27  ;;  %v2354_v52 = vld [vmem:[#allocation10 + $0x348] sm:$0xff]  ;;  %v6643_v27 = vpack.c.bf16 %v2376_v22, %v2372_v9 }
 0x7fa   :  { %2160 = vmatprep.mubr.f32.mxu0 %v5926_v0  ;;  %2273 = vmatprep.mubr.f32.mxu1 %v5926_v0  ;;  %v6617_v41 = vpack.c.bf16 %v2358_v38, %v2354_v52  ;;  %v6645_v21 = vpack.c.bf16 %v2373_v7, %v2369_v51  ;;  %v2371_v52 = vld [vmem:[#allocation10 + $0x3d0] sm:$0xff] }
 0x7fb   :  { %4827 = vmatpush1.bf16.msra.mxu1 %v6564_v1  ;;  %4797 = vmatprep.subr.bf16.mxu0 %v6569_v5  ;;  %v2375_v38 = vld [vmem:[#allocation10 + $0x3f0] sm:$0xff] }
 0x7fc   :  { %4829 = vmatprep.subr.bf16.mxu1 %v6571_v30  ;;  %4799 = vmatpush1.bf16.msra.mxu0 %v6573_v17  ;;  %v6648_v57 = vpack.c.bf16 %v2375_v38, %v2371_v52 }
 0x7fd   :  { %4801 = vmatprep.subr.bf16.mxu0 %v6581_v53 }
 0x7ff   :  { %4831 = vmatpush1.bf16.msra.mxu1 %v6576_v8 }
 0x800   :  { %4833 = vmatprep.subr.bf16.mxu1 %v6583_v3  ;;  %4803 = vmatpush1.bf16.msra.mxu0 %v6585_v6 }
 0x801   :  { %4805 = vmatprep.subr.bf16.mxu0 %v6593_v29 }
 0x803   :  { %4835 = vmatpush1.bf16.msra.mxu1 %v6588_v16 }
 0x804   :  { %4837 = vmatprep.subr.bf16.mxu1 %v6595_v44  ;;  %4807 = vmatpush1.bf16.msra.mxu0 %v6597_v48 }
 0x805   :  { %4809 = vmatprep.subr.bf16.mxu0 %v6605_v18 }
 0x807   :  { %4839 = vmatpush1.bf16.msra.mxu1 %v6600_v62 }
 0x808   :  { %4841 = vmatprep.subr.bf16.mxu1 %v6607_v20  ;;  %4811 = vmatpush1.bf16.msra.mxu0 %v6609_v12 }
 0x809   :  { %4813 = vmatprep.subr.bf16.mxu0 %v6617_v41 }
 0x80b   :  { %4843 = vmatpush1.bf16.msra.mxu1 %v6612_v15 }
 0x80c   :  { %4845 = vmatprep.subr.bf16.mxu1 %v6619_v28  ;;  %4815 = vmatpush1.bf16.msra.mxu0 %v6621_v24 }
 0x80d   :  { %4817 = vmatprep.subr.bf16.mxu0 %v6629_v10 }
 0x80f   :  { %4847 = vmatpush1.bf16.msra.mxu1 %v6624_v50 }
 0x810   :  { %4849 = vmatprep.subr.bf16.mxu1 %v6631_v26  ;;  %4819 = vmatpush1.bf16.msra.mxu0 %v6633_v32 }
 0x811   :  { %4821 = vmatprep.subr.bf16.mxu0 %v6641_v14 }
 0x813   :  { %4851 = vmatpush1.bf16.msra.mxu1 %v6636_v54 }
 0x814   :  { %4853 = vmatprep.subr.bf16.mxu1 %v6643_v27  ;;  %4823 = vmatpush1.bf16.msra.mxu0 %v6645_v21 }
 0x815   :  { %4857 = vmatprep.subr.bf16.mxu0 %v6557_v46 }
 0x817   :  { %4855 = vmatpush1.bf16.msra.mxu1 %v6648_v57 }
 0x818   :  { %4889 = vmatprep.subr.bf16.mxu1 %v6559_v55 }
 0x894   :  { %v1851_v45 = vpop.f32.mrb[14].mxu0  ;;  %v1922_v49 = vpop.f32.mrb[14].mxu1 }
 0x895   :  { %v5318_v11 = vadd.f32 %v1851_v45, %v6226_v37  ;;  %v1853_v42 = vpop.f32.mrb[15].mxu0  ;;  %v1924_v47 = vpop.f32.mrb[15].mxu1  ;;  %v5334_v23 = vadd.f32 %v1922_v49, %v6243_v2  ;;  %v118_v49 = vld [vmem:[%s7199_s5 + $0x8] sm:$0xff]  ;;  %s5927_s5 = smov [#allocation16]  }
 0x896   :  { %v5319_v56 = vadd.f32 %v1853_v42, %v6230_v39  ;;  %v5335_v13 = vadd.f32 %v1924_v47, %v6237_v59  ;;  %s4070_s25 = sshll.u32 %s5927_s5, 4  ;;  %s7078_s25 = int_to_ptr.vmem [resolvable:$true] %s4070_s25 }
 0x897   :  { %v4125_v60 = vmul.f32 -1.442695, %v5318_v11  ;;  %s5836_s29 = scalar_lea.vmem %s7078_s25, 256  ;;  %p5841_p7 = scmp.lt.s32.totalorder %s7078_s25, %s7078_s25 }
 0x898   :  { %v4126_v63 = vmul.f32 -1.442695, %v5319_v56  ;;  %v4127_v19 = vmul.f32 -1.442695, %v5335_v13  ;;  %p5837_p6 = scmp.ne.s32.totalorder %s7078_s25, %s5836_s29  ;;  %p5842_p8 = scmp.lt.s32.totalorder %s5836_s29, %s5836_s29 }
 0x899   :  { %5560 = vpow2.f32 %v4125_v60 }
 0x89a   :  { %5562 = vpow2.f32 %v4126_v63  ;;  %p5843_p9 = por %p5842_p8, %p5841_p7 }
 0x89b   :  { %5564 = vpow2.f32 %v4127_v19 }
 0x89c   :  { %5566 = vtanh.f32 %v5334_v23  ;;  %p5844_p10 = pnand %p5843_p9, %p5837_p6 }
 0x8a3   :  { %v5561_v36 = vpop.eup %5560 }
 0x8a4   :  { %v5563_v40 = vpop.eup %5562  ;;  %v1934_v58 = vadd.f32 1.0, %v5561_v36 }
 0x8a5   :  { %v1940_v4 = vadd.f32 1.0, %v5563_v40  ;;  %v5565_v37 = vpop.eup %5564 }
 0x8a6   :  { %5568 = vrcp.f32 %v1934_v58  ;;  %v5567_v9 = vpop.eup %5566  ;;  %v1947_v7 = vadd.f32 1.0, %v5565_v37 }
 0x8a7   :  { %5570 = vrcp.f32 %v1940_v4 }
 0x8a8   :  { %5572 = vrcp.f32 %v1947_v7  ;;  %v122_v7 = vld [vmem:[#allocation13 + $0x8] sm:$0xff] }
 0x8b0   :  { %v5569_v39 = vpop.eup %5568 }
 0x8b1   :  { %v5571_v22 = vpop.eup %5570  ;;  %v1951_v51 = vmul.f32 %v5569_v39, %v5567_v9 }
 0x8b2   :  { %v1950_v52 = vmul.f32 %v5571_v22, %v6520_v25  ;;  %v5573_v2 = vpop.eup %5572  ;;  %v2032_v25 = vld [vmem:[#allocation12 + $0x4] sm:$0xf] }
 0x8b3   :  { %v6701_v11 = vrot.slane %v2032_v25, %v201_v33  ;;  %v6705_v42 = vrot.slane %v2032_v25, %v205_v35  ;;  %v6711_v40 = vrot.slane %v2032_v25, %v213_v43  ;;  %v6716_v35 = vrot.slane %v2032_v25, %v209_v61 }
 0x8b4   :  { %v1952_v59 = vadd.f32 %v1951_v51, %v1950_v52 }
 0x8b6   :  { %5574 = vtanh.f32 %v1952_v59  ;;  %1958 = vst [vmem:[#allocation18] sm:$0xff] %v1952_v59 }
 0x8c0   :  { %v5575_v38 = vpop.eup %5574 }
 0x8c1   :  { %v1954_v45 = vmul.f32 %v5575_v38, %v5573_v2 }
 0x8c3   :  { %1957 = vst [vmem:[#allocation16] sm:$0xff] %v1954_v45  ;;  %2161 = vmatmul.mubr.f32.gmra.mrb[30].mxu0 %v1954_v45  ;;  %2274 = vmatmul.mubr.f32.gmra.mrb[30].mxu1 %v1954_v45 }
 0x8c4   :  { %2449 = vmatprep.mubr.f32.mxu0 %v5926_v0  ;;  %2520 = vmatprep.mubr.f32.mxu1 %v5926_v0 }
 0x8c7   :  { %2450 = vmatmul.mubr.f32.vlgmr.msra.gmra.mrb[16].mxu0 %v118_v49  ;;  %2521 = vmatmul.mubr.f32.vlgmr.msra.gmra.mrb[16].mxu1 %v118_v49 }
 0x8c8   :  { %4859 = vmatpush1.bf16.msra.mxu0 %v6561_v34  ;;  %4891 = vmatpush1.bf16.msra.mxu1 %v6564_v1 }
 0x8c9   :  { %4861 = vmatprep.subr.bf16.mxu0 %v6569_v5  ;;  %4893 = vmatprep.subr.bf16.mxu1 %v6571_v30 }
 0x8ca   :  { %2624 = vmatprep.mubr.f32.mxu0 %v5926_v0  ;;  %2695 = vmatprep.mubr.f32.mxu1 %v5926_v0 }
 0x8cc   :  { %4863 = vmatpush1.bf16.msra.mxu0 %v6573_v17  ;;  %4895 = vmatpush1.bf16.msra.mxu1 %v6576_v8 }
 0x8cd   :  { %4865 = vmatprep.subr.bf16.mxu0 %v6581_v53  ;;  %4897 = vmatprep.subr.bf16.mxu1 %v6583_v3 }
 0x8d0   :  { %4867 = vmatpush1.bf16.msra.mxu0 %v6585_v6  ;;  %4899 = vmatpush1.bf16.msra.mxu1 %v6588_v16 }
 0x8d1   :  { %4869 = vmatprep.subr.bf16.mxu0 %v6593_v29  ;;  %4901 = vmatprep.subr.bf16.mxu1 %v6595_v44 }
 0x8d4   :  { %4871 = vmatpush1.bf16.msra.mxu0 %v6597_v48  ;;  %4903 = vmatpush1.bf16.msra.mxu1 %v6600_v62 }
 0x8d5   :  { %4873 = vmatprep.subr.bf16.mxu0 %v6605_v18  ;;  %4905 = vmatprep.subr.bf16.mxu1 %v6607_v20 }
 0x8d8   :  { %4875 = vmatpush1.bf16.msra.mxu0 %v6609_v12  ;;  %4907 = vmatpush1.bf16.msra.mxu1 %v6612_v15 }
 0x8d9   :  { %4877 = vmatprep.subr.bf16.mxu0 %v6617_v41  ;;  %4909 = vmatprep.subr.bf16.mxu1 %v6619_v28 }
 0x8dc   :  { %4879 = vmatpush1.bf16.msra.mxu0 %v6621_v24  ;;  %4911 = vmatpush1.bf16.msra.mxu1 %v6624_v50 }
 0x8dd   :  { %4881 = vmatprep.subr.bf16.mxu0 %v6629_v10  ;;  %4913 = vmatprep.subr.bf16.mxu1 %v6631_v26 }
 0x8e0   :  { %4883 = vmatpush1.bf16.msra.mxu0 %v6633_v32  ;;  %4915 = vmatpush1.bf16.msra.mxu1 %v6636_v54 }
 0x8e1   :  { %4885 = vmatprep.subr.bf16.mxu0 %v6641_v14  ;;  %4917 = vmatprep.subr.bf16.mxu1 %v6643_v27 }
 0x8e4   :  { %4887 = vmatpush1.bf16.msra.mxu0 %v6645_v21  ;;  %4919 = vmatpush1.bf16.msra.mxu1 %v6648_v57 }
 0x8e5   :  { %4921 = vmatprep.subr.bf16.mxu0 %v6557_v46  ;;  %4953 = vmatprep.subr.bf16.mxu1 %v6559_v55 }
 0x99a   :  { %v2451_v47 = vpop.f32.mrb[16].mxu0  ;;  %v2522_v56 = vpop.f32.mrb[16].mxu1 }
 0x99b   :  { %v5336_v60 = vadd.f32 %v2451_v47, %v6701_v11  ;;  %v2453_v63 = vpop.f32.mrb[17].mxu0  ;;  %v2524_v13 = vpop.f32.mrb[17].mxu1  ;;  %v5352_v4 = vadd.f32 %v2522_v56, %v6716_v35 }
 0x99c   :  { %v5337_v19 = vadd.f32 %v2453_v63, %v6705_v42  ;;  %v5353_v33 = vadd.f32 %v2524_v13, %v6711_v40 }
 0x99d   :  { %v4128_v23 = vmul.f32 -1.442695, %v5336_v60 }
 0x99e   :  { %v4129_v36 = vmul.f32 -1.442695, %v5337_v19  ;;  %v4130_v58 = vmul.f32 -1.442695, %v5353_v33 }
 0x99f   :  { %5576 = vpow2.f32 %v4128_v23 }
 0x9a0   :  { %5578 = vpow2.f32 %v4129_v36 }
 0x9a1   :  { %5580 = vpow2.f32 %v4130_v58 }
 0x9a2   :  { %5582 = vtanh.f32 %v5352_v4 }
 0x9a9   :  { %v5577_v37 = vpop.eup %5576 }
 0x9aa   :  { %v5579_v9 = vpop.eup %5578  ;;  %v2534_v39 = vadd.f32 1.0, %v5577_v37 }
 0x9ab   :  { %v2540_v22 = vadd.f32 1.0, %v5579_v9  ;;  %v5581_v43 = vpop.eup %5580 }
 0x9ac   :  { %5584 = vrcp.f32 %v2534_v39  ;;  %v5583_v51 = vpop.eup %5582  ;;  %v2547_v31 = vadd.f32 1.0, %v5581_v43 }
 0x9ad   :  { %5586 = vrcp.f32 %v2540_v22 }
 0x9ae   :  { %5588 = vrcp.f32 %v2547_v31 }
 0x9b6   :  { %v5585_v52 = vpop.eup %5584 }
 0x9b7   :  { %v5587_v59 = vpop.eup %5586  ;;  %v2551_v2 = vmul.f32 %v5585_v52, %v5583_v51 }
 0x9b8   :  { %v2550_v61 = vmul.f32 %v5587_v59, %v122_v7  ;;  %v5589_v45 = vpop.eup %5588 }
 0x9ba   :  { %v6719_v38 = vadd.f32 %v2551_v2, %v2550_v61 }
 0x9bc   :  { %5590 = vtanh.f32 %v6719_v38 }
 0x9c6   :  { %v5591_v49 = vpop.eup %5590 }
 0x9c7   :  { %v2554_v25 = vmul.f32 %v5591_v49, %v5589_v45 }
 0x9c9   :  { %2555 = vst [vmem:[#allocation3] sm:$0xff] %v2554_v25  ;;  %2625 = vmatmul.mubr.f32.vlgmr.msra.gmra.mrb[18].mxu0 %v2554_v25  ;;  %2696 = vmatmul.mubr.f32.vlgmr.msra.gmra.mrb[18].mxu1 %v2554_v25 }
 0x9ca   :  { %4923 = vmatpush1.bf16.msra.mxu0 %v6561_v34  ;;  %4955 = vmatpush1.bf16.msra.mxu1 %v6564_v1 }
 0x9cb   :  { %4925 = vmatprep.subr.bf16.mxu0 %v6569_v5  ;;  %4957 = vmatprep.subr.bf16.mxu1 %v6571_v30 }
 0x9cc   :  { %2799 = vmatprep.mubr.f32.mxu0 %v5926_v0  ;;  %2870 = vmatprep.mubr.f32.mxu1 %v5926_v0 }
 0x9ce   :  { %4927 = vmatpush1.bf16.msra.mxu0 %v6573_v17  ;;  %4959 = vmatpush1.bf16.msra.mxu1 %v6576_v8 }
 0x9cf   :  { %4929 = vmatprep.subr.bf16.mxu0 %v6581_v53  ;;  %4961 = vmatprep.subr.bf16.mxu1 %v6583_v3 }
 0x9d2   :  { %4931 = vmatpush1.bf16.msra.mxu0 %v6585_v6  ;;  %4963 = vmatpush1.bf16.msra.mxu1 %v6588_v16 }
 0x9d3   :  { %4933 = vmatprep.subr.bf16.mxu0 %v6593_v29  ;;  %4965 = vmatprep.subr.bf16.mxu1 %v6595_v44 }
 0x9d6   :  { %4935 = vmatpush1.bf16.msra.mxu0 %v6597_v48  ;;  %4967 = vmatpush1.bf16.msra.mxu1 %v6600_v62 }
 0x9d7   :  { %4937 = vmatprep.subr.bf16.mxu0 %v6605_v18  ;;  %4969 = vmatprep.subr.bf16.mxu1 %v6607_v20 }
 0x9da   :  { %4939 = vmatpush1.bf16.msra.mxu0 %v6609_v12  ;;  %4971 = vmatpush1.bf16.msra.mxu1 %v6612_v15 }
 0x9db   :  { %4941 = vmatprep.subr.bf16.mxu0 %v6617_v41  ;;  %4973 = vmatprep.subr.bf16.mxu1 %v6619_v28 }
 0x9de   :  { %4943 = vmatpush1.bf16.msra.mxu0 %v6621_v24  ;;  %4975 = vmatpush1.bf16.msra.mxu1 %v6624_v50 }
 0x9df   :  { %4945 = vmatprep.subr.bf16.mxu0 %v6629_v10  ;;  %4977 = vmatprep.subr.bf16.mxu1 %v6631_v26 }
 0x9e2   :  { %4947 = vmatpush1.bf16.msra.mxu0 %v6633_v32  ;;  %4979 = vmatpush1.bf16.msra.mxu1 %v6636_v54 }
 0x9e3   :  { %4949 = vmatprep.subr.bf16.mxu0 %v6641_v14  ;;  %4981 = vmatprep.subr.bf16.mxu1 %v6643_v27 }
 0x9e6   :  { %4951 = vmatpush1.bf16.msra.mxu0 %v6645_v21  ;;  %4983 = vmatpush1.bf16.msra.mxu1 %v6648_v57 }
 0x9e7   :  { %4985 = vmatprep.subr.bf16.mxu0 %v6557_v46  ;;  %5017 = vmatprep.subr.bf16.mxu1 %v6559_v55 }
 0xa9c   :  { %v2626_v47 = vpop.f32.mrb[18].mxu0  ;;  %v2697_v56 = vpop.f32.mrb[18].mxu1 }
 0xa9d   :  { %v5338_v60 = vadd.f32 %v2626_v47, %v6701_v11  ;;  %v2628_v63 = vpop.f32.mrb[19].mxu0  ;;  %v2699_v13 = vpop.f32.mrb[19].mxu1  ;;  %v5354_v4 = vadd.f32 %v2697_v56, %v6716_v35 }
 0xa9e   :  { %v5339_v19 = vadd.f32 %v2628_v63, %v6705_v42  ;;  %v5355_v33 = vadd.f32 %v2699_v13, %v6711_v40 }
 0xa9f   :  { %v4131_v23 = vmul.f32 -1.442695, %v5338_v60 }
 0xaa0   :  { %v4132_v36 = vmul.f32 -1.442695, %v5339_v19  ;;  %v4133_v58 = vmul.f32 -1.442695, %v5355_v33 }
 0xaa1   :  { %5592 = vpow2.f32 %v4131_v23 }
 0xaa2   :  { %5594 = vpow2.f32 %v4132_v36 }
 0xaa3   :  { %5596 = vpow2.f32 %v4133_v58 }
 0xaa4   :  { %5598 = vtanh.f32 %v5354_v4 }
 0xaab   :  { %v5593_v37 = vpop.eup %5592 }
 0xaac   :  { %v5595_v9 = vpop.eup %5594  ;;  %v2709_v39 = vadd.f32 1.0, %v5593_v37 }
 0xaad   :  { %v2715_v22 = vadd.f32 1.0, %v5595_v9  ;;  %v5597_v43 = vpop.eup %5596 }
 0xaae   :  { %5600 = vrcp.f32 %v2709_v39  ;;  %v5599_v51 = vpop.eup %5598  ;;  %v2722_v2 = vadd.f32 1.0, %v5597_v43 }
 0xaaf   :  { %5602 = vrcp.f32 %v2715_v22 }
 0xab0   :  { %5604 = vrcp.f32 %v2722_v2 }
 0xab8   :  { %v5601_v7 = vpop.eup %5600 }
 0xab9   :  { %v5603_v52 = vpop.eup %5602  ;;  %v2726_v59 = vmul.f32 %v5601_v7, %v5599_v51 }
 0xaba   :  { %v2725_v31 = vmul.f32 %v5603_v52, %v6719_v38  ;;  %v5605_v45 = vpop.eup %5604 }
 0xabc   :  { %v6761_v61 = vadd.f32 %v2726_v59, %v2725_v31 }
 0xabe   :  { %5606 = vtanh.f32 %v6761_v61 }
 0xac8   :  { %v5607_v49 = vpop.eup %5606 }
 0xac9   :  { %v2729_v25 = vmul.f32 %v5607_v49, %v5605_v45 }
 0xacb   :  { %2730 = vst [vmem:[#allocation3 + $0x8] sm:$0xff] %v2729_v25  ;;  %2800 = vmatmul.mubr.f32.vlgmr.msra.gmra.mrb[20].mxu0 %v2729_v25  ;;  %2871 = vmatmul.mubr.f32.vlgmr.msra.gmra.mrb[20].mxu1 %v2729_v25 }
 0xacc   :  { %4987 = vmatpush1.bf16.msra.mxu0 %v6561_v34  ;;  %5019 = vmatpush1.bf16.msra.mxu1 %v6564_v1 }
 0xacd   :  { %4989 = vmatprep.subr.bf16.mxu0 %v6569_v5  ;;  %5021 = vmatprep.subr.bf16.mxu1 %v6571_v30 }
 0xace   :  { %2974 = vmatprep.mubr.f32.mxu0 %v5926_v0  ;;  %3045 = vmatprep.mubr.f32.mxu1 %v5926_v0 }
 0xad0   :  { %4991 = vmatpush1.bf16.msra.mxu0 %v6573_v17  ;;  %5023 = vmatpush1.bf16.msra.mxu1 %v6576_v8 }
 0xad1   :  { %4993 = vmatprep.subr.bf16.mxu0 %v6581_v53  ;;  %5025 = vmatprep.subr.bf16.mxu1 %v6583_v3 }
 0xad4   :  { %4995 = vmatpush1.bf16.msra.mxu0 %v6585_v6  ;;  %5027 = vmatpush1.bf16.msra.mxu1 %v6588_v16 }
 0xad5   :  { %4997 = vmatprep.subr.bf16.mxu0 %v6593_v29  ;;  %5029 = vmatprep.subr.bf16.mxu1 %v6595_v44 }
 0xad8   :  { %4999 = vmatpush1.bf16.msra.mxu0 %v6597_v48  ;;  %5031 = vmatpush1.bf16.msra.mxu1 %v6600_v62 }
 0xad9   :  { %5001 = vmatprep.subr.bf16.mxu0 %v6605_v18  ;;  %5033 = vmatprep.subr.bf16.mxu1 %v6607_v20 }
 0xadc   :  { %5003 = vmatpush1.bf16.msra.mxu0 %v6609_v12  ;;  %5035 = vmatpush1.bf16.msra.mxu1 %v6612_v15 }
 0xadd   :  { %5005 = vmatprep.subr.bf16.mxu0 %v6617_v41  ;;  %5037 = vmatprep.subr.bf16.mxu1 %v6619_v28 }
 0xae0   :  { %5007 = vmatpush1.bf16.msra.mxu0 %v6621_v24  ;;  %5039 = vmatpush1.bf16.msra.mxu1 %v6624_v50 }
 0xae1   :  { %5009 = vmatprep.subr.bf16.mxu0 %v6629_v10  ;;  %5041 = vmatprep.subr.bf16.mxu1 %v6631_v26 }
 0xae4   :  { %5011 = vmatpush1.bf16.msra.mxu0 %v6633_v32  ;;  %5043 = vmatpush1.bf16.msra.mxu1 %v6636_v54 }
 0xae5   :  { %5013 = vmatprep.subr.bf16.mxu0 %v6641_v14  ;;  %5045 = vmatprep.subr.bf16.mxu1 %v6643_v27 }
 0xae8   :  { %5015 = vmatpush1.bf16.msra.mxu0 %v6645_v21  ;;  %5047 = vmatpush1.bf16.msra.mxu1 %v6648_v57 }
 0xae9   :  { %5049 = vmatprep.subr.bf16.mxu0 %v6557_v46  ;;  %5081 = vmatprep.subr.bf16.mxu1 %v6559_v55 }
 0xb9e   :  { %v2801_v38 = vpop.f32.mrb[20].mxu0  ;;  %v2872_v47 = vpop.f32.mrb[20].mxu1 }
 0xb9f   :  { %v5340_v56 = vadd.f32 %v2801_v38, %v6701_v11  ;;  %v2803_v60 = vpop.f32.mrb[21].mxu0  ;;  %v2874_v63 = vpop.f32.mrb[21].mxu1  ;;  %v5356_v58 = vadd.f32 %v2872_v47, %v6716_v35 }
 0xba0   :  { %v5341_v13 = vadd.f32 %v2803_v60, %v6705_v42  ;;  %v5357_v36 = vadd.f32 %v2874_v63, %v6711_v40 }
 0xba1   :  { %v4134_v19 = vmul.f32 -1.442695, %v5340_v56 }
 0xba2   :  { %v4135_v23 = vmul.f32 -1.442695, %v5341_v13  ;;  %v4136_v33 = vmul.f32 -1.442695, %v5357_v36 }
 0xba3   :  { %5608 = vpow2.f32 %v4134_v19 }
 0xba4   :  { %5610 = vpow2.f32 %v4135_v23 }
 0xba5   :  { %5612 = vpow2.f32 %v4136_v33 }
 0xba6   :  { %5614 = vtanh.f32 %v5356_v58 }
 0xbad   :  { %v5609_v4 = vpop.eup %5608 }
 0xbae   :  { %v5611_v37 = vpop.eup %5610  ;;  %v2884_v9 = vadd.f32 1.0, %v5609_v4 }
 0xbaf   :  { %v2890_v39 = vadd.f32 1.0, %v5611_v37  ;;  %v5613_v22 = vpop.eup %5612 }
 0xbb0   :  { %5616 = vrcp.f32 %v2884_v9  ;;  %v5615_v43 = vpop.eup %5614  ;;  %v2897_v59 = vadd.f32 1.0, %v5613_v22 }
 0xbb1   :  { %5618 = vrcp.f32 %v2890_v39 }
 0xbb2   :  { %5620 = vrcp.f32 %v2897_v59 }
 0xbba   :  { %v5617_v51 = vpop.eup %5616 }
 0xbbb   :  { %v5619_v7 = vpop.eup %5618  ;;  %v2901_v52 = vmul.f32 %v5617_v51, %v5615_v43 }
 0xbbc   :  { %v2900_v2 = vmul.f32 %v5619_v7, %v6761_v61  ;;  %v5621_v45 = vpop.eup %5620 }
 0xbbe   :  { %v6803_v31 = vadd.f32 %v2901_v52, %v2900_v2 }
 0xbc0   :  { %5622 = vtanh.f32 %v6803_v31 }
 0xbca   :  { %v5623_v49 = vpop.eup %5622 }
 0xbcb   :  { %v2904_v25 = vmul.f32 %v5623_v49, %v5621_v45 }
 0xbcd   :  { %2905 = vst [vmem:[#allocation3 + $0x10] sm:$0xff] %v2904_v25  ;;  %2975 = vmatmul.mubr.f32.vlgmr.msra.gmra.mrb[22].mxu0 %v2904_v25  ;;  %3046 = vmatmul.mubr.f32.vlgmr.msra.gmra.mrb[22].mxu1 %v2904_v25 }
 0xbce   :  { %5051 = vmatpush1.bf16.msra.mxu0 %v6561_v34  ;;  %5083 = vmatpush1.bf16.msra.mxu1 %v6564_v1 }
 0xbcf   :  { %5053 = vmatprep.subr.bf16.mxu0 %v6569_v5  ;;  %5085 = vmatprep.subr.bf16.mxu1 %v6571_v30 }
 0xbd0   :  { %3149 = vmatprep.mubr.f32.mxu0 %v5926_v0  ;;  %3220 = vmatprep.mubr.f32.mxu1 %v5926_v0 }
 0xbd2   :  { %5055 = vmatpush1.bf16.msra.mxu0 %v6573_v17  ;;  %5087 = vmatpush1.bf16.msra.mxu1 %v6576_v8 }
 0xbd3   :  { %5057 = vmatprep.subr.bf16.mxu0 %v6581_v53  ;;  %5089 = vmatprep.subr.bf16.mxu1 %v6583_v3 }
 0xbd6   :  { %5059 = vmatpush1.bf16.msra.mxu0 %v6585_v6  ;;  %5091 = vmatpush1.bf16.msra.mxu1 %v6588_v16 }
 0xbd7   :  { %5061 = vmatprep.subr.bf16.mxu0 %v6593_v29  ;;  %5093 = vmatprep.subr.bf16.mxu1 %v6595_v44 }
 0xbda   :  { %5063 = vmatpush1.bf16.msra.mxu0 %v6597_v48  ;;  %5095 = vmatpush1.bf16.msra.mxu1 %v6600_v62 }
 0xbdb   :  { %5065 = vmatprep.subr.bf16.mxu0 %v6605_v18  ;;  %5097 = vmatprep.subr.bf16.mxu1 %v6607_v20 }
 0xbde   :  { %5067 = vmatpush1.bf16.msra.mxu0 %v6609_v12  ;;  %5099 = vmatpush1.bf16.msra.mxu1 %v6612_v15 }
 0xbdf   :  { %5069 = vmatprep.subr.bf16.mxu0 %v6617_v41  ;;  %5101 = vmatprep.subr.bf16.mxu1 %v6619_v28 }
 0xbe2   :  { %5071 = vmatpush1.bf16.msra.mxu0 %v6621_v24  ;;  %5103 = vmatpush1.bf16.msra.mxu1 %v6624_v50 }
 0xbe3   :  { %5073 = vmatprep.subr.bf16.mxu0 %v6629_v10  ;;  %5105 = vmatprep.subr.bf16.mxu1 %v6631_v26 }
 0xbe6   :  { %5075 = vmatpush1.bf16.msra.mxu0 %v6633_v32  ;;  %5107 = vmatpush1.bf16.msra.mxu1 %v6636_v54 }
 0xbe7   :  { %5077 = vmatprep.subr.bf16.mxu0 %v6641_v14  ;;  %5109 = vmatprep.subr.bf16.mxu1 %v6643_v27 }
 0xbea   :  { %5079 = vmatpush1.bf16.msra.mxu0 %v6645_v21  ;;  %5111 = vmatpush1.bf16.msra.mxu1 %v6648_v57 }
 0xbeb   :  { %5113 = vmatprep.subr.bf16.mxu0 %v6557_v46  ;;  %5145 = vmatprep.subr.bf16.mxu1 %v6559_v55 }
 0xca0   :  { %v2976_v61 = vpop.f32.mrb[22].mxu0  ;;  %v3047_v38 = vpop.f32.mrb[22].mxu1 }
 0xca1   :  { %v5342_v47 = vadd.f32 %v2976_v61, %v6701_v11  ;;  %v2978_v56 = vpop.f32.mrb[23].mxu0  ;;  %v3049_v60 = vpop.f32.mrb[23].mxu1  ;;  %v5358_v33 = vadd.f32 %v3047_v38, %v6716_v35 }
 0xca2   :  { %v5343_v63 = vadd.f32 %v2978_v56, %v6705_v42  ;;  %v5359_v23 = vadd.f32 %v3049_v60, %v6711_v40 }
 0xca3   :  { %v4137_v13 = vmul.f32 -1.442695, %v5342_v47 }
 0xca4   :  { %v4138_v19 = vmul.f32 -1.442695, %v5343_v63  ;;  %v4139_v36 = vmul.f32 -1.442695, %v5359_v23 }
 0xca5   :  { %5624 = vpow2.f32 %v4137_v13 }
 0xca6   :  { %5626 = vpow2.f32 %v4138_v19 }
 0xca7   :  { %5628 = vpow2.f32 %v4139_v36 }
 0xca8   :  { %5630 = vtanh.f32 %v5358_v33 }
 0xcaf   :  { %v5625_v58 = vpop.eup %5624 }
 0xcb0   :  { %v5627_v4 = vpop.eup %5626  ;;  %v3059_v37 = vadd.f32 1.0, %v5625_v58 }
 0xcb1   :  { %v3065_v9 = vadd.f32 1.0, %v5627_v4  ;;  %v5629_v39 = vpop.eup %5628 }
 0xcb2   :  { %5632 = vrcp.f32 %v3059_v37  ;;  %v5631_v22 = vpop.eup %5630  ;;  %v3072_v52 = vadd.f32 1.0, %v5629_v39 }
 0xcb3   :  { %5634 = vrcp.f32 %v3065_v9 }
 0xcb4   :  { %5636 = vrcp.f32 %v3072_v52 }
 0xcbc   :  { %v5633_v43 = vpop.eup %5632 }
 0xcbd   :  { %v5635_v51 = vpop.eup %5634  ;;  %v3076_v7 = vmul.f32 %v5633_v43, %v5631_v22 }
 0xcbe   :  { %v3075_v59 = vmul.f32 %v5635_v51, %v6803_v31  ;;  %v5637_v45 = vpop.eup %5636 }
 0xcc0   :  { %v6845_v2 = vadd.f32 %v3076_v7, %v3075_v59 }
 0xcc2   :  { %5638 = vtanh.f32 %v6845_v2 }
 0xccc   :  { %v5639_v49 = vpop.eup %5638 }
 0xccd   :  { %v3079_v25 = vmul.f32 %v5639_v49, %v5637_v45 }
 0xccf   :  { %3080 = vst [vmem:[#allocation3 + $0x18] sm:$0xff] %v3079_v25  ;;  %3150 = vmatmul.mubr.f32.vlgmr.msra.gmra.mrb[24].mxu0 %v3079_v25  ;;  %3221 = vmatmul.mubr.f32.vlgmr.msra.gmra.mrb[24].mxu1 %v3079_v25 }
 0xcd0   :  { %5115 = vmatpush1.bf16.msra.mxu0 %v6561_v34  ;;  %5147 = vmatpush1.bf16.msra.mxu1 %v6564_v1 }
 0xcd1   :  { %5117 = vmatprep.subr.bf16.mxu0 %v6569_v5  ;;  %5149 = vmatprep.subr.bf16.mxu1 %v6571_v30 }
 0xcd2   :  { %3324 = vmatprep.mubr.f32.mxu0 %v5926_v0  ;;  %3395 = vmatprep.mubr.f32.mxu1 %v5926_v0 }
 0xcd4   :  { %5119 = vmatpush1.bf16.msra.mxu0 %v6573_v17  ;;  %5151 = vmatpush1.bf16.msra.mxu1 %v6576_v8 }
 0xcd5   :  { %5121 = vmatprep.subr.bf16.mxu0 %v6581_v53  ;;  %5153 = vmatprep.subr.bf16.mxu1 %v6583_v3 }
 0xcd8   :  { %5123 = vmatpush1.bf16.msra.mxu0 %v6585_v6  ;;  %5155 = vmatpush1.bf16.msra.mxu1 %v6588_v16 }
 0xcd9   :  { %5125 = vmatprep.subr.bf16.mxu0 %v6593_v29  ;;  %5157 = vmatprep.subr.bf16.mxu1 %v6595_v44 }
 0xcdc   :  { %5127 = vmatpush1.bf16.msra.mxu0 %v6597_v48  ;;  %5159 = vmatpush1.bf16.msra.mxu1 %v6600_v62 }
 0xcdd   :  { %5129 = vmatprep.subr.bf16.mxu0 %v6605_v18  ;;  %5161 = vmatprep.subr.bf16.mxu1 %v6607_v20 }
 0xce0   :  { %5131 = vmatpush1.bf16.msra.mxu0 %v6609_v12  ;;  %5163 = vmatpush1.bf16.msra.mxu1 %v6612_v15 }
 0xce1   :  { %5133 = vmatprep.subr.bf16.mxu0 %v6617_v41  ;;  %5165 = vmatprep.subr.bf16.mxu1 %v6619_v28 }
 0xce4   :  { %5135 = vmatpush1.bf16.msra.mxu0 %v6621_v24  ;;  %5167 = vmatpush1.bf16.msra.mxu1 %v6624_v50 }
 0xce5   :  { %5137 = vmatprep.subr.bf16.mxu0 %v6629_v10  ;;  %5169 = vmatprep.subr.bf16.mxu1 %v6631_v26 }
 0xce8   :  { %5139 = vmatpush1.bf16.msra.mxu0 %v6633_v32  ;;  %5171 = vmatpush1.bf16.msra.mxu1 %v6636_v54 }
 0xce9   :  { %5141 = vmatprep.subr.bf16.mxu0 %v6641_v14  ;;  %5173 = vmatprep.subr.bf16.mxu1 %v6643_v27 }
 0xcec   :  { %5143 = vmatpush1.bf16.msra.mxu0 %v6645_v21  ;;  %5175 = vmatpush1.bf16.msra.mxu1 %v6648_v57 }
 0xced   :  { %5177 = vmatprep.subr.bf16.mxu0 %v6557_v46  ;;  %5209 = vmatprep.subr.bf16.mxu1 %v6559_v55 }
 0xda2   :  { %v3151_v31 = vpop.f32.mrb[24].mxu0  ;;  %v3222_v61 = vpop.f32.mrb[24].mxu1 }
 0xda3   :  { %v5344_v38 = vadd.f32 %v3151_v31, %v6701_v11  ;;  %v3153_v47 = vpop.f32.mrb[25].mxu0  ;;  %v3224_v56 = vpop.f32.mrb[25].mxu1  ;;  %v5360_v36 = vadd.f32 %v3222_v61, %v6716_v35 }
 0xda4   :  { %v5345_v60 = vadd.f32 %v3153_v47, %v6705_v42  ;;  %v5361_v19 = vadd.f32 %v3224_v56, %v6711_v40 }
 0xda5   :  { %v4140_v63 = vmul.f32 -1.442695, %v5344_v38 }
 0xda6   :  { %v4141_v13 = vmul.f32 -1.442695, %v5345_v60  ;;  %v4142_v23 = vmul.f32 -1.442695, %v5361_v19 }
 0xda7   :  { %5640 = vpow2.f32 %v4140_v63 }
 0xda8   :  { %5642 = vpow2.f32 %v4141_v13 }
 0xda9   :  { %5644 = vpow2.f32 %v4142_v23 }
 0xdaa   :  { %5646 = vtanh.f32 %v5360_v36 }
 0xdb1   :  { %v5641_v33 = vpop.eup %5640 }
 0xdb2   :  { %v5643_v58 = vpop.eup %5642  ;;  %v3234_v4 = vadd.f32 1.0, %v5641_v33 }
 0xdb3   :  { %v3240_v37 = vadd.f32 1.0, %v5643_v58  ;;  %v5645_v9 = vpop.eup %5644 }
 0xdb4   :  { %5648 = vrcp.f32 %v3234_v4  ;;  %v5647_v39 = vpop.eup %5646  ;;  %v3247_v7 = vadd.f32 1.0, %v5645_v9 }
 0xdb5   :  { %5650 = vrcp.f32 %v3240_v37 }
 0xdb6   :  { %5652 = vrcp.f32 %v3247_v7 }
 0xdbe   :  { %v5649_v22 = vpop.eup %5648 }
 0xdbf   :  { %v5651_v43 = vpop.eup %5650  ;;  %v3251_v51 = vmul.f32 %v5649_v22, %v5647_v39 }
 0xdc0   :  { %v3250_v52 = vmul.f32 %v5651_v43, %v6845_v2  ;;  %v5653_v45 = vpop.eup %5652 }
 0xdc2   :  { %v6887_v59 = vadd.f32 %v3251_v51, %v3250_v52 }
 0xdc4   :  { %5654 = vtanh.f32 %v6887_v59 }
 0xdce   :  { %v5655_v49 = vpop.eup %5654 }
 0xdcf   :  { %v3254_v25 = vmul.f32 %v5655_v49, %v5653_v45 }
 0xdd1   :  { %3255 = vst [vmem:[#allocation3 + $0x20] sm:$0xff] %v3254_v25  ;;  %3325 = vmatmul.mubr.f32.vlgmr.msra.gmra.mrb[26].mxu0 %v3254_v25  ;;  %3396 = vmatmul.mubr.f32.vlgmr.msra.gmra.mrb[26].mxu1 %v3254_v25 }
 0xdd2   :  { %5179 = vmatpush1.bf16.msra.mxu0 %v6561_v34  ;;  %5211 = vmatpush1.bf16.msra.mxu1 %v6564_v1 }
 0xdd3   :  { %5181 = vmatprep.subr.bf16.mxu0 %v6569_v5  ;;  %5213 = vmatprep.subr.bf16.mxu1 %v6571_v30 }
 0xdd4   :  { %3499 = vmatprep.mubr.f32.mxu0 %v5926_v0  ;;  %3570 = vmatprep.mubr.f32.mxu1 %v5926_v0 }
 0xdd6   :  { %5183 = vmatpush1.bf16.msra.mxu0 %v6573_v17  ;;  %5215 = vmatpush1.bf16.msra.mxu1 %v6576_v8 }
 0xdd7   :  { %5185 = vmatprep.subr.bf16.mxu0 %v6581_v53  ;;  %5217 = vmatprep.subr.bf16.mxu1 %v6583_v3 }
 0xdda   :  { %5187 = vmatpush1.bf16.msra.mxu0 %v6585_v6  ;;  %5219 = vmatpush1.bf16.msra.mxu1 %v6588_v16 }
 0xddb   :  { %5189 = vmatprep.subr.bf16.mxu0 %v6593_v29  ;;  %5221 = vmatprep.subr.bf16.mxu1 %v6595_v44 }
 0xdde   :  { %5191 = vmatpush1.bf16.msra.mxu0 %v6597_v48  ;;  %5223 = vmatpush1.bf16.msra.mxu1 %v6600_v62 }
 0xddf   :  { %5193 = vmatprep.subr.bf16.mxu0 %v6605_v18  ;;  %5225 = vmatprep.subr.bf16.mxu1 %v6607_v20 }
 0xde2   :  { %5195 = vmatpush1.bf16.msra.mxu0 %v6609_v12  ;;  %5227 = vmatpush1.bf16.msra.mxu1 %v6612_v15 }
 0xde3   :  { %5197 = vmatprep.subr.bf16.mxu0 %v6617_v41  ;;  %5229 = vmatprep.subr.bf16.mxu1 %v6619_v28 }
 0xde6   :  { %5199 = vmatpush1.bf16.msra.mxu0 %v6621_v24  ;;  %5231 = vmatpush1.bf16.msra.mxu1 %v6624_v50 }
 0xde7   :  { %5201 = vmatprep.subr.bf16.mxu0 %v6629_v10  ;;  %5233 = vmatprep.subr.bf16.mxu1 %v6631_v26 }
 0xdea   :  { %5203 = vmatpush1.bf16.msra.mxu0 %v6633_v32  ;;  %5235 = vmatpush1.bf16.msra.mxu1 %v6636_v54 }
 0xdeb   :  { %5205 = vmatprep.subr.bf16.mxu0 %v6641_v14  ;;  %5237 = vmatprep.subr.bf16.mxu1 %v6643_v27 }
 0xdee   :  { %5207 = vmatpush1.bf16.msra.mxu0 %v6645_v21  ;;  %5239 = vmatpush1.bf16.msra.mxu1 %v6648_v57 }
 0xdef   :  { %5241 = vmatprep.subr.bf16.mxu0 %v6557_v46  ;;  %5273 = vmatprep.subr.bf16.mxu1 %v6559_v55 }
 0xea4   :  { %v3326_v2 = vpop.f32.mrb[26].mxu0  ;;  %v3397_v31 = vpop.f32.mrb[26].mxu1 }
 0xea5   :  { %v5346_v61 = vadd.f32 %v3326_v2, %v6701_v11  ;;  %v3328_v38 = vpop.f32.mrb[27].mxu0  ;;  %v3399_v47 = vpop.f32.mrb[27].mxu1  ;;  %v5362_v23 = vadd.f32 %v3397_v31, %v6716_v35 }
 0xea6   :  { %v5347_v56 = vadd.f32 %v3328_v38, %v6705_v42  ;;  %v5363_v13 = vadd.f32 %v3399_v47, %v6711_v40 }
 0xea7   :  { %v4143_v60 = vmul.f32 -1.442695, %v5346_v61 }
 0xea8   :  { %v4144_v63 = vmul.f32 -1.442695, %v5347_v56  ;;  %v4145_v19 = vmul.f32 -1.442695, %v5363_v13  ;;  %v6975_v13 = vld [vmem:[#allocation3 + $0xb] sm:$0x1] }
 0xea9   :  { %5656 = vpow2.f32 %v4143_v60 }
 0xeaa   :  { %5658 = vpow2.f32 %v4144_v63  ;;  %v3823_v63 = vld [vmem:[#allocation3 + $0x9] sm:$0x1] }
 0xeab   :  { %5660 = vpow2.f32 %v4145_v19  ;;  %v6977_v19 = vld [vmem:[#allocation3 + $0xc] sm:$0x1] }
 0xeac   :  { %5662 = vtanh.f32 %v5362_v23 }
 0xeb3   :  { %v5657_v46 = vpop.eup %5656 }
 0xeb4   :  { %v5659_v36 = vpop.eup %5658  ;;  %v3409_v55 = vadd.f32 1.0, %v5657_v46 }
 0xeb5   :  { %v3415_v33 = vadd.f32 1.0, %v5659_v36  ;;  %v5661_v58 = vpop.eup %5660  ;;  %v3838_v36 = vrot.slane %v3823_v63, 7 }
 0xeb6   :  { %5664 = vrcp.f32 %v3409_v55  ;;  %v5663_v4 = vpop.eup %5662  ;;  %v3422_v22 = vadd.f32 1.0, %v5661_v58  ;;  %v6984_v58 = vld [vmem:[#allocation3 + $0xf] sm:$0x1] }
 0xeb7   :  { %5666 = vrcp.f32 %v3415_v33  ;;  %v6982_v33 = vld [vmem:[#allocation3 + $0xe] sm:$0x1] }
 0xeb8   :  { %5668 = vrcp.f32 %v3422_v22  ;;  %v3937_v22 = vrot.slane %v6977_v19, 7 }
 0xec0   :  { %v5665_v37 = vpop.eup %5664 }
 0xec1   :  { %v5667_v9 = vpop.eup %5666  ;;  %v3426_v39 = vmul.f32 %v5665_v37, %v5663_v4  ;;  %v6986_v37 = vld [vmem:[#allocation3 + $0x10] sm:$0x1] }
 0xec2   :  { %v3425_v43 = vmul.f32 %v5667_v9, %v6887_v59  ;;  %v5669_v7 = vpop.eup %5668  ;;  %v6988_v9 = vld [vmem:[#allocation3 + $0x11] sm:$0x1] }
 0xec4   :  { %v6929_v51 = vadd.f32 %v3426_v39, %v3425_v43  ;;  %v3904_v39 = vrot.slane %v6975_v13, 7 }
 0xec6   :  { %5670 = vtanh.f32 %v6929_v51 }
 0xed0   :  { %v5671_v52 = vpop.eup %5670 }
 0xed1   :  { %v3429_v45 = vmul.f32 %v5671_v52, %v5669_v7  ;;  %v6992_v52 = vld [vmem:[#allocation3 + $0x12] sm:$0x1] }
 0xed3   :  { %3430 = vst [vmem:[#allocation3 + $0x28] sm:$0xff] %v3429_v45  ;;  %3500 = vmatmul.mubr.f32.vlgmr.msra.gmra.mrb[28].mxu0 %v3429_v45  ;;  %3571 = vmatmul.mubr.f32.vlgmr.msra.gmra.mrb[28].mxu1 %v3429_v45  ;;  %v6994_v45 = vld [vmem:[#allocation3 + $0x13] sm:$0x1] }
 0xed4   :  { %5243 = vmatpush1.bf16.msra.mxu0 %v6561_v34  ;;  %5275 = vmatpush1.bf16.msra.mxu1 %v6564_v1 }
 0xed5   :  { %5245 = vmatprep.subr.bf16.mxu0 %v6569_v5  ;;  %5277 = vmatprep.subr.bf16.mxu1 %v6571_v30 }
 0xed6   :  { %3674 = vmatprep.mubr.f32.mxu0 %v5926_v0  ;;  %3745 = vmatprep.mubr.f32.mxu1 %v5926_v0 }
 0xed8   :  { %5247 = vmatpush1.bf16.msra.mxu0 %v6573_v17  ;;  %5279 = vmatpush1.bf16.msra.mxu1 %v6576_v8 }
 0xed9   :  { %5249 = vmatprep.subr.bf16.mxu0 %v6581_v53  ;;  %5281 = vmatprep.subr.bf16.mxu1 %v6583_v3 }
 0xedc   :  { %5251 = vmatpush1.bf16.msra.mxu0 %v6585_v6  ;;  %5283 = vmatpush1.bf16.msra.mxu1 %v6588_v16 }
 0xedd   :  { %5253 = vmatprep.subr.bf16.mxu0 %v6593_v29  ;;  %5285 = vmatprep.subr.bf16.mxu1 %v6595_v44 }
 0xee0   :  { %5255 = vmatpush1.bf16.msra.mxu0 %v6597_v48  ;;  %5287 = vmatpush1.bf16.msra.mxu1 %v6600_v62 }
 0xee1   :  { %5257 = vmatprep.subr.bf16.mxu0 %v6605_v18  ;;  %5289 = vmatprep.subr.bf16.mxu1 %v6607_v20 }
 0xee4   :  { %5259 = vmatpush1.bf16.msra.mxu0 %v6609_v12  ;;  %5291 = vmatpush1.bf16.msra.mxu1 %v6612_v15 }
 0xee5   :  { %5261 = vmatprep.subr.bf16.mxu0 %v6617_v41  ;;  %5293 = vmatprep.subr.bf16.mxu1 %v6619_v28 }
 0xee8   :  { %5263 = vmatpush1.bf16.msra.mxu0 %v6621_v24  ;;  %5295 = vmatpush1.bf16.msra.mxu1 %v6624_v50 }
 0xee9   :  { %5265 = vmatprep.subr.bf16.mxu0 %v6629_v10  ;;  %5297 = vmatprep.subr.bf16.mxu1 %v6631_v26 }
 0xeec   :  { %5267 = vmatpush1.bf16.msra.mxu0 %v6633_v32  ;;  %5299 = vmatpush1.bf16.msra.mxu1 %v6636_v54 }
 0xeed   :  { %5269 = vmatprep.subr.bf16.mxu0 %v6641_v14  ;;  %5301 = vmatprep.subr.bf16.mxu1 %v6643_v27 }
 0xef0   :  { %5271 = vmatpush1.bf16.msra.mxu0 %v6645_v21  ;;  %5303 = vmatpush1.bf16.msra.mxu1 %v6648_v57 }
 0xfa6   :  { %v3501_v0 = vpop.f32.mrb[28].mxu0  ;;  %v3572_v34 = vpop.f32.mrb[28].mxu1 }
 0xfa7   :  { %v5348_v1 = vadd.f32 %v3501_v0, %v6701_v11  ;;  %v3503_v5 = vpop.f32.mrb[29].mxu0  ;;  %v3574_v30 = vpop.f32.mrb[29].mxu1  ;;  %v5364_v16 = vadd.f32 %v3572_v34, %v6716_v35 }
 0xfa8   :  { %v5349_v17 = vadd.f32 %v3503_v5, %v6705_v42  ;;  %v5365_v3 = vadd.f32 %v3574_v30, %v6711_v40  ;;  %v6999_v5 = vld [vmem:[#allocation3 + $0x15] sm:$0x1]  ;;  %v4003_v30 = vrot.slane %v6982_v33, 7 }
 0xfa9   :  { %v4146_v8 = vmul.f32 -1.442695, %v5348_v1  ;;  %v6997_v1 = vld [vmem:[#allocation3 + $0x14] sm:$0x1] }
 0xfaa   :  { %v4147_v53 = vmul.f32 -1.442695, %v5349_v17  ;;  %v4148_v6 = vmul.f32 -1.442695, %v5365_v3  ;;  %v4036_v17 = vrot.slane %v6984_v58, 7 }
 0xfab   :  { %5672 = vpow2.f32 %v4146_v8  ;;  %v3802_v8 = vrot.slane %v6986_v37, 6  ;;  %v7006_v3 = vld [vmem:[#allocation3 + $0x17] sm:$0x1] }
 0xfac   :  { %5674 = vpow2.f32 %v4147_v53  ;;  %v7004_v53 = vld [vmem:[#allocation3 + $0x16] sm:$0x1] }
 0xfad   :  { %5676 = vpow2.f32 %v4148_v6 }
 0xfae   :  { %5678 = vtanh.f32 %v5364_v16  ;;  %v3783_v16 = vld [vmem:[#allocation3] sm:$0x1] }
 0xfb5   :  { %v5673_v29 = vpop.eup %5672 }
 0xfb6   :  { %v5675_v44 = vpop.eup %5674  ;;  %v3584_v48 = vadd.f32 1.0, %v5673_v29  ;;  %v3822_v29 = vld [vmem:[#allocation3 + $0x1] sm:$0x1] }
 0xfb7   :  { %v3590_v62 = vadd.f32 1.0, %v5675_v44  ;;  %v5677_v18 = vpop.eup %5676  ;;  %v3840_v44 = vrot.slane %v6988_v9, 6 }
 0xfb8   :  { %5680 = vrcp.f32 %v3584_v48  ;;  %v5679_v20 = vpop.eup %5678  ;;  %v3597_v28 = vadd.f32 1.0, %v5677_v18  ;;  %v3873_v48 = vrot.slane %v6992_v52, 6  ;;  %v3786_v18 = vld [vmem:[#allocation3 + $0x18] sm:$0x1]  ;;  %v7047_v52 = vld [vmem:[#allocation3 + $0x25] sm:$0x1] }
 0xfb9   :  { %5682 = vrcp.f32 %v3590_v62  ;;  %v3906_v62 = vrot.slane %v6994_v45, 6 }
 0xfba   :  { %5684 = vrcp.f32 %v3597_v28  ;;  %v3972_v28 = vrot.slane %v6999_v5, 6 }
 0xfc2   :  { %v5681_v12 = vpop.eup %5680 }
 0xfc3   :  { %v5683_v15 = vpop.eup %5682  ;;  %v3601_v41 = vmul.f32 %v5681_v12, %v5679_v20  ;;  %v7011_v20 = vld [vmem:[#allocation3 + $0x19] sm:$0x1]  ;;  %v3855_v12 = vld [vmem:[#allocation3 + $0x2] sm:$0x1] }
 0xfc4   :  { %v3600_v24 = vmul.f32 %v5683_v15, %v6929_v51  ;;  %v5685_v10 = vpop.eup %5684  ;;  %v3888_v15 = vld [vmem:[#allocation3 + $0x3] sm:$0x1] }
 0xfc6   :  { %v3602_v50 = vadd.f32 %v3601_v41, %v3600_v24  ;;  %v3939_v41 = vrot.slane %v6997_v1, 6  ;;  %v3858_v24 = vld [vmem:[#allocation3 + $0x1a] sm:$0x1]  ;;  %v7054_v1 = vld [vmem:[#allocation3 + $0x28] sm:$0x1] }
 0xfc8   :  { %5686 = vtanh.f32 %v3602_v50 }
 0xfd2   :  { %v5687_v26 = vpop.eup %5686 }
 0xfd3   :  { %v3604_v32 = vmul.f32 %v5687_v26, %v5685_v10  ;;  %v3954_v10 = vld [vmem:[#allocation3 + $0x5] sm:$0x1]  ;;  %v3987_v26 = vld [vmem:[#allocation3 + $0x6] sm:$0x1] }
 0xfd4   :  { %v4004_v13 = vsel %vm3800_vm0, %v4003_v30, %v3987_v26  ;;  %v7057_v30 = vld [vmem:[#allocation3 + $0x29] sm:$0x1] }
 0xfd5   :  { %3605 = vst [vmem:[#allocation3 + $0x30] sm:$0xff] %v3604_v32  ;;  %3675 = vmatmul.mubr.f32.vlgmr.msra.gmra.mrb[30].mxu0 %v3604_v32  ;;  %3746 = vmatmul.mubr.f32.vlgmr.msra.gmra.mrb[30].mxu1 %v3604_v32  ;;  %v4005_v32 = vrot.slane %v7004_v53, 6 }
0x10a8   :  { %v3676_v54 = vpop.f32.mrb[30].mxu0  ;;  %v3747_v14 = vpop.f32.mrb[30].mxu1 }
0x10a9   :  { %v5350_v27 = vadd.f32 %v3676_v54, %v6701_v11  ;;  %v3678_v21 = vpop.f32.mrb[31].mxu0  ;;  %v3749_v57 = vpop.f32.mrb[31].mxu1  ;;  %v5366_v61 = vadd.f32 %v3747_v14, %v6716_v35  ;;  %v3784_v11 = vld [vmem:[#allocation3 + $0x8] sm:$0x1]  ;;  %v6979_v35 = vld [vmem:[#allocation3 + $0xd] sm:$0x1] }
0x10aa   :  { %v5351_v59 = vadd.f32 %v3678_v21, %v6705_v42  ;;  %v5367_v2 = vadd.f32 %v3749_v57, %v6711_v40  ;;  %v6973_v42 = vld [vmem:[#allocation3 + $0xa] sm:$0x1]  ;;  %v3799_v23 = vrot.slane %v3784_v11, 7  ;;  %v3970_v0 = vrot.slane %v6979_v35, 7  ;;  %v4020_v54 = vld [vmem:[#allocation3 + $0x7] sm:$0x1] }
0x10ab   :  { %v4149_v49 = vmul.f32 -1.442695, %v5350_v27  ;;  %v3871_v55 = vrot.slane %v6973_v42, 7  ;;  %v4038_v14 = vrot.slane %v7006_v3, 6  ;;  %v3839_v21 = vsel %vm3800_vm0, %v3838_v36, %v3822_v29  ;;  %v3891_v57 = vld [vmem:[#allocation3 + $0x1b] sm:$0x1] }
0x10ac   :  { %v4150_v25 = vmul.f32 -1.442695, %v5351_v59  ;;  %v4151_v31 = vmul.f32 -1.442695, %v5367_v2  ;;  %v3801_v27 = vsel %vm3800_vm0, %v3799_v23, %v3783_v16  ;;  %v3924_v59 = vld [vmem:[#allocation3 + $0x1c] sm:$0x1]  ;;  %v3971_v42 = vsel %vm3800_vm0, %v3970_v0, %v3954_v10 }
0x10ad   :  { %5688 = vpow2.f32 %v4149_v49  ;;  %v3957_v49 = vld [vmem:[#allocation3 + $0x1d] sm:$0x1]  ;;  %v3842_v2 = vrot.slane %v7011_v20, 5  ;;  %v7028_v11 = vld [vmem:[#allocation3 + $0x22] sm:$0x1]  ;;  %v4037_v19 = vsel %vm3800_vm0, %v4036_v17, %v4020_v54  ;;  %v3908_v23 = vrot.slane %v3891_v57, 5 }
0x10ae   :  { %5690 = vpow2.f32 %v4150_v25  ;;  %v3805_v25 = vrot.slane %v3786_v18, 5  ;;  %v3941_v35 = vrot.slane %v3924_v59, 5  ;;  %v3804_v36 = vsel %vm3803_vm1, %v3802_v8, %v3801_v27  ;;  %v7050_v0 = vld [vmem:[#allocation3 + $0x26] sm:$0x1]  ;;  %v7063_v16 = vld [vmem:[#allocation3 + $0x2a] sm:$0x1] }
0x10af   :  { %5692 = vpow2.f32 %v4151_v31  ;;  %v3872_v31 = vsel %vm3800_vm0, %v3871_v55, %v3855_v12  ;;  %v7035_v55 = vld [vmem:[#allocation3 + $0x23] sm:$0x1]  ;;  %v3841_v37 = vsel %vm3803_vm1, %v3840_v44, %v3839_v21  ;;  %v3973_v45 = vsel %vm3803_vm1, %v3972_v28, %v3971_v42  ;;  %v7066_v44 = vld [vmem:[#allocation3 + $0x2b] sm:$0x1]  ;;  %v7070_v20 = vld [vmem:[#allocation3 + $0x2c] sm:$0x1] }
0x10b0   :  { %5694 = vtanh.f32 %v5366_v61  ;;  %v3905_v61 = vsel %vm3800_vm0, %v3904_v39, %v3888_v15  ;;  %v3877_v39 = vrot.slane %v7028_v11, 4  ;;  %v3807_v5 = vsel %vm3806_vm2, %v3805_v25, %v3804_v36  ;;  %v7073_v15 = vld [vmem:[#allocation3 + $0x2d] sm:$0x1]  ;;  %v7080_v10 = vld [vmem:[#allocation3 + $0x2e] sm:$0x1] }
0x10b1   :  { %v3910_v17 = vrot.slane %v7035_v55, 4  ;;  %v4006_v8 = vsel %vm3803_vm1, %v4005_v32, %v4004_v13  ;;  %v4039_v53 = vsel %vm3803_vm1, %v4038_v14, %v4037_v19  ;;  %v3976_v28 = vrot.slane %v7047_v52, 4  ;;  %v7083_v32 = vld [vmem:[#allocation3 + $0x2f] sm:$0x1]  ;;  %v7092_v59 = vld [vmem:[#allocation3 + $0x30] sm:$0x1] }
0x10b2   :  { %v3811_v14 = vrot.slane %v7054_v1, 3  ;;  %v3846_v27 = vrot.slane %v7057_v30, 3  ;;  %v3879_v21 = vrot.slane %v7063_v16, 3  ;;  %v3912_v57 = vrot.slane %v7066_v44, 3  ;;  %v7095_v25 = vld [vmem:[#allocation3 + $0x31] sm:$0x1] }
0x10b7   :  { %v5689_v38 = vpop.eup %5688 }
0x10b8   :  { %v5691_v47 = vpop.eup %5690  ;;  %v3759_v56 = vadd.f32 1.0, %v5689_v38  ;;  %v3990_v38 = vld [vmem:[#allocation3 + $0x1e] sm:$0x1] }
0x10b9   :  { %v3765_v60 = vadd.f32 1.0, %v5691_v47  ;;  %v5693_v40 = vpop.eup %5692  ;;  %v7022_v47 = vld [vmem:[#allocation3 + $0x1f] sm:$0x1]  ;;  %v4007_v33 = vrot.slane %v3990_v38, 5 }
0x10ba   :  { %5696 = vrcp.f32 %v3759_v56  ;;  %v5695_v46 = vpop.eup %5694  ;;  %v3772_v7 = vadd.f32 1.0, %v5693_v40  ;;  %v7024_v56 = vld [vmem:[#allocation3 + $0x20] sm:$0x1]  ;;  %v3875_v40 = vrot.slane %v3858_v24, 5  ;;  %v4040_v58 = vrot.slane %v7022_v47, 5 }
0x10bb   :  { %5698 = vrcp.f32 %v3765_v60  ;;  %v7026_v60 = vld [vmem:[#allocation3 + $0x21] sm:$0x1]  ;;  %v4009_v24 = vrot.slane %v7050_v0, 4  ;;  %v4008_v26 = vsel %vm3806_vm2, %v4007_v33, %v4006_v8 }
0x10bc   :  { %5700 = vrcp.f32 %v3772_v7  ;;  %v3844_v9 = vrot.slane %v7026_v60, 4 }
0x10c4   :  { %v5697_v4 = vpop.eup %5696 }
0x10c5   :  { %v5699_v43 = vpop.eup %5698  ;;  %v3776_v51 = vmul.f32 %v5697_v4, %v5695_v46  ;;  %v3974_v46 = vrot.slane %v3957_v49, 5  ;;  %v3808_v4 = vrot.slane %v7024_v56, 4 }
0x10c6   :  { %v3775_v34 = vmul.f32 %v5699_v43, %v3602_v50  ;;  %v3921_v50 = vld [vmem:[#allocation3 + $0x4] sm:$0x1]  ;;  %v3874_v43 = vsel %vm3803_vm1, %v3873_v48, %v3872_v31  ;;  %v5701_v3 = vpop.eup %5700  ;;  %v3978_v31 = vrot.slane %v7073_v15, 3 }
0x10c7   :  { %v3938_v63 = vsel %vm3800_vm0, %v3937_v22, %v3921_v50  ;;  %v7042_v22 = vld [vmem:[#allocation3 + $0x24] sm:$0x1]  ;;  %v3876_v29 = vsel %vm3806_vm2, %v3875_v40, %v3874_v43  ;;  %v3810_v49 = vsel %vm3809_vm3, %v3808_v4, %v3807_v5 }
0x10c8   :  { %v3777_v6 = vadd.f32 %v3776_v51, %v3775_v34  ;;  %v3907_v51 = vsel %vm3803_vm1, %v3906_v62, %v3905_v61  ;;  %v3940_v7 = vsel %vm3803_vm1, %v3939_v41, %v3938_v63  ;;  %v7052_v34 = vld [vmem:[#allocation3 + $0x27] sm:$0x1]  ;;  %v3943_v62 = vrot.slane %v7042_v22, 4 }
0x10c9   :  { %v3909_v48 = vsel %vm3806_vm2, %v3908_v23, %v3907_v51  ;;  %v3942_v12 = vsel %vm3806_vm2, %v3941_v35, %v3940_v7  ;;  %v3975_v41 = vsel %vm3806_vm2, %v3974_v46, %v3973_v45  ;;  %v4042_v54 = vrot.slane %v7052_v34, 4 }
0x10ca   :  { %5702 = vtanh.f32 %v3777_v6  ;;  %3782 = vst [vmem:[#allocation18 + $0x8] sm:$0xff] %v3777_v6  ;;  %v3843_v6 = vsel %vm3806_vm2, %v3842_v2, %v3841_v37  ;;  %v3945_v2 = vrot.slane %v7070_v20, 3  ;;  %v4041_v61 = vsel %vm3806_vm2, %v4040_v58, %v4039_v53 }
0x10d4   :  { %v5703_v18 = vpop.eup %5702 }
0x10d5   :  { %v3779_v50 = vmul.f32 %v5703_v18, %v5701_v3 }
0x10d7   :  { %3780 = vst [vmem:[#allocation3 + $0x38] sm:$0xff] %v3779_v50  ;;  %3781 = vst [vmem:[#allocation16 + $0x8] sm:$0xff] %v3779_v50 }
0x10d8   :  { %5847 = shalt.err (!%p5844_p10)
}
0x10d9   :  { %s5848_s19 = scalar_lea.hbm %s7202_s8, 256 }
0x10da   :  { %p5849_p11 = scmp.ne.s32.totalorder %s7202_s8, %s5848_s19  ;;  %p5852_p12 = scmp.lt.u32.totalorder %s5848_s19, %s7202_s8 }
0x10dc   :  { %p5854_p13 = pnand %p5852_p12, %p5849_p11 }
0x10de   :  { %5857 = shalt.err (!%p5854_p13)
}
0x10df   :  { %4076 = dma.vmem_to_hbm [thread:$0]  %s7078_s25, 256, %s7202_s8, [#allocation17], %s5919_s3, %s5919_s3, %s5920_s24   ;;  %v3845_v38 = vsel %vm3809_vm3, %v3844_v9, %v3843_v6  ;;  %v3861_v47 = vld [vmem:[#allocation3 + $0x32] sm:$0x1]  ;;  %v3878_v56 = vsel %vm3809_vm3, %v3877_v39, %v3876_v29  ;;  %v4011_v63 = vrot.slane %v7080_v10, 3  ;;  %v4044_v42 = vrot.slane %v7083_v32, 3 }
0x10e0   :  { %v3894_v13 = vld [vmem:[#allocation3 + $0x33] sm:$0x1]  ;;  %v3911_v19 = vsel %vm3809_vm3, %v3910_v17, %v3909_v48  ;;  %v3927_v40 = vld [vmem:[#allocation3 + $0x34] sm:$0x1]  ;;  %v3944_v23 = vsel %vm3809_vm3, %v3943_v62, %v3942_v12  ;;  %v3977_v35 = vsel %vm3809_vm3, %v3976_v28, %v3975_v41  ;;  %v4010_v60 = vsel %vm3809_vm3, %v4009_v24, %v4008_v26  ;;  %s5858_s8 = scalar_lea.vmem %s7090_s28, 256  ;;  %p5863_p1 = scmp.lt.s32.totalorder %s7090_s28, %s7090_s28 }
0x10e1   :  { %p5859_p0 = scmp.ne.s32.totalorder %s7090_s28, %s5858_s8  ;;  %p5864_p2 = scmp.lt.s32.totalorder %s5858_s8, %s5858_s8 }
0x10e3   :  { %p5865_p3 = por %p5864_p2, %p5863_p1 }
0x10e5   :  { %p5866_p4 = pnand %p5865_p3, %p5859_p0 }
0x10e7   :  { %5869 = shalt.err (!%p5866_p4)
}
0x10e8   :  { %s5870_s17 = scalar_lea.hbm %s7203_s9, 256 }
0x10e9   :  { %p5871_p5 = scmp.ne.s32.totalorder %s7203_s9, %s5870_s17  ;;  %p5874_p6 = scmp.lt.u32.totalorder %s5870_s17, %s7203_s9 }
0x10eb   :  { %p5876_p7 = pnand %p5874_p6, %p5871_p5 }
0x10ed   :  { %5879 = shalt.err (!%p5876_p7)
}
0x10ee   :  { %4088 = dma.vmem_to_hbm [thread:$0]  %s7090_s28, 256, %s7203_s9, [#allocation17], %s5919_s3, %s5919_s3, %s5920_s24   ;;  %v3813_v11 = vsel %vm3812_vm4, %v3811_v14, %v3810_v49  ;;  %v3814_v46 = vrot.slane %v7092_v59, 2  ;;  %v3848_v36 = vrot.slane %v7095_v25, 2  ;;  %v3960_v55 = vld [vmem:[#allocation3 + $0x35] sm:$0x1]  ;;  %v4043_v58 = vsel %vm3809_vm3, %v4042_v54, %v4041_v61 }
0x10ef   :  { %v3993_v33 = vld [vmem:[#allocation3 + $0x36] sm:$0x1]  ;;  %vm3815_vm5 = vcmask 1046534   ;;  %v3847_v4 = vsel %vm3812_vm4, %v3846_v27, %v3845_v38  ;;  %v3880_v37 = vsel %vm3812_vm4, %v3879_v21, %v3878_v56  ;;  %v3913_v9 = vsel %vm3812_vm4, %v3912_v57, %v3911_v19  ;;  %v4026_v7 = vld [vmem:[#allocation3 + $0x37] sm:$0x1]  ;;  %s5929_s9 = smov [#allocation15]  }
0x10f0   :  { %v3881_v39 = vrot.slane %v3861_v47, 2  ;;  %v3914_v22 = vrot.slane %v3894_v13, 2  ;;  %v3946_v43 = vsel %vm3812_vm4, %v3945_v2, %v3944_v23  ;;  %v3947_v51 = vrot.slane %v3927_v40, 2  ;;  %v3790_v34 = vld [vmem:[#allocation3 + $0x38] sm:$0x1]  ;;  %s4058_s21 = sshll.u32 %s5929_s9, 4  ;;  %s4059_s21 = int_to_ptr.vmem [resolvable:$true] %s4058_s21 }
0x10f1   :  { %vm3818_vm6 = vcmask 1047559   ;;  %v3979_v52 = vsel %vm3812_vm4, %v3978_v31, %v3977_v35  ;;  %v3980_v45 = vrot.slane %v3960_v55, 2  ;;  %v4013_v0 = vrot.slane %v3993_v33, 2  ;;  %v3829_v5 = vld [vmem:[#allocation3 + $0x39] sm:$0x1]  ;;  %s5880_s22 = scalar_lea.vmem %s4059_s21, 1024  ;;  %p5885_p9 = scmp.lt.s32.totalorder %s4059_s21, %s4059_s21 }
0x10f2   :  { %v3816_v1 = vsel %vm3815_vm5, %v3814_v46, %v3813_v11  ;;  %v3849_v30 = vsel %vm3815_vm5, %v3848_v36, %v3847_v4  ;;  %v3862_v17 = vld [vmem:[#allocation3 + $0x3a] sm:$0x1]  ;;  %v4012_v8 = vsel %vm3812_vm4, %v4011_v63, %v4010_v60  ;;  %v4045_v53 = vsel %vm3812_vm4, %v4044_v42, %v4043_v58  ;;  %v3895_v29 = vld [vmem:[#allocation3 + $0x3b] sm:$0x1]  ;;  %v3928_v20 = vld [vmem:[#allocation3 + $0x3c] sm:$0x1]  ;;  %p5881_p8 = scmp.ne.s32.totalorder %s4059_s21, %s5880_s22  ;;  %p5886_p10 = scmp.lt.s32.totalorder %s5880_s22, %s5880_s22 }
0x10f3   :  { %v3817_v3 = vrot.slane %v3790_v34, 1  ;;  %v3850_v6 = vrot.slane %v3829_v5, 1  ;;  %v3883_v16 = vrot.slane %v3862_v17, 1  ;;  %v4046_v44 = vrot.slane %v4026_v7, 2  ;;  %v3961_v15 = vld [vmem:[#allocation3 + $0x3d] sm:$0x1] }
0x10f4   :  { %v3882_v48 = vsel %vm3815_vm5, %v3881_v39, %v3880_v37  ;;  %v3915_v62 = vsel %vm3815_vm5, %v3914_v22, %v3913_v9  ;;  %v3916_v18 = vrot.slane %v3895_v29, 1  ;;  %v3948_v12 = vsel %vm3815_vm5, %v3947_v51, %v3946_v43  ;;  %v3994_v10 = vld [vmem:[#allocation3 + $0x3e] sm:$0x1]  ;;  %v4027_v26 = vld [vmem:[#allocation3 + $0x3f] sm:$0x1]  ;;  %p5887_p11 = por %p5886_p10, %p5885_p9 }
0x10f5   :  { %v3819_v41 = vsel %vm3818_vm6, %v3817_v3, %v3816_v1  ;;  %v3851_v28 = vsel %vm3818_vm6, %v3850_v6, %v3849_v30  ;;  %v3884_v24 = vsel %vm3818_vm6, %v3883_v16, %v3882_v48  ;;  %v3949_v50 = vrot.slane %v3928_v20, 1 }
0x10f6   :  { %3821 = vst [vmem:[#allocation15] sm:$0xff] %v3819_v41  ;;  %3854 = vst [vmem:[#allocation15 + $0x8] sm:$0xff] %v3851_v28  ;;  %v3917_v32 = vsel %vm3818_vm6, %v3916_v18, %v3915_v62  ;;  %v3982_v54 = vrot.slane %v3961_v15, 1  ;;  %v4015_v14 = vrot.slane %v3994_v10, 1  ;;  %v4048_v27 = vrot.slane %v4027_v26, 1  ;;  %p5888_p12 = pnand %p5887_p11, %p5881_p8 }
0x10f7   :  { %3887 = vst [vmem:[#allocation15 + $0x10] sm:$0xff] %v3884_v24  ;;  %3920 = vst [vmem:[#allocation15 + $0x18] sm:$0xff] %v3917_v32  ;;  %v3950_v21 = vsel %vm3818_vm6, %v3949_v50, %v3948_v12  ;;  %v3981_v57 = vsel %vm3815_vm5, %v3980_v45, %v3979_v52  ;;  %v4014_v59 = vsel %vm3815_vm5, %v4013_v0, %v4012_v8 }
0x10f8   :  { %v4047_v49 = vsel %vm3815_vm5, %v4046_v44, %v4045_v53  ;;  %3953 = vst [vmem:[#allocation15 + $0x20] sm:$0xff] %v3950_v21  ;;  %v3983_v25 = vsel %vm3818_vm6, %v3982_v54, %v3981_v57  ;;  %v4016_v2 = vsel %vm3818_vm6, %v4015_v14, %v4014_v59 }
0x10f9   :  { %v4049_v31 = vsel %vm3818_vm6, %v4048_v27, %v4047_v49  ;;  %3986 = vst [vmem:[#allocation15 + $0x28] sm:$0xff] %v3983_v25  ;;  %4019 = vst [vmem:[#allocation15 + $0x30] sm:$0xff] %v4016_v2 }
0x10fa   :  { %4052 = vst [vmem:[#allocation15 + $0x38] sm:$0xff] %v4049_v31 }
0x10fb   :  { %5891 = shalt.err (!%p5888_p12)
}
0x10fc   :  { %s5892_s25 = scalar_lea.hbm %s7201_s7, 1024 }
0x10fd   :  { %p5893_p13 = scmp.ne.s32.totalorder %s7201_s7, %s5892_s25  ;;  %p5896_p0 = scmp.lt.u32.totalorder %s5892_s25, %s7201_s7 }
0x10ff   :  { %p5898_p1 = pnand %p5896_p0, %p5893_p13 }
0x1101   :  { %5901 = shalt.err (!%p5898_p1)
}
0x1102   :  { %4064 = dma.vmem_to_hbm [thread:$0]  %s4059_s21, 1024, %s7201_s7, [#allocation6], %s5919_s3, %s5919_s3, %s5920_s24  }
0x1103   :  { %5910 = dma.done.wait [#allocation6], 1024  }
0x1104   :  { %5911 = vsyncadd [#allocation6], 4294966272 }
0x1105   :  { %5912 = dma.done.wait [#allocation17], 512  }
0x1106   :  { %5913 = vsyncadd [#allocation17], 4294966784 }
0x1107   :  { %4098 = vsyncpa [#allocation5], 1 }
0x1108   :  { %4099 = vsyncpa [#allocation8], 1 }
0x1109   :  { %4100 = vsyncpa [#allocation11], 1 }
0x110a   :  { %4101 = vsyncpa [#allocation14], 1 }
0x110b   :  { %4102 = vsyncpa [#allocation6], 1 }
0x110c   :  { %4103 = vsyncpa [#allocation17], 1 }

</bundles_post_ra>
